<compile_context>
chip_gen: v5e
topology: v5e:2x2
jax: 0.10.0
libtpu: 0.0.40
codegen_flags: <defaults>
</compile_context>

<pallas_src>
import numpy as np
import jax
import jax.numpy as jnp
from jax import lax
from jax.experimental import pallas as pl
from jax.experimental.pallas import tpu as pltpu

GW = 128   # lane width of one fused gate block (both LSTMs' gate + padding)
NG = 4     # gates in PyTorch order: i, f, g, o


# --------------------------- fused forward kernel ---------------------------
def fused_forward_kernel(x_ref, qf_ref, qt_ref,
                         win_ref, win2_ref, whh_ref, b_ref,
                         wp_ref, b1_ref, w2_ref, b2_ref, w3_ref, b3_ref,
                         out_ref, gx_sc):
    # x_ref    : (T, N, D)      trajectories, seq-first
    # qf/qt    : (Q, 1) int32   query indices
    # win_ref  : (D, 4*GW)      fused padded input->gate weights (ta1 & ta2)
    # win2_ref : (D, 4*GW)      ta2-only blocks (folds the x - x[0] shift)
    # whh_ref  : (GW, 4*GW)     block-diagonal recurrent weights, h = [h1|h2|0]
    # b_ref    : (1, 4*GW)      combined biases (b_ih + b_hh), padded
    # wp_ref   : (GW, 2*M1)     layer1 weights pre-split so gather+concat become
    #                           two one-hot matmuls (Pa/Pb trick)
    # b1/w2/b2/w3/b3            remaining MLP parameters
    # gx_sc    : (T, N, 4*GW)   VMEM scratch for the hoisted input projection
    T, N, _ = x_ref.shape
    Q = qf_ref.shape[0]
    M1 = b1_ref.shape[1]

    def sig(z):  # tanh-form sigmoid: one EUP op per vreg (avoids exp + recip)
        return 0.5 * jnp.tanh(0.5 * z) + 0.5

    # ---- 1. Input projection hoisted out of the recurrence (no serial dep). ----
    # ta2 runs on (x_t - x_0); since (x_t - x_0) @ Wih2 = x_t @ Wih2 - x_0 @ Wih2,
    # the shift folds into a per-row bias adjustment -> one matmul per timestep.
    badj = b_ref[...] - jnp.dot(x_ref[0], win2_ref[...],
                                preferred_element_type=jnp.float32)        # (N, 4*GW)
    for t in range(T):  # static; iterations independent, fully pipelined on the MXU
        gx_sc[t] = jnp.dot(x_ref[t], win_ref[...],
                           preferred_element_type=jnp.float32) + badj

    # ---- 2. Both LSTMs in lockstep: one block-diag recurrent matmul / step. ----
    # Gate order matches PyTorch (i, f, g, o); each slice below is one vreg and
    # lands on a 128-lane-group boundary (free select, no XLU shuffles).
    def step(t, carry):
        h, c = carry                                                       # (N, GW)
        gates = gx_sc[t] + jnp.dot(h, whh_ref[...],
                                   preferred_element_type=jnp.float32)    # (N, 4*GW)
        i = sig(gates[:, 0 * GW:1 * GW])
        f = sig(gates[:, 1 * GW:2 * GW])
        g = jnp.tanh(gates[:, 2 * GW:3 * GW])
        o = sig(gates[:, 3 * GW:4 * GW])
        c = f * c + i * g
        h = o * jnp.tanh(c)
        return h, c

    zeros = jnp.zeros((N, GW), jnp.float32)   # padding lanes stay exactly 0
    h, _ = lax.fori_loop(0, T, step, (zeros, zeros), unroll=True)

    # ---- 3. MLP head with the q_from/q_to gather + concat fused in. ----
    # union @ W1^T + b1 == sel_from @ (h @ Wp[:, :M1]) + sel_to @ (h @ Wp[:, M1:]) + b1
    papb = jnp.dot(h, wp_ref[...], preferred_element_type=jnp.float32)     # (N, 2*M1)
    col = lax.broadcasted_iota(jnp.int32, (Q, N), 1)
    sel_f = (col == qf_ref[...]).astype(jnp.float32)                       # (Q, N)
    sel_t = (col == qt_ref[...]).astype(jnp.float32)
    z = (jnp.dot(sel_f, papb[:, 0:M1], preferred_element_type=jnp.float32)
         + jnp.dot(sel_t, papb[:, M1:2 * M1], preferred_element_type=jnp.float32)
         + b1_ref[...])                                                    # (Q, 128)
    z = jnp.maximum(z, 0.0)
    z = jnp.dot(z, w2_ref[...], preferred_element_type=jnp.float32) + b2_ref[...]
    z = jnp.maximum(z, 0.0)                                                # (Q, 32)
    # layer3 (32 -> 1): VPU multiply + lane reduction instead of a 1-wide MXU result.
    z3 = jnp.sum(z * w3_ref[...], axis=-1, keepdims=True) + b3_ref[...]    # (Q, 1)
    out_ref[...] = sig(z3)


# ------------------------------ host wrapper --------------------------------
def lstm_mlp_pass(packed, x, q_from, q_to):
    T, N, _ = x.shape
    Q = q_from.shape[0]
    qf = q_from.reshape(Q, 1).astype(jnp.int32)
    qt = q_to.reshape(Q, 1).astype(jnp.int32)
    return pl.pallas_call(
        fused_forward_kernel,
        out_shape=jax.ShapeDtypeStruct((Q, 1), jnp.float32),
        in_specs=[pl.BlockSpec(memory_space=pltpu.MemorySpace.VMEM)] * 13,
        out_specs=pl.BlockSpec(memory_space=pltpu.MemorySpace.VMEM),
        scratch_shapes=[pltpu.VMEM((T, N, NG * GW), jnp.float32)],
    )(x, qf, qt, *packed)


# -------------------------- parameters & packing -----------------------------
def make_raw_params(key, lstm_hidden_dim=48, inp_dim=3):
    """Deterministic torch-layout parameters (synthetic init)."""
    H, D = lstm_hidden_dim, inp_dim
    ks = jax.random.split(key, 5)

    def lstm_p(k):
        k0, k1, k2 = jax.random.split(k, 3)
        w_ih = jax.random.normal(k0, (4 * H, D), jnp.float32) * 0.1
        w_hh = jax.random.normal(k1, (4 * H, H), jnp.float32) * 0.1
        b = jax.random.normal(k2, (4 * H,), jnp.float32) * 0.1  # b_ih + b_hh combined
        return w_ih, w_hh, b

    def linear_p(k, fan_in, fan_out):
        std = (2.0 / (fan_in + fan_out)) ** 0.5      # xavier-normal-ish
        w = jax.random.normal(k, (fan_out, fan_in), jnp.float32) * std
        return w, jnp.zeros((fan_out,), jnp.float32)

    W1, b1 = linear_p(ks[2], 4 * H, 128)
    W2, b2 = linear_p(ks[3], 128, 32)
    W3, b3 = linear_p(ks[4], 32, 1)
    return {"ta1": lstm_p(ks[0]), "ta2": lstm_p(ks[1]),
            "mlp": (W1, b1, W2, b2, W3, b3)}


def pack_params(raw):
    """Build the fused / lane-padded weights used by the kernel (done once)."""
    w_ih1, w_hh1, bb1 = raw["ta1"]
    w_ih2, w_hh2, bb2 = raw["ta2"]
    W1, b1, W2, b2, W3, b3 = raw["mlp"]
    H = w_hh1.shape[1]
    D = w_ih1.shape[1]
    M1 = W1.shape[0]
    assert 2 * H <= GW, "fused gate packing needs both hidden states in one lane group"

    win = jnp.zeros((D, NG * GW), jnp.float32)
    win2 = jnp.zeros((D, NG * GW), jnp.float32)
    whh = jnp.zeros((GW, NG * GW), jnp.float32)
    bvec = jnp.zeros((1, NG * GW), jnp.float32)
    for g in range(4):                       # PyTorch gate order: i, f, g, o
        s, e = g * H, (g + 1) * H
        c0 = g * GW                          # fused gate block: [lstm1 | lstm2 | pad]
        win = win.at[:, c0:c0 + H].set(w_ih1[s:e].T)
        win = win.at[:, c0 + H:c0 + 2 * H].set(w_ih2[s:e].T)
        win2 = win2.at[:, c0 + H:c0 + 2 * H].set(w_ih2[s:e].T)
        whh = whh.at[0:H, c0:c0 + H].set(w_hh1[s:e].T)
        whh = whh.at[H:2 * H, c0 + H:c0 + 2 * H].set(w_hh2[s:e].T)
        bvec = bvec.at[0, c0:c0 + H].set(bb1[s:e])
        bvec = bvec.at[0, c0 + H:c0 + 2 * H].set(bb2[s:e])

    # layer1 weight pre-split: union = [h1[qf] | h1[qt] | h2[qf] | h2[qt]]
    #   Pa columns gather everything multiplied by rows selected via q_from,
    #   Pb columns everything selected via q_to.  Carry layout: h = [h1 | h2 | 0].
    W1t = W1.T                                # (4H, 128)
    wp = jnp.zeros((GW, 2 * M1), jnp.float32)
    wp = wp.at[0:H, 0:M1].set(W1t[0:H])                  # h1 -> Pa (q_from part)
    wp = wp.at[H:2 * H, 0:M1].set(W1t[2 * H:3 * H])      # h2 -> Pa
    wp = wp.at[0:H, M1:2 * M1].set(W1t[H:2 * H])         # h1 -> Pb (q_to part)
    wp = wp.at[H:2 * H, M1:2 * M1].set(W1t[3 * H:4 * H]) # h2 -> Pb

    return (win, win2, whh, bvec, wp,
            b1.reshape(1, -1), W2.T, b2.reshape(1, -1),
            W3.reshape(1, -1), b3.reshape(1, 1))


# --------------------------- numpy reference (f64) ---------------------------
def reference_forward(raw, x, q_from, q_to):
    x = np.asarray(x, np.float64)

    def sig(z):
        return 1.0 / (1.0 + np.exp(-z))

    def lstm(xs, w_ih, w_hh, b):
        w_ih = np.asarray(w_ih, np.float64)
        w_hh = np.asarray(w_hh, np.float64)
        b = np.asarray(b, np.float64)
        T, N, _ = xs.shape
        H = w_hh.shape[1]
        h = np.zeros((N, H)); c = np.zeros((N, H))
        for t in range(T):
            gates = xs[t] @ w_ih.T + h @ w_hh.T + b
            i = sig(gates[:, 0:H]); f = sig(gates[:, H:2 * H])
            g = np.tanh(gates[:, 2 * H:3 * H]); o = sig(gates[:, 3 * H:4 * H])
            c = f * c + i * g
            h = o * np.tanh(c)
        return h

    h1 = lstm(x, *raw["ta1"])
    h2 = lstm(x - x[0], *raw["ta2"])
    qf = np.asarray(q_from); qt = np.asarray(q_to)
    W1, b1, W2, b2, W3, b3 = [np.asarray(a, np.float64) for a in raw["mlp"]]
    u = np.concatenate([h1[qf], h1[qt], h2[qf], h2[qt]], axis=1)
    z = np.maximum(u @ W1.T + b1, 0.0)
    z = np.maximum(z @ W2.T + b2, 0.0)
    return sig(z @ W3.T + b3)


# ----------------------------------- main ------------------------------------
if __name__ == "__main__":
    key = jax.random.PRNGKey(0)
    k_x, k_p = jax.random.split(key)

    T, N, D = 8, 6, 3          # seq_len, num trajectories, inp_dim
    H = 48                     # lstm_hidden_dim (module default)
    Q = 4                      # number of (q_from, q_to) query pairs

    x = jax.random.normal(k_x, (T, N, D), jnp.float32)
    q_from = jnp.array([0, 1, 2, 3], dtype=jnp.int32)
    q_to = jnp.array([5, 4, 3, 2], dtype=jnp.int32)

    raw = make_raw_params(k_p, lstm_hidden_dim=H, inp_dim=D)
    packed = pack_params(raw)

    fwd = jax.jit(lstm_mlp_pass)
    out = jax.block_until_ready(fwd(packed, x, q_from, q_to))

    assert out.shape == (Q, 1)
    assert bool(jnp.all(jnp.isfinite(out)))
    assert bool(jnp.all((out >= 0.0) & (out <= 1.0)))

    ref = reference_forward(raw, x, q_from, q_to)
    assert np.allclose(np.asarray(out), ref, atol=2e-3, rtol=2e-3), (
        "max abs err", float(np.max(np.abs(np.asarray(out) - ref))))

    print("KERNEL_OK")
</pallas_src>

<mosaic_0001>
module attributes {stable_mosaic.version = 11 : i64} {
  func.func @fused_forward_kernel(%arg0: memref<8x6x3xf32, #tpu.memory_space<vmem>>, %arg1: memref<4x1xi32, #tpu.memory_space<vmem>>, %arg2: memref<4x1xi32, #tpu.memory_space<vmem>>, %arg3: memref<3x512xf32, #tpu.memory_space<vmem>>, %arg4: memref<3x512xf32, #tpu.memory_space<vmem>>, %arg5: memref<128x512xf32, #tpu.memory_space<vmem>>, %arg6: memref<1x512xf32, #tpu.memory_space<vmem>>, %arg7: memref<128x256xf32, #tpu.memory_space<vmem>>, %arg8: memref<1x128xf32, #tpu.memory_space<vmem>>, %arg9: memref<128x32xf32, #tpu.memory_space<vmem>>, %arg10: memref<1x32xf32, #tpu.memory_space<vmem>>, %arg11: memref<1x32xf32, #tpu.memory_space<vmem>>, %arg12: memref<1x1xf32, #tpu.memory_space<vmem>>, %arg13: memref<4x1xf32, #tpu.memory_space<vmem>>, %arg14: memref<8x6x512xf32, #tpu.memory_space<vmem>>) attributes {dimension_semantics = [], scalar_prefetch = 0 : i64, scratch_operands = 1 : i64, tpu.core_type = #tpu.core_type<tc>} {
    %c0 = arith.constant 0 : index
    %c0_0 = arith.constant 0 : index
    %0 = vector.load %arg6[%c0, %c0_0] : memref<1x512xf32, #tpu.memory_space<vmem>>, vector<1x512xf32>
    %c0_1 = arith.constant 0 : index
    %c0_2 = arith.constant 0 : index
    %c0_3 = arith.constant 0 : index
    %1 = vector.load %arg0[%c0_1, %c0_2, %c0_3] : memref<8x6x3xf32, #tpu.memory_space<vmem>>, vector<1x6x3xf32>
    %2 = vector.shape_cast %1 : vector<1x6x3xf32> to vector<6x3xf32>
    %c0_4 = arith.constant 0 : index
    %c0_5 = arith.constant 0 : index
    %3 = vector.load %arg4[%c0_4, %c0_5] : memref<3x512xf32, #tpu.memory_space<vmem>>, vector<3x512xf32>
    %cst = arith.constant dense<0.000000e+00> : vector<6x512xf32>
    %4 = tpu.matmul %2, %3, %cst {dimension_numbers = #tpu.dot_dimension_numbers<[1], [0], [0], [1], [0, 0, 1, 1], [], []>} : vector<6x3xf32>, vector<3x512xf32>, vector<6x512xf32> -> vector<6x512xf32>
    %5 = vector.broadcast %0 : vector<1x512xf32> to vector<6x512xf32>
    %6 = arith.subf %5, %4 : vector<6x512xf32>
    %c0_6 = arith.constant 0 : index
    %c0_7 = arith.constant 0 : index
    %c0_8 = arith.constant 0 : index
    %7 = vector.load %arg0[%c0_6, %c0_7, %c0_8] : memref<8x6x3xf32, #tpu.memory_space<vmem>>, vector<1x6x3xf32>
    %8 = vector.shape_cast %7 : vector<1x6x3xf32> to vector<6x3xf32>
    %c0_9 = arith.constant 0 : index
    %c0_10 = arith.constant 0 : index
    %9 = vector.load %arg3[%c0_9, %c0_10] : memref<3x512xf32, #tpu.memory_space<vmem>>, vector<3x512xf32>
    %cst_11 = arith.constant dense<0.000000e+00> : vector<6x512xf32>
    %10 = tpu.matmul %8, %9, %cst_11 {dimension_numbers = #tpu.dot_dimension_numbers<[1], [0], [0], [1], [0, 0, 1, 1], [], []>} : vector<6x3xf32>, vector<3x512xf32>, vector<6x512xf32> -> vector<6x512xf32>
    %11 = arith.addf %10, %6 : vector<6x512xf32>
    %c0_12 = arith.constant 0 : index
    %c0_13 = arith.constant 0 : index
    %c0_14 = arith.constant 0 : index
    %12 = vector.load %arg14[%c0_12, %c0_13, %c0_14] : memref<8x6x512xf32, #tpu.memory_space<vmem>>, vector<1x6x512xf32>
    %13 = vector.shape_cast %12 : vector<1x6x512xf32> to vector<6x512xf32>
    %14 = vector.shape_cast %11 : vector<6x512xf32> to vector<1x6x512xf32>
    tpu.vector_store %arg14[%c0_12, %c0_13, %c0_14], %14 {strides = array<i32>} : memref<8x6x512xf32, #tpu.memory_space<vmem>>, vector<1x6x512xf32>,
    %c1 = arith.constant 1 : index
    %c0_15 = arith.constant 0 : index
    %c0_16 = arith.constant 0 : index
    %15 = vector.load %arg0[%c1, %c0_15, %c0_16] : memref<8x6x3xf32, #tpu.memory_space<vmem>>, vector<1x6x3xf32>
    %16 = vector.shape_cast %15 : vector<1x6x3xf32> to vector<6x3xf32>
    %c0_17 = arith.constant 0 : index
    %c0_18 = arith.constant 0 : index
    %17 = vector.load %arg3[%c0_17, %c0_18] : memref<3x512xf32, #tpu.memory_space<vmem>>, vector<3x512xf32>
    %cst_19 = arith.constant dense<0.000000e+00> : vector<6x512xf32>
    %18 = tpu.matmul %16, %17, %cst_19 {dimension_numbers = #tpu.dot_dimension_numbers<[1], [0], [0], [1], [0, 0, 1, 1], [], []>} : vector<6x3xf32>, vector<3x512xf32>, vector<6x512xf32> -> vector<6x512xf32>
    %19 = arith.addf %18, %6 : vector<6x512xf32>
    %c1_20 = arith.constant 1 : index
    %c0_21 = arith.constant 0 : index
    %c0_22 = arith.constant 0 : index
    %20 = vector.load %arg14[%c1_20, %c0_21, %c0_22] : memref<8x6x512xf32, #tpu.memory_space<vmem>>, vector<1x6x512xf32>
    %21 = vector.shape_cast %20 : vector<1x6x512xf32> to vector<6x512xf32>
    %22 = vector.shape_cast %19 : vector<6x512xf32> to vector<1x6x512xf32>
    tpu.vector_store %arg14[%c1_20, %c0_21, %c0_22], %22 {strides = array<i32>} : memref<8x6x512xf32, #tpu.memory_space<vmem>>, vector<1x6x512xf32>,
    %c2 = arith.constant 2 : index
    %c0_23 = arith.constant 0 : index
    %c0_24 = arith.constant 0 : index
    %23 = vector.load %arg0[%c2, %c0_23, %c0_24] : memref<8x6x3xf32, #tpu.memory_space<vmem>>, vector<1x6x3xf32>
    %24 = vector.shape_cast %23 : vector<1x6x3xf32> to vector<6x3xf32>
    %c0_25 = arith.constant 0 : index
    %c0_26 = arith.constant 0 : index
    %25 = vector.load %arg3[%c0_25, %c0_26] : memref<3x512xf32, #tpu.memory_space<vmem>>, vector<3x512xf32>
    %cst_27 = arith.constant dense<0.000000e+00> : vector<6x512xf32>
    %26 = tpu.matmul %24, %25, %cst_27 {dimension_numbers = #tpu.dot_dimension_numbers<[1], [0], [0], [1], [0, 0, 1, 1], [], []>} : vector<6x3xf32>, vector<3x512xf32>, vector<6x512xf32> -> vector<6x512xf32>
    %27 = arith.addf %26, %6 : vector<6x512xf32>
    %c2_28 = arith.constant 2 : index
    %c0_29 = arith.constant 0 : index
    %c0_30 = arith.constant 0 : index
    %28 = vector.load %arg14[%c2_28, %c0_29, %c0_30] : memref<8x6x512xf32, #tpu.memory_space<vmem>>, vector<1x6x512xf32>
    %29 = vector.shape_cast %28 : vector<1x6x512xf32> to vector<6x512xf32>
    %30 = vector.shape_cast %27 : vector<6x512xf32> to vector<1x6x512xf32>
    tpu.vector_store %arg14[%c2_28, %c0_29, %c0_30], %30 {strides = array<i32>} : memref<8x6x512xf32, #tpu.memory_space<vmem>>, vector<1x6x512xf32>,
    %c3 = arith.constant 3 : index
    %c0_31 = arith.constant 0 : index
    %c0_32 = arith.constant 0 : index
    %31 = vector.load %arg0[%c3, %c0_31, %c0_32] : memref<8x6x3xf32, #tpu.memory_space<vmem>>, vector<1x6x3xf32>
    %32 = vector.shape_cast %31 : vector<1x6x3xf32> to vector<6x3xf32>
    %c0_33 = arith.constant 0 : index
    %c0_34 = arith.constant 0 : index
    %33 = vector.load %arg3[%c0_33, %c0_34] : memref<3x512xf32, #tpu.memory_space<vmem>>, vector<3x512xf32>
    %cst_35 = arith.constant dense<0.000000e+00> : vector<6x512xf32>
    %34 = tpu.matmul %32, %33, %cst_35 {dimension_numbers = #tpu.dot_dimension_numbers<[1], [0], [0], [1], [0, 0, 1, 1], [], []>} : vector<6x3xf32>, vector<3x512xf32>, vector<6x512xf32> -> vector<6x512xf32>
    %35 = arith.addf %34, %6 : vector<6x512xf32>
    %c3_36 = arith.constant 3 : index
    %c0_37 = arith.constant 0 : index
    %c0_38 = arith.constant 0 : index
    %36 = vector.load %arg14[%c3_36, %c0_37, %c0_38] : memref<8x6x512xf32, #tpu.memory_space<vmem>>, vector<1x6x512xf32>
    %37 = vector.shape_cast %36 : vector<1x6x512xf32> to vector<6x512xf32>
    %38 = vector.shape_cast %35 : vector<6x512xf32> to vector<1x6x512xf32>
    tpu.vector_store %arg14[%c3_36, %c0_37, %c0_38], %38 {strides = array<i32>} : memref<8x6x512xf32, #tpu.memory_space<vmem>>, vector<1x6x512xf32>,
    %c4 = arith.constant 4 : index
    %c0_39 = arith.constant 0 : index
    %c0_40 = arith.constant 0 : index
    %39 = vector.load %arg0[%c4, %c0_39, %c0_40] : memref<8x6x3xf32, #tpu.memory_space<vmem>>, vector<1x6x3xf32>
    %40 = vector.shape_cast %39 : vector<1x6x3xf32> to vector<6x3xf32>
    %c0_41 = arith.constant 0 : index
    %c0_42 = arith.constant 0 : index
    %41 = vector.load %arg3[%c0_41, %c0_42] : memref<3x512xf32, #tpu.memory_space<vmem>>, vector<3x512xf32>
    %cst_43 = arith.constant dense<0.000000e+00> : vector<6x512xf32>
    %42 = tpu.matmul %40, %41, %cst_43 {dimension_numbers = #tpu.dot_dimension_numbers<[1], [0], [0], [1], [0, 0, 1, 1], [], []>} : vector<6x3xf32>, vector<3x512xf32>, vector<6x512xf32> -> vector<6x512xf32>
    %43 = arith.addf %42, %6 : vector<6x512xf32>
    %c4_44 = arith.constant 4 : index
    %c0_45 = arith.constant 0 : index
    %c0_46 = arith.constant 0 : index
    %44 = vector.load %arg14[%c4_44, %c0_45, %c0_46] : memref<8x6x512xf32, #tpu.memory_space<vmem>>, vector<1x6x512xf32>
    %45 = vector.shape_cast %44 : vector<1x6x512xf32> to vector<6x512xf32>
    %46 = vector.shape_cast %43 : vector<6x512xf32> to vector<1x6x512xf32>
    tpu.vector_store %arg14[%c4_44, %c0_45, %c0_46], %46 {strides = array<i32>} : memref<8x6x512xf32, #tpu.memory_space<vmem>>, vector<1x6x512xf32>,
    %c5 = arith.constant 5 : index
    %c0_47 = arith.constant 0 : index
    %c0_48 = arith.constant 0 : index
    %47 = vector.load %arg0[%c5, %c0_47, %c0_48] : memref<8x6x3xf32, #tpu.memory_space<vmem>>, vector<1x6x3xf32>
    %48 = vector.shape_cast %47 : vector<1x6x3xf32> to vector<6x3xf32>
    %c0_49 = arith.constant 0 : index
    %c0_50 = arith.constant 0 : index
    %49 = vector.load %arg3[%c0_49, %c0_50] : memref<3x512xf32, #tpu.memory_space<vmem>>, vector<3x512xf32>
    %cst_51 = arith.constant dense<0.000000e+00> : vector<6x512xf32>
    %50 = tpu.matmul %48, %49, %cst_51 {dimension_numbers = #tpu.dot_dimension_numbers<[1], [0], [0], [1], [0, 0, 1, 1], [], []>} : vector<6x3xf32>, vector<3x512xf32>, vector<6x512xf32> -> vector<6x512xf32>
    %51 = arith.addf %50, %6 : vector<6x512xf32>
    %c5_52 = arith.constant 5 : index
    %c0_53 = arith.constant 0 : index
    %c0_54 = arith.constant 0 : index
    %52 = vector.load %arg14[%c5_52, %c0_53, %c0_54] : memref<8x6x512xf32, #tpu.memory_space<vmem>>, vector<1x6x512xf32>
    %53 = vector.shape_cast %52 : vector<1x6x512xf32> to vector<6x512xf32>
    %54 = vector.shape_cast %51 : vector<6x512xf32> to vector<1x6x512xf32>
    tpu.vector_store %arg14[%c5_52, %c0_53, %c0_54], %54 {strides = array<i32>} : memref<8x6x512xf32, #tpu.memory_space<vmem>>, vector<1x6x512xf32>,
    %c6 = arith.constant 6 : index
    %c0_55 = arith.constant 0 : index
    %c0_56 = arith.constant 0 : index
    %55 = vector.load %arg0[%c6, %c0_55, %c0_56] : memref<8x6x3xf32, #tpu.memory_space<vmem>>, vector<1x6x3xf32>
    %56 = vector.shape_cast %55 : vector<1x6x3xf32> to vector<6x3xf32>
    %c0_57 = arith.constant 0 : index
    %c0_58 = arith.constant 0 : index
    %57 = vector.load %arg3[%c0_57, %c0_58] : memref<3x512xf32, #tpu.memory_space<vmem>>, vector<3x512xf32>
    %cst_59 = arith.constant dense<0.000000e+00> : vector<6x512xf32>
    %58 = tpu.matmul %56, %57, %cst_59 {dimension_numbers = #tpu.dot_dimension_numbers<[1], [0], [0], [1], [0, 0, 1, 1], [], []>} : vector<6x3xf32>, vector<3x512xf32>, vector<6x512xf32> -> vector<6x512xf32>
    %59 = arith.addf %58, %6 : vector<6x512xf32>
    %c6_60 = arith.constant 6 : index
    %c0_61 = arith.constant 0 : index
    %c0_62 = arith.constant 0 : index
    %60 = vector.load %arg14[%c6_60, %c0_61, %c0_62] : memref<8x6x512xf32, #tpu.memory_space<vmem>>, vector<1x6x512xf32>
    %61 = vector.shape_cast %60 : vector<1x6x512xf32> to vector<6x512xf32>
    %62 = vector.shape_cast %59 : vector<6x512xf32> to vector<1x6x512xf32>
    tpu.vector_store %arg14[%c6_60, %c0_61, %c0_62], %62 {strides = array<i32>} : memref<8x6x512xf32, #tpu.memory_space<vmem>>, vector<1x6x512xf32>,
    %c7 = arith.constant 7 : index
    %c0_63 = arith.constant 0 : index
    %c0_64 = arith.constant 0 : index
    %63 = vector.load %arg0[%c7, %c0_63, %c0_64] : memref<8x6x3xf32, #tpu.memory_space<vmem>>, vector<1x6x3xf32>
    %64 = vector.shape_cast %63 : vector<1x6x3xf32> to vector<6x3xf32>
    %c0_65 = arith.constant 0 : index
    %c0_66 = arith.constant 0 : index
    %65 = vector.load %arg3[%c0_65, %c0_66] : memref<3x512xf32, #tpu.memory_space<vmem>>, vector<3x512xf32>
    %cst_67 = arith.constant dense<0.000000e+00> : vector<6x512xf32>
    %66 = tpu.matmul %64, %65, %cst_67 {dimension_numbers = #tpu.dot_dimension_numbers<[1], [0], [0], [1], [0, 0, 1, 1], [], []>} : vector<6x3xf32>, vector<3x512xf32>, vector<6x512xf32> -> vector<6x512xf32>
    %67 = arith.addf %66, %6 : vector<6x512xf32>
    %c7_68 = arith.constant 7 : index
    %c0_69 = arith.constant 0 : index
    %c0_70 = arith.constant 0 : index
    %68 = vector.load %arg14[%c7_68, %c0_69, %c0_70] : memref<8x6x512xf32, #tpu.memory_space<vmem>>, vector<1x6x512xf32>
    %69 = vector.shape_cast %68 : vector<1x6x512xf32> to vector<6x512xf32>
    %70 = vector.shape_cast %67 : vector<6x512xf32> to vector<1x6x512xf32>
    tpu.vector_store %arg14[%c7_68, %c0_69, %c0_70], %70 {strides = array<i32>} : memref<8x6x512xf32, #tpu.memory_space<vmem>>, vector<1x6x512xf32>,
    %cst_71 = arith.constant 0.000000e+00 : f32
    %71 = vector.broadcast %cst_71 : f32 to vector<6x128xf32>
    %c0_i32 = arith.constant 0 : i32
    %72 = arith.index_cast %c0_i32 : i32 to index
    %c0_72 = arith.constant 0 : index
    %c0_73 = arith.constant 0 : index
    %73 = vector.load %arg14[%72, %c0_72, %c0_73] : memref<8x6x512xf32, #tpu.memory_space<vmem>>, vector<1x6x512xf32>
    %74 = vector.shape_cast %73 : vector<1x6x512xf32> to vector<6x512xf32>
    %c0_74 = arith.constant 0 : index
    %c0_75 = arith.constant 0 : index
    %75 = vector.load %arg5[%c0_74, %c0_75] : memref<128x512xf32, #tpu.memory_space<vmem>>, vector<128x512xf32>
    %cst_76 = arith.constant dense<0.000000e+00> : vector<6x512xf32>
    %76 = tpu.matmul %71, %75, %cst_76 {dimension_numbers = #tpu.dot_dimension_numbers<[1], [0], [0], [1], [0, 0, 1, 1], [], []>} : vector<6x128xf32>, vector<128x512xf32>, vector<6x512xf32> -> vector<6x512xf32>
    %77 = arith.addf %74, %76 : vector<6x512xf32>
    %78 = vector.extract_strided_slice %77 {offsets = [0, 0], sizes = [6, 128], strides = [1, 1]} : vector<6x512xf32> to vector<6x128xf32>
    %cst_77 = arith.constant 5.000000e-01 : f32
    %79 = vector.broadcast %cst_77 : f32 to vector<6x128xf32>
    %80 = arith.mulf %79, %78 : vector<6x128xf32>
    %81 = math.tanh %80 : vector<6x128xf32>
    %cst_78 = arith.constant 5.000000e-01 : f32
    %82 = vector.broadcast %cst_78 : f32 to vector<6x128xf32>
    %83 = arith.mulf %82, %81 : vector<6x128xf32>
    %cst_79 = arith.constant 5.000000e-01 : f32
    %84 = vector.broadcast %cst_79 : f32 to vector<6x128xf32>
    %85 = arith.addf %83, %84 : vector<6x128xf32>
    %86 = vector.extract_strided_slice %77 {offsets = [0, 128], sizes = [6, 128], strides = [1, 1]} : vector<6x512xf32> to vector<6x128xf32>
    %cst_80 = arith.constant 5.000000e-01 : f32
    %87 = vector.broadcast %cst_80 : f32 to vector<6x128xf32>
    %88 = arith.mulf %87, %86 : vector<6x128xf32>
    %89 = math.tanh %88 : vector<6x128xf32>
    %cst_81 = arith.constant 5.000000e-01 : f32
    %90 = vector.broadcast %cst_81 : f32 to vector<6x128xf32>
    %91 = arith.mulf %90, %89 : vector<6x128xf32>
    %cst_82 = arith.constant 5.000000e-01 : f32
    %92 = vector.broadcast %cst_82 : f32 to vector<6x128xf32>
    %93 = arith.addf %91, %92 : vector<6x128xf32>
    %94 = vector.extract_strided_slice %77 {offsets = [0, 256], sizes = [6, 128], strides = [1, 1]} : vector<6x512xf32> to vector<6x128xf32>
    %95 = math.tanh %94 : vector<6x128xf32>
    %96 = vector.extract_strided_slice %77 {offsets = [0, 384], sizes = [6, 128], strides = [1, 1]} : vector<6x512xf32> to vector<6x128xf32>
    %cst_83 = arith.constant 5.000000e-01 : f32
    %97 = vector.broadcast %cst_83 : f32 to vector<6x128xf32>
    %98 = arith.mulf %97, %96 : vector<6x128xf32>
    %99 = math.tanh %98 : vector<6x128xf32>
    %cst_84 = arith.constant 5.000000e-01 : f32
    %100 = vector.broadcast %cst_84 : f32 to vector<6x128xf32>
    %101 = arith.mulf %100, %99 : vector<6x128xf32>
    %cst_85 = arith.constant 5.000000e-01 : f32
    %102 = vector.broadcast %cst_85 : f32 to vector<6x128xf32>
    %103 = arith.addf %101, %102 : vector<6x128xf32>
    %104 = arith.mulf %93, %71 : vector<6x128xf32>
    %105 = arith.mulf %85, %95 : vector<6x128xf32>
    %106 = arith.addf %104, %105 : vector<6x128xf32>
    %107 = math.tanh %106 : vector<6x128xf32>
    %108 = arith.mulf %103, %107 : vector<6x128xf32>
    %c1_i32 = arith.constant 1 : i32
    %109 = arith.index_cast %c1_i32 : i32 to index
    %c0_86 = arith.constant 0 : index
    %c0_87 = arith.constant 0 : index
    %110 = vector.load %arg14[%109, %c0_86, %c0_87] : memref<8x6x512xf32, #tpu.memory_space<vmem>>, vector<1x6x512xf32>
    %111 = vector.shape_cast %110 : vector<1x6x512xf32> to vector<6x512xf32>
    %c0_88 = arith.constant 0 : index
    %c0_89 = arith.constant 0 : index
    %112 = vector.load %arg5[%c0_88, %c0_89] : memref<128x512xf32, #tpu.memory_space<vmem>>, vector<128x512xf32>
    %cst_90 = arith.constant dense<0.000000e+00> : vector<6x512xf32>
    %113 = tpu.matmul %108, %112, %cst_90 {dimension_numbers = #tpu.dot_dimension_numbers<[1], [0], [0], [1], [0, 0, 1, 1], [], []>} : vector<6x128xf32>, vector<128x512xf32>, vector<6x512xf32> -> vector<6x512xf32>
    %114 = arith.addf %111, %113 : vector<6x512xf32>
    %115 = vector.extract_strided_slice %114 {offsets = [0, 0], sizes = [6, 128], strides = [1, 1]} : vector<6x512xf32> to vector<6x128xf32>
    %cst_91 = arith.constant 5.000000e-01 : f32
    %116 = vector.broadcast %cst_91 : f32 to vector<6x128xf32>
    %117 = arith.mulf %116, %115 : vector<6x128xf32>
    %118 = math.tanh %117 : vector<6x128xf32>
    %cst_92 = arith.constant 5.000000e-01 : f32
    %119 = vector.broadcast %cst_92 : f32 to vector<6x128xf32>
    %120 = arith.mulf %119, %118 : vector<6x128xf32>
    %cst_93 = arith.constant 5.000000e-01 : f32
    %121 = vector.broadcast %cst_93 : f32 to vector<6x128xf32>
    %122 = arith.addf %120, %121 : vector<6x128xf32>
    %123 = vector.extract_strided_slice %114 {offsets = [0, 128], sizes = [6, 128], strides = [1, 1]} : vector<6x512xf32> to vector<6x128xf32>
    %cst_94 = arith.constant 5.000000e-01 : f32
    %124 = vector.broadcast %cst_94 : f32 to vector<6x128xf32>
    %125 = arith.mulf %124, %123 : vector<6x128xf32>
    %126 = math.tanh %125 : vector<6x128xf32>
    %cst_95 = arith.constant 5.000000e-01 : f32
    %127 = vector.broadcast %cst_95 : f32 to vector<6x128xf32>
    %128 = arith.mulf %127, %126 : vector<6x128xf32>
    %cst_96 = arith.constant 5.000000e-01 : f32
    %129 = vector.broadcast %cst_96 : f32 to vector<6x128xf32>
    %130 = arith.addf %128, %129 : vector<6x128xf32>
    %131 = vector.extract_strided_slice %114 {offsets = [0, 256], sizes = [6, 128], strides = [1, 1]} : vector<6x512xf32> to vector<6x128xf32>
    %132 = math.tanh %131 : vector<6x128xf32>
    %133 = vector.extract_strided_slice %114 {offsets = [0, 384], sizes = [6, 128], strides = [1, 1]} : vector<6x512xf32> to vector<6x128xf32>
    %cst_97 = arith.constant 5.000000e-01 : f32
    %134 = vector.broadcast %cst_97 : f32 to vector<6x128xf32>
    %135 = arith.mulf %134, %133 : vector<6x128xf32>
    %136 = math.tanh %135 : vector<6x128xf32>
    %cst_98 = arith.constant 5.000000e-01 : f32
    %137 = vector.broadcast %cst_98 : f32 to vector<6x128xf32>
    %138 = arith.mulf %137, %136 : vector<6x128xf32>
    %cst_99 = arith.constant 5.000000e-01 : f32
    %139 = vector.broadcast %cst_99 : f32 to vector<6x128xf32>
    %140 = arith.addf %138, %139 : vector<6x128xf32>
    %141 = arith.mulf %130, %106 : vector<6x128xf32>
    %142 = arith.mulf %122, %132 : vector<6x128xf32>
    %143 = arith.addf %141, %142 : vector<6x128xf32>
    %144 = math.tanh %143 : vector<6x128xf32>
    %145 = arith.mulf %140, %144 : vector<6x128xf32>
    %c2_i32 = arith.constant 2 : i32
    %146 = arith.index_cast %c2_i32 : i32 to index
    %c0_100 = arith.constant 0 : index
    %c0_101 = arith.constant 0 : index
    %147 = vector.load %arg14[%146, %c0_100, %c0_101] : memref<8x6x512xf32, #tpu.memory_space<vmem>>, vector<1x6x512xf32>
    %148 = vector.shape_cast %147 : vector<1x6x512xf32> to vector<6x512xf32>
    %c0_102 = arith.constant 0 : index
    %c0_103 = arith.constant 0 : index
    %149 = vector.load %arg5[%c0_102, %c0_103] : memref<128x512xf32, #tpu.memory_space<vmem>>, vector<128x512xf32>
    %cst_104 = arith.constant dense<0.000000e+00> : vector<6x512xf32>
    %150 = tpu.matmul %145, %149, %cst_104 {dimension_numbers = #tpu.dot_dimension_numbers<[1], [0], [0], [1], [0, 0, 1, 1], [], []>} : vector<6x128xf32>, vector<128x512xf32>, vector<6x512xf32> -> vector<6x512xf32>
    %151 = arith.addf %148, %150 : vector<6x512xf32>
    %152 = vector.extract_strided_slice %151 {offsets = [0, 0], sizes = [6, 128], strides = [1, 1]} : vector<6x512xf32> to vector<6x128xf32>
    %cst_105 = arith.constant 5.000000e-01 : f32
    %153 = vector.broadcast %cst_105 : f32 to vector<6x128xf32>
    %154 = arith.mulf %153, %152 : vector<6x128xf32>
    %155 = math.tanh %154 : vector<6x128xf32>
    %cst_106 = arith.constant 5.000000e-01 : f32
    %156 = vector.broadcast %cst_106 : f32 to vector<6x128xf32>
    %157 = arith.mulf %156, %155 : vector<6x128xf32>
    %cst_107 = arith.constant 5.000000e-01 : f32
    %158 = vector.broadcast %cst_107 : f32 to vector<6x128xf32>
    %159 = arith.addf %157, %158 : vector<6x128xf32>
    %160 = vector.extract_strided_slice %151 {offsets = [0, 128], sizes = [6, 128], strides = [1, 1]} : vector<6x512xf32> to vector<6x128xf32>
    %cst_108 = arith.constant 5.000000e-01 : f32
    %161 = vector.broadcast %cst_108 : f32 to vector<6x128xf32>
    %162 = arith.mulf %161, %160 : vector<6x128xf32>
    %163 = math.tanh %162 : vector<6x128xf32>
    %cst_109 = arith.constant 5.000000e-01 : f32
    %164 = vector.broadcast %cst_109 : f32 to vector<6x128xf32>
    %165 = arith.mulf %164, %163 : vector<6x128xf32>
    %cst_110 = arith.constant 5.000000e-01 : f32
    %166 = vector.broadcast %cst_110 : f32 to vector<6x128xf32>
    %167 = arith.addf %165, %166 : vector<6x128xf32>
    %168 = vector.extract_strided_slice %151 {offsets = [0, 256], sizes = [6, 128], strides = [1, 1]} : vector<6x512xf32> to vector<6x128xf32>
    %169 = math.tanh %168 : vector<6x128xf32>
    %170 = vector.extract_strided_slice %151 {offsets = [0, 384], sizes = [6, 128], strides = [1, 1]} : vector<6x512xf32> to vector<6x128xf32>
    %cst_111 = arith.constant 5.000000e-01 : f32
    %171 = vector.broadcast %cst_111 : f32 to vector<6x128xf32>
    %172 = arith.mulf %171, %170 : vector<6x128xf32>
    %173 = math.tanh %172 : vector<6x128xf32>
    %cst_112 = arith.constant 5.000000e-01 : f32
    %174 = vector.broadcast %cst_112 : f32 to vector<6x128xf32>
    %175 = arith.mulf %174, %173 : vector<6x128xf32>
    %cst_113 = arith.constant 5.000000e-01 : f32
    %176 = vector.broadcast %cst_113 : f32 to vector<6x128xf32>
    %177 = arith.addf %175, %176 : vector<6x128xf32>
    %178 = arith.mulf %167, %143 : vector<6x128xf32>
    %179 = arith.mulf %159, %169 : vector<6x128xf32>
    %180 = arith.addf %178, %179 : vector<6x128xf32>
    %181 = math.tanh %180 : vector<6x128xf32>
    %182 = arith.mulf %177, %181 : vector<6x128xf32>
    %c3_i32 = arith.constant 3 : i32
    %183 = arith.index_cast %c3_i32 : i32 to index
    %c0_114 = arith.constant 0 : index
    %c0_115 = arith.constant 0 : index
    %184 = vector.load %arg14[%183, %c0_114, %c0_115] : memref<8x6x512xf32, #tpu.memory_space<vmem>>, vector<1x6x512xf32>
    %185 = vector.shape_cast %184 : vector<1x6x512xf32> to vector<6x512xf32>
    %c0_116 = arith.constant 0 : index
    %c0_117 = arith.constant 0 : index
    %186 = vector.load %arg5[%c0_116, %c0_117] : memref<128x512xf32, #tpu.memory_space<vmem>>, vector<128x512xf32>
    %cst_118 = arith.constant dense<0.000000e+00> : vector<6x512xf32>
    %187 = tpu.matmul %182, %186, %cst_118 {dimension_numbers = #tpu.dot_dimension_numbers<[1], [0], [0], [1], [0, 0, 1, 1], [], []>} : vector<6x128xf32>, vector<128x512xf32>, vector<6x512xf32> -> vector<6x512xf32>
    %188 = arith.addf %185, %187 : vector<6x512xf32>
    %189 = vector.extract_strided_slice %188 {offsets = [0, 0], sizes = [6, 128], strides = [1, 1]} : vector<6x512xf32> to vector<6x128xf32>
    %cst_119 = arith.constant 5.000000e-01 : f32
    %190 = vector.broadcast %cst_119 : f32 to vector<6x128xf32>
    %191 = arith.mulf %190, %189 : vector<6x128xf32>
    %192 = math.tanh %191 : vector<6x128xf32>
    %cst_120 = arith.constant 5.000000e-01 : f32
    %193 = vector.broadcast %cst_120 : f32 to vector<6x128xf32>
    %194 = arith.mulf %193, %192 : vector<6x128xf32>
    %cst_121 = arith.constant 5.000000e-01 : f32
    %195 = vector.broadcast %cst_121 : f32 to vector<6x128xf32>
    %196 = arith.addf %194, %195 : vector<6x128xf32>
    %197 = vector.extract_strided_slice %188 {offsets = [0, 128], sizes = [6, 128], strides = [1, 1]} : vector<6x512xf32> to vector<6x128xf32>
    %cst_122 = arith.constant 5.000000e-01 : f32
    %198 = vector.broadcast %cst_122 : f32 to vector<6x128xf32>
    %199 = arith.mulf %198, %197 : vector<6x128xf32>
    %200 = math.tanh %199 : vector<6x128xf32>
    %cst_123 = arith.constant 5.000000e-01 : f32
    %201 = vector.broadcast %cst_123 : f32 to vector<6x128xf32>
    %202 = arith.mulf %201, %200 : vector<6x128xf32>
    %cst_124 = arith.constant 5.000000e-01 : f32
    %203 = vector.broadcast %cst_124 : f32 to vector<6x128xf32>
    %204 = arith.addf %202, %203 : vector<6x128xf32>
    %205 = vector.extract_strided_slice %188 {offsets = [0, 256], sizes = [6, 128], strides = [1, 1]} : vector<6x512xf32> to vector<6x128xf32>
    %206 = math.tanh %205 : vector<6x128xf32>
    %207 = vector.extract_strided_slice %188 {offsets = [0, 384], sizes = [6, 128], strides = [1, 1]} : vector<6x512xf32> to vector<6x128xf32>
    %cst_125 = arith.constant 5.000000e-01 : f32
    %208 = vector.broadcast %cst_125 : f32 to vector<6x128xf32>
    %209 = arith.mulf %208, %207 : vector<6x128xf32>
    %210 = math.tanh %209 : vector<6x128xf32>
    %cst_126 = arith.constant 5.000000e-01 : f32
    %211 = vector.broadcast %cst_126 : f32 to vector<6x128xf32>
    %212 = arith.mulf %211, %210 : vector<6x128xf32>
    %cst_127 = arith.constant 5.000000e-01 : f32
    %213 = vector.broadcast %cst_127 : f32 to vector<6x128xf32>
    %214 = arith.addf %212, %213 : vector<6x128xf32>
    %215 = arith.mulf %204, %180 : vector<6x128xf32>
    %216 = arith.mulf %196, %206 : vector<6x128xf32>
    %217 = arith.addf %215, %216 : vector<6x128xf32>
    %218 = math.tanh %217 : vector<6x128xf32>
    %219 = arith.mulf %214, %218 : vector<6x128xf32>
    %c4_i32 = arith.constant 4 : i32
    %220 = arith.index_cast %c4_i32 : i32 to index
    %c0_128 = arith.constant 0 : index
    %c0_129 = arith.constant 0 : index
    %221 = vector.load %arg14[%220, %c0_128, %c0_129] : memref<8x6x512xf32, #tpu.memory_space<vmem>>, vector<1x6x512xf32>
    %222 = vector.shape_cast %221 : vector<1x6x512xf32> to vector<6x512xf32>
    %c0_130 = arith.constant 0 : index
    %c0_131 = arith.constant 0 : index
    %223 = vector.load %arg5[%c0_130, %c0_131] : memref<128x512xf32, #tpu.memory_space<vmem>>, vector<128x512xf32>
    %cst_132 = arith.constant dense<0.000000e+00> : vector<6x512xf32>
    %224 = tpu.matmul %219, %223, %cst_132 {dimension_numbers = #tpu.dot_dimension_numbers<[1], [0], [0], [1], [0, 0, 1, 1], [], []>} : vector<6x128xf32>, vector<128x512xf32>, vector<6x512xf32> -> vector<6x512xf32>
    %225 = arith.addf %222, %224 : vector<6x512xf32>
    %226 = vector.extract_strided_slice %225 {offsets = [0, 0], sizes = [6, 128], strides = [1, 1]} : vector<6x512xf32> to vector<6x128xf32>
    %cst_133 = arith.constant 5.000000e-01 : f32
    %227 = vector.broadcast %cst_133 : f32 to vector<6x128xf32>
    %228 = arith.mulf %227, %226 : vector<6x128xf32>
    %229 = math.tanh %228 : vector<6x128xf32>
    %cst_134 = arith.constant 5.000000e-01 : f32
    %230 = vector.broadcast %cst_134 : f32 to vector<6x128xf32>
    %231 = arith.mulf %230, %229 : vector<6x128xf32>
    %cst_135 = arith.constant 5.000000e-01 : f32
    %232 = vector.broadcast %cst_135 : f32 to vector<6x128xf32>
    %233 = arith.addf %231, %232 : vector<6x128xf32>
    %234 = vector.extract_strided_slice %225 {offsets = [0, 128], sizes = [6, 128], strides = [1, 1]} : vector<6x512xf32> to vector<6x128xf32>
    %cst_136 = arith.constant 5.000000e-01 : f32
    %235 = vector.broadcast %cst_136 : f32 to vector<6x128xf32>
    %236 = arith.mulf %235, %234 : vector<6x128xf32>
    %237 = math.tanh %236 : vector<6x128xf32>
    %cst_137 = arith.constant 5.000000e-01 : f32
    %238 = vector.broadcast %cst_137 : f32 to vector<6x128xf32>
    %239 = arith.mulf %238, %237 : vector<6x128xf32>
    %cst_138 = arith.constant 5.000000e-01 : f32
    %240 = vector.broadcast %cst_138 : f32 to vector<6x128xf32>
    %241 = arith.addf %239, %240 : vector<6x128xf32>
    %242 = vector.extract_strided_slice %225 {offsets = [0, 256], sizes = [6, 128], strides = [1, 1]} : vector<6x512xf32> to vector<6x128xf32>
    %243 = math.tanh %242 : vector<6x128xf32>
    %244 = vector.extract_strided_slice %225 {offsets = [0, 384], sizes = [6, 128], strides = [1, 1]} : vector<6x512xf32> to vector<6x128xf32>
    %cst_139 = arith.constant 5.000000e-01 : f32
    %245 = vector.broadcast %cst_139 : f32 to vector<6x128xf32>
    %246 = arith.mulf %245, %244 : vector<6x128xf32>
    %247 = math.tanh %246 : vector<6x128xf32>
    %cst_140 = arith.constant 5.000000e-01 : f32
    %248 = vector.broadcast %cst_140 : f32 to vector<6x128xf32>
    %249 = arith.mulf %248, %247 : vector<6x128xf32>
    %cst_141 = arith.constant 5.000000e-01 : f32
    %250 = vector.broadcast %cst_141 : f32 to vector<6x128xf32>
    %251 = arith.addf %249, %250 : vector<6x128xf32>
    %252 = arith.mulf %241, %217 : vector<6x128xf32>
    %253 = arith.mulf %233, %243 : vector<6x128xf32>
    %254 = arith.addf %252, %253 : vector<6x128xf32>
    %255 = math.tanh %254 : vector<6x128xf32>
    %256 = arith.mulf %251, %255 : vector<6x128xf32>
    %c5_i32 = arith.constant 5 : i32
    %257 = arith.index_cast %c5_i32 : i32 to index
    %c0_142 = arith.constant 0 : index
    %c0_143 = arith.constant 0 : index
    %258 = vector.load %arg14[%257, %c0_142, %c0_143] : memref<8x6x512xf32, #tpu.memory_space<vmem>>, vector<1x6x512xf32>
    %259 = vector.shape_cast %258 : vector<1x6x512xf32> to vector<6x512xf32>
    %c0_144 = arith.constant 0 : index
    %c0_145 = arith.constant 0 : index
    %260 = vector.load %arg5[%c0_144, %c0_145] : memref<128x512xf32, #tpu.memory_space<vmem>>, vector<128x512xf32>
    %cst_146 = arith.constant dense<0.000000e+00> : vector<6x512xf32>
    %261 = tpu.matmul %256, %260, %cst_146 {dimension_numbers = #tpu.dot_dimension_numbers<[1], [0], [0], [1], [0, 0, 1, 1], [], []>} : vector<6x128xf32>, vector<128x512xf32>, vector<6x512xf32> -> vector<6x512xf32>
    %262 = arith.addf %259, %261 : vector<6x512xf32>
    %263 = vector.extract_strided_slice %262 {offsets = [0, 0], sizes = [6, 128], strides = [1, 1]} : vector<6x512xf32> to vector<6x128xf32>
    %cst_147 = arith.constant 5.000000e-01 : f32
    %264 = vector.broadcast %cst_147 : f32 to vector<6x128xf32>
    %265 = arith.mulf %264, %263 : vector<6x128xf32>
    %266 = math.tanh %265 : vector<6x128xf32>
    %cst_148 = arith.constant 5.000000e-01 : f32
    %267 = vector.broadcast %cst_148 : f32 to vector<6x128xf32>
    %268 = arith.mulf %267, %266 : vector<6x128xf32>
    %cst_149 = arith.constant 5.000000e-01 : f32
    %269 = vector.broadcast %cst_149 : f32 to vector<6x128xf32>
    %270 = arith.addf %268, %269 : vector<6x128xf32>
    %271 = vector.extract_strided_slice %262 {offsets = [0, 128], sizes = [6, 128], strides = [1, 1]} : vector<6x512xf32> to vector<6x128xf32>
    %cst_150 = arith.constant 5.000000e-01 : f32
    %272 = vector.broadcast %cst_150 : f32 to vector<6x128xf32>
    %273 = arith.mulf %272, %271 : vector<6x128xf32>
    %274 = math.tanh %273 : vector<6x128xf32>
    %cst_151 = arith.constant 5.000000e-01 : f32
    %275 = vector.broadcast %cst_151 : f32 to vector<6x128xf32>
    %276 = arith.mulf %275, %274 : vector<6x128xf32>
    %cst_152 = arith.constant 5.000000e-01 : f32
    %277 = vector.broadcast %cst_152 : f32 to vector<6x128xf32>
    %278 = arith.addf %276, %277 : vector<6x128xf32>
    %279 = vector.extract_strided_slice %262 {offsets = [0, 256], sizes = [6, 128], strides = [1, 1]} : vector<6x512xf32> to vector<6x128xf32>
    %280 = math.tanh %279 : vector<6x128xf32>
    %281 = vector.extract_strided_slice %262 {offsets = [0, 384], sizes = [6, 128], strides = [1, 1]} : vector<6x512xf32> to vector<6x128xf32>
    %cst_153 = arith.constant 5.000000e-01 : f32
    %282 = vector.broadcast %cst_153 : f32 to vector<6x128xf32>
    %283 = arith.mulf %282, %281 : vector<6x128xf32>
    %284 = math.tanh %283 : vector<6x128xf32>
    %cst_154 = arith.constant 5.000000e-01 : f32
    %285 = vector.broadcast %cst_154 : f32 to vector<6x128xf32>
    %286 = arith.mulf %285, %284 : vector<6x128xf32>
    %cst_155 = arith.constant 5.000000e-01 : f32
    %287 = vector.broadcast %cst_155 : f32 to vector<6x128xf32>
    %288 = arith.addf %286, %287 : vector<6x128xf32>
    %289 = arith.mulf %278, %254 : vector<6x128xf32>
    %290 = arith.mulf %270, %280 : vector<6x128xf32>
    %291 = arith.addf %289, %290 : vector<6x128xf32>
    %292 = math.tanh %291 : vector<6x128xf32>
    %293 = arith.mulf %288, %292 : vector<6x128xf32>
    %c6_i32 = arith.constant 6 : i32
    %294 = arith.index_cast %c6_i32 : i32 to index
    %c0_156 = arith.constant 0 : index
    %c0_157 = arith.constant 0 : index
    %295 = vector.load %arg14[%294, %c0_156, %c0_157] : memref<8x6x512xf32, #tpu.memory_space<vmem>>, vector<1x6x512xf32>
    %296 = vector.shape_cast %295 : vector<1x6x512xf32> to vector<6x512xf32>
    %c0_158 = arith.constant 0 : index
    %c0_159 = arith.constant 0 : index
    %297 = vector.load %arg5[%c0_158, %c0_159] : memref<128x512xf32, #tpu.memory_space<vmem>>, vector<128x512xf32>
    %cst_160 = arith.constant dense<0.000000e+00> : vector<6x512xf32>
    %298 = tpu.matmul %293, %297, %cst_160 {dimension_numbers = #tpu.dot_dimension_numbers<[1], [0], [0], [1], [0, 0, 1, 1], [], []>} : vector<6x128xf32>, vector<128x512xf32>, vector<6x512xf32> -> vector<6x512xf32>
    %299 = arith.addf %296, %298 : vector<6x512xf32>
    %300 = vector.extract_strided_slice %299 {offsets = [0, 0], sizes = [6, 128], strides = [1, 1]} : vector<6x512xf32> to vector<6x128xf32>
    %cst_161 = arith.constant 5.000000e-01 : f32
    %301 = vector.broadcast %cst_161 : f32 to vector<6x128xf32>
    %302 = arith.mulf %301, %300 : vector<6x128xf32>
    %303 = math.tanh %302 : vector<6x128xf32>
    %cst_162 = arith.constant 5.000000e-01 : f32
    %304 = vector.broadcast %cst_162 : f32 to vector<6x128xf32>
    %305 = arith.mulf %304, %303 : vector<6x128xf32>
    %cst_163 = arith.constant 5.000000e-01 : f32
    %306 = vector.broadcast %cst_163 : f32 to vector<6x128xf32>
    %307 = arith.addf %305, %306 : vector<6x128xf32>
    %308 = vector.extract_strided_slice %299 {offsets = [0, 128], sizes = [6, 128], strides = [1, 1]} : vector<6x512xf32> to vector<6x128xf32>
    %cst_164 = arith.constant 5.000000e-01 : f32
    %309 = vector.broadcast %cst_164 : f32 to vector<6x128xf32>
    %310 = arith.mulf %309, %308 : vector<6x128xf32>
    %311 = math.tanh %310 : vector<6x128xf32>
    %cst_165 = arith.constant 5.000000e-01 : f32
    %312 = vector.broadcast %cst_165 : f32 to vector<6x128xf32>
    %313 = arith.mulf %312, %311 : vector<6x128xf32>
    %cst_166 = arith.constant 5.000000e-01 : f32
    %314 = vector.broadcast %cst_166 : f32 to vector<6x128xf32>
    %315 = arith.addf %313, %314 : vector<6x128xf32>
    %316 = vector.extract_strided_slice %299 {offsets = [0, 256], sizes = [6, 128], strides = [1, 1]} : vector<6x512xf32> to vector<6x128xf32>
    %317 = math.tanh %316 : vector<6x128xf32>
    %318 = vector.extract_strided_slice %299 {offsets = [0, 384], sizes = [6, 128], strides = [1, 1]} : vector<6x512xf32> to vector<6x128xf32>
    %cst_167 = arith.constant 5.000000e-01 : f32
    %319 = vector.broadcast %cst_167 : f32 to vector<6x128xf32>
    %320 = arith.mulf %319, %318 : vector<6x128xf32>
    %321 = math.tanh %320 : vector<6x128xf32>
    %cst_168 = arith.constant 5.000000e-01 : f32
    %322 = vector.broadcast %cst_168 : f32 to vector<6x128xf32>
    %323 = arith.mulf %322, %321 : vector<6x128xf32>
    %cst_169 = arith.constant 5.000000e-01 : f32
    %324 = vector.broadcast %cst_169 : f32 to vector<6x128xf32>
    %325 = arith.addf %323, %324 : vector<6x128xf32>
    %326 = arith.mulf %315, %291 : vector<6x128xf32>
    %327 = arith.mulf %307, %317 : vector<6x128xf32>
    %328 = arith.addf %326, %327 : vector<6x128xf32>
    %329 = math.tanh %328 : vector<6x128xf32>
    %330 = arith.mulf %325, %329 : vector<6x128xf32>
    %c7_i32 = arith.constant 7 : i32
    %331 = arith.index_cast %c7_i32 : i32 to index
    %c0_170 = arith.constant 0 : index
    %c0_171 = arith.constant 0 : index
    %332 = vector.load %arg14[%331, %c0_170, %c0_171] : memref<8x6x512xf32, #tpu.memory_space<vmem>>, vector<1x6x512xf32>
    %333 = vector.shape_cast %332 : vector<1x6x512xf32> to vector<6x512xf32>
    %c0_172 = arith.constant 0 : index
    %c0_173 = arith.constant 0 : index
    %334 = vector.load %arg5[%c0_172, %c0_173] : memref<128x512xf32, #tpu.memory_space<vmem>>, vector<128x512xf32>
    %cst_174 = arith.constant dense<0.000000e+00> : vector<6x512xf32>
    %335 = tpu.matmul %330, %334, %cst_174 {dimension_numbers = #tpu.dot_dimension_numbers<[1], [0], [0], [1], [0, 0, 1, 1], [], []>} : vector<6x128xf32>, vector<128x512xf32>, vector<6x512xf32> -> vector<6x512xf32>
    %336 = arith.addf %333, %335 : vector<6x512xf32>
    %337 = vector.extract_strided_slice %336 {offsets = [0, 0], sizes = [6, 128], strides = [1, 1]} : vector<6x512xf32> to vector<6x128xf32>
    %cst_175 = arith.constant 5.000000e-01 : f32
    %338 = vector.broadcast %cst_175 : f32 to vector<6x128xf32>
    %339 = arith.mulf %338, %337 : vector<6x128xf32>
    %340 = math.tanh %339 : vector<6x128xf32>
    %cst_176 = arith.constant 5.000000e-01 : f32
    %341 = vector.broadcast %cst_176 : f32 to vector<6x128xf32>
    %342 = arith.mulf %341, %340 : vector<6x128xf32>
    %cst_177 = arith.constant 5.000000e-01 : f32
    %343 = vector.broadcast %cst_177 : f32 to vector<6x128xf32>
    %344 = arith.addf %342, %343 : vector<6x128xf32>
    %345 = vector.extract_strided_slice %336 {offsets = [0, 128], sizes = [6, 128], strides = [1, 1]} : vector<6x512xf32> to vector<6x128xf32>
    %cst_178 = arith.constant 5.000000e-01 : f32
    %346 = vector.broadcast %cst_178 : f32 to vector<6x128xf32>
    %347 = arith.mulf %346, %345 : vector<6x128xf32>
    %348 = math.tanh %347 : vector<6x128xf32>
    %cst_179 = arith.constant 5.000000e-01 : f32
    %349 = vector.broadcast %cst_179 : f32 to vector<6x128xf32>
    %350 = arith.mulf %349, %348 : vector<6x128xf32>
    %cst_180 = arith.constant 5.000000e-01 : f32
    %351 = vector.broadcast %cst_180 : f32 to vector<6x128xf32>
    %352 = arith.addf %350, %351 : vector<6x128xf32>
    %353 = vector.extract_strided_slice %336 {offsets = [0, 256], sizes = [6, 128], strides = [1, 1]} : vector<6x512xf32> to vector<6x128xf32>
    %354 = math.tanh %353 : vector<6x128xf32>
    %355 = vector.extract_strided_slice %336 {offsets = [0, 384], sizes = [6, 128], strides = [1, 1]} : vector<6x512xf32> to vector<6x128xf32>
    %cst_181 = arith.constant 5.000000e-01 : f32
    %356 = vector.broadcast %cst_181 : f32 to vector<6x128xf32>
    %357 = arith.mulf %356, %355 : vector<6x128xf32>
    %358 = math.tanh %357 : vector<6x128xf32>
    %cst_182 = arith.constant 5.000000e-01 : f32
    %359 = vector.broadcast %cst_182 : f32 to vector<6x128xf32>
    %360 = arith.mulf %359, %358 : vector<6x128xf32>
    %cst_183 = arith.constant 5.000000e-01 : f32
    %361 = vector.broadcast %cst_183 : f32 to vector<6x128xf32>
    %362 = arith.addf %360, %361 : vector<6x128xf32>
    %363 = arith.mulf %352, %328 : vector<6x128xf32>
    %364 = arith.mulf %344, %354 : vector<6x128xf32>
    %365 = arith.addf %363, %364 : vector<6x128xf32>
    %366 = math.tanh %365 : vector<6x128xf32>
    %367 = arith.mulf %362, %366 : vector<6x128xf32>
    %c8_i32 = arith.constant 8 : i32
    %c0_184 = arith.constant 0 : index
    %c0_185 = arith.constant 0 : index
    %368 = vector.load %arg7[%c0_184, %c0_185] : memref<128x256xf32, #tpu.memory_space<vmem>>, vector<128x256xf32>
    %cst_186 = arith.constant dense<0.000000e+00> : vector<6x256xf32>
    %369 = tpu.matmul %367, %368, %cst_186 {dimension_numbers = #tpu.dot_dimension_numbers<[1], [0], [0], [1], [0, 0, 1, 1], [], []>} : vector<6x128xf32>, vector<128x256xf32>, vector<6x256xf32> -> vector<6x256xf32>
    %370 = tpu.iota {dimensions = array<i32: 1>} : vector<4x6xi32>
    %c0_187 = arith.constant 0 : index
    %c0_188 = arith.constant 0 : index
    %371 = vector.load %arg1[%c0_187, %c0_188] : memref<4x1xi32, #tpu.memory_space<vmem>>, vector<4x1xi32>
    %372 = vector.broadcast %371 : vector<4x1xi32> to vector<4x6xi32>
    %373 = arith.cmpi eq, %370, %372 : vector<4x6xi32>
    %374 = arith.extui %373 : vector<4x6xi1> to vector<4x6xi32>
    %375 = arith.sitofp %374 : vector<4x6xi32> to vector<4x6xf32>
    %c0_189 = arith.constant 0 : index
    %c0_190 = arith.constant 0 : index
    %376 = vector.load %arg2[%c0_189, %c0_190] : memref<4x1xi32, #tpu.memory_space<vmem>>, vector<4x1xi32>
    %377 = vector.broadcast %376 : vector<4x1xi32> to vector<4x6xi32>
    %378 = arith.cmpi eq, %370, %377 : vector<4x6xi32>
    %379 = arith.extui %378 : vector<4x6xi1> to vector<4x6xi32>
    %380 = arith.sitofp %379 : vector<4x6xi32> to vector<4x6xf32>
    %381 = vector.extract_strided_slice %369 {offsets = [0, 0], sizes = [6, 128], strides = [1, 1]} : vector<6x256xf32> to vector<6x128xf32>
    %cst_191 = arith.constant dense<0.000000e+00> : vector<4x128xf32>
    %382 = tpu.matmul %375, %381, %cst_191 {dimension_numbers = #tpu.dot_dimension_numbers<[1], [0], [0], [1], [0, 0, 1, 1], [], []>} : vector<4x6xf32>, vector<6x128xf32>, vector<4x128xf32> -> vector<4x128xf32>
    %383 = vector.extract_strided_slice %369 {offsets = [0, 128], sizes = [6, 128], strides = [1, 1]} : vector<6x256xf32> to vector<6x128xf32>
    %cst_192 = arith.constant dense<0.000000e+00> : vector<4x128xf32>
    %384 = tpu.matmul %380, %383, %cst_192 {dimension_numbers = #tpu.dot_dimension_numbers<[1], [0], [0], [1], [0, 0, 1, 1], [], []>} : vector<4x6xf32>, vector<6x128xf32>, vector<4x128xf32> -> vector<4x128xf32>
    %385 = arith.addf %382, %384 : vector<4x128xf32>
    %c0_193 = arith.constant 0 : index
    %c0_194 = arith.constant 0 : index
    %386 = vector.load %arg8[%c0_193, %c0_194] : memref<1x128xf32, #tpu.memory_space<vmem>>, vector<1x128xf32>
    %387 = vector.broadcast %386 : vector<1x128xf32> to vector<4x128xf32>
    %388 = arith.addf %385, %387 : vector<4x128xf32>
    %cst_195 = arith.constant 0.000000e+00 : f32
    %389 = vector.broadcast %cst_195 : f32 to vector<4x128xf32>
    %390 = arith.maximumf %388, %389 : vector<4x128xf32>
    %c0_196 = arith.constant 0 : index
    %c0_197 = arith.constant 0 : index
    %391 = vector.load %arg9[%c0_196, %c0_197] : memref<128x32xf32, #tpu.memory_space<vmem>>, vector<128x32xf32>
    %cst_198 = arith.constant dense<0.000000e+00> : vector<4x32xf32>
    %392 = tpu.matmul %390, %391, %cst_198 {dimension_numbers = #tpu.dot_dimension_numbers<[1], [0], [0], [1], [0, 0, 1, 1], [], []>} : vector<4x128xf32>, vector<128x32xf32>, vector<4x32xf32> -> vector<4x32xf32>
    %c0_199 = arith.constant 0 : index
    %c0_200 = arith.constant 0 : index
    %393 = vector.load %arg10[%c0_199, %c0_200] : memref<1x32xf32, #tpu.memory_space<vmem>>, vector<1x32xf32>
    %394 = vector.broadcast %393 : vector<1x32xf32> to vector<4x32xf32>
    %395 = arith.addf %392, %394 : vector<4x32xf32>
    %cst_201 = arith.constant 0.000000e+00 : f32
    %396 = vector.broadcast %cst_201 : f32 to vector<4x32xf32>
    %397 = arith.maximumf %395, %396 : vector<4x32xf32>
    %c0_202 = arith.constant 0 : index
    %c0_203 = arith.constant 0 : index
    %398 = vector.load %arg11[%c0_202, %c0_203] : memref<1x32xf32, #tpu.memory_space<vmem>>, vector<1x32xf32>
    %399 = vector.broadcast %398 : vector<1x32xf32> to vector<4x32xf32>
    %400 = arith.mulf %397, %399 : vector<4x32xf32>
    %cst_204 = arith.constant dense<0.000000e+00> : vector<4xf32>
    %401 = vector.multi_reduction <add>, %400, %cst_204 [1] : vector<4x32xf32> to vector<4xf32>
    %402 = vector.shape_cast %401 : vector<4xf32> to vector<4x1xf32>
    %c0_205 = arith.constant 0 : index
    %c0_206 = arith.constant 0 : index
    %403 = vector.load %arg12[%c0_205, %c0_206] : memref<1x1xf32, #tpu.memory_space<vmem>>, vector<1x1xf32>
    %404 = vector.broadcast %403 : vector<1x1xf32> to vector<4x1xf32>
    %405 = arith.addf %402, %404 : vector<4x1xf32>
    %cst_207 = arith.constant 5.000000e-01 : f32
    %406 = vector.broadcast %cst_207 : f32 to vector<4x1xf32>
    %407 = arith.mulf %406, %405 : vector<4x1xf32>
    %408 = math.tanh %407 : vector<4x1xf32>
    %cst_208 = arith.constant 5.000000e-01 : f32
    %409 = vector.broadcast %cst_208 : f32 to vector<4x1xf32>
    %410 = arith.mulf %409, %408 : vector<4x1xf32>
    %cst_209 = arith.constant 5.000000e-01 : f32
    %411 = vector.broadcast %cst_209 : f32 to vector<4x1xf32>
    %412 = arith.addf %410, %411 : vector<4x1xf32>
    %c0_210 = arith.constant 0 : index
    %c0_211 = arith.constant 0 : index
    %413 = vector.load %arg13[%c0_210, %c0_211] : memref<4x1xf32, #tpu.memory_space<vmem>>, vector<4x1xf32>
    tpu.vector_store %arg13[%c0_210, %c0_211], %412 {strides = array<i32>} : memref<4x1xf32, #tpu.memory_space<vmem>>, vector<4x1xf32>,
    return
  }
}

</mosaic_0001>

<bundles_post_ra>
// kernel: lstm_mlp_pass.1
= control target key start
LH: loop header
LB: loop body
LE: loop exit
PB: predicated region body
PF: predicated region fallthrough
CT: control target
= control target key end

     0   :  { %s3642_s0 = inlined_call_operand.vmem [shape: f32[8,6,3], index: 0, kind: input, shape index: {}]   ;;  %s3643_s1 = inlined_call_operand.vmem [shape: s32[4,1], index: 1, kind: input, shape index: {}]   ;;  %s3644_s2 = inlined_call_operand.vmem [shape: s32[4,1], index: 2, kind: input, shape index: {}]   ;;  %s3645_s3 = inlined_call_operand.vmem [shape: f32[3,512], index: 3, kind: input, shape index: {}]   ;;  %s3646_s4 = inlined_call_operand.vmem [shape: f32[3,512], index: 4, kind: input, shape index: {}]   ;;  %s3647_s5 = inlined_call_operand.hbm [shape: f32[128,512], index: 5, kind: input, shape index: {}]   ;;  %s3648_s6 = inlined_call_operand.vmem [shape: f32[1,512], index: 6, kind: input, shape index: {}]   ;;  %s3649_s7 = inlined_call_operand.hbm [shape: f32[128,256], index: 7, kind: input, shape index: {}]   ;;  %s3650_s8 = inlined_call_operand.vmem [shape: f32[1,128], index: 8, kind: input, shape index: {}]   ;;  %s3651_s9 = inlined_call_operand.vmem [shape: f32[128,32], index: 9, kind: input, shape index: {}]   ;;  %s3652_s10 = inlined_call_operand.vmem [shape: f32[1,32], index: 10, kind: input, shape index: {}]   ;;  %s3653_s11 = inlined_call_operand.vmem [shape: f32[1,32], index: 11, kind: input, shape index: {}]   ;;  %s3654_s12 = inlined_call_operand.<no memory space> [shape: f32[1,1], index: 12, kind: input, shape index: {}]   ;;  %s3655_s13 = inlined_call_operand.vmem [shape: f32[4,1], index: 13, kind: output, shape index: {}]  }
   0x1   :  { %v18_v0 = vstv %s3654_s12 }
   0x2   :  { %19 = vst [vmem:[#allocation3] sm:$0x1] %v18_v0 }
   0x3   :  { %20 = vsyncpa [#allocation5], 0  ;;  %s36_s29 = sshll.u32 %s3647_s5, 4  ;;  %s37_s29 = int_to_ptr.hbm [resolvable:$true] %s36_s29 }
   0x4   :  { %21 = vsyncpa [#allocation7], 0  ;;  %s2486_s30 = smov [#allocation4]   ;;  %s51_s17 = sshll.u32 %s3649_s7, 4  ;;  %s52_s17 = int_to_ptr.hbm [resolvable:$true] %s51_s17 }
   0x5   :  { %s38_s14 = sshll.u32 %s2486_s30, 4  ;;  %s2487_s18 = smov 512   ;;  %s39_s14 = int_to_ptr.vmem [resolvable:$true] %s38_s14 }
   0x6   :  { %s2488_s19 = smov 32   ;;  %s2489_s12 = smov [#allocation6]  }
   0x7   :  { %44 = dma.hbm_to_vmem [thread:$0]  %s37_s29, 8192, %s39_s14, [#allocation5], %s2487_s18, %s2487_s18, %s2488_s19  }
   0x8   :  { %s53_s20 = sshll.u32 %s2489_s12, 4  ;;  %s2490_s21 = smov 256   ;;  %s54_s20 = int_to_ptr.vmem [resolvable:$true] %s53_s20 }
   0x9   :  { %s2491_s22 = smov 16  }
   0xa   :  { %59 = dma.hbm_to_vmem [thread:$0]  %s52_s17, 4096, %s54_s20, [#allocation7], %s2490_s21, %s2490_s21, %s2491_s22  }
   0xb   :  { %2482 = dma.done.wait [#allocation5], 8192  }
   0xc   :  { %2483 = vsyncadd [#allocation5], 4294959104 }
   0xd   :  { %2484 = dma.done.wait [#allocation7], 4096  }
   0xe   :  { %2485 = vsyncadd [#allocation7], 4294963200  ;;  %v80_v1 = vld [vmem:[%s3646_s4] sm:$0x77]  ;;  %v81_v2 = vld [vmem:[%s3646_s4 + $0x8] sm:$0x77] }
   0xf   :  { %84 = vst [vmem:[#allocation1] ss:$2 sm:$0xff] %v80_v1  ;;  %vm95_vm0 = vcmask 1042432   ;;  %v197_v3 = vld [vmem:[%s3645_s3] sm:$0x77]  ;;  %vm91_vm1 = vcmask 23552  }
  0x10   :  { %86 = vst [vmem:[#allocation1 + $0x10] ss:$2 sm:$0xff] %v81_v2  ;;  %v79_v4 = vld [vmem:[%s3642_s0] sm:$0x3f]  ;;  %v198_v5 = vld [vmem:[%s3645_s3 + $0x8] sm:$0x77] }
  0x11   :  { %v302_v10 = vld [vmem:[%s3645_s3] sm:$0x77]  ;;  %v303_v11 = vld [vmem:[%s3645_s3 + $0x8] sm:$0x77]  ;;  %v2215_v24 = vld [vmem:[%s3642_s0 + $0x10] sm:$0x3f] }
  0x12   :  { %v411_v16 = vld [vmem:[%s3645_s3] sm:$0x77]  ;;  %v412_v17 = vld [vmem:[%s3645_s3 + $0x8] sm:$0x77]  ;;  %v2224_v31 = vld [vmem:[%s3642_s0 + $0x18] sm:$0x3f] }
  0x13   :  { %v2206_v18 = vld [vmem:[%s3642_s0 + $0x8] sm:$0x3f]  ;;  %v520_v23 = vld [vmem:[%s3645_s3] sm:$0x77]  ;;  %v2251_v52 = vld [vmem:[%s3642_s0 + $0x30] sm:$0x3f] }
  0x14   :  { %v521_v25 = vld [vmem:[%s3645_s3 + $0x8] sm:$0x77]  ;;  %v629_v30 = vld [vmem:[%s3645_s3] sm:$0x77]  ;;  %v2713_v58 = vld [vmem:[%s3642_s0 + $0x38] sm:$0x3f] }
  0x15   :  { %v630_v32 = vld [vmem:[%s3645_s3 + $0x8] sm:$0x77]  ;;  %v738_v37 = vld [vmem:[%s3645_s3] sm:$0x77]  ;;  %v2722_v63 = vld [vmem:[#allocation4 + $0x1e8] sm:$0xff]  ;;  %vm2067_vm4 = vcmask 1045504  }
  0x16   :  { %v87_v6 = vld.sshfl [vmem:[#allocation1] sm:$0xff pattern:$0x75316420]  ;;  %v88_v7 = vld.sshfl [vmem:[#allocation1 + $0x8] sm:$0xff pattern:$0x75316420] }
  0x17   :  { %2190 = vmatpush.msk.msra.mxu3 %vm95_vm0, %v87_v6  ;;  %2192 = vmatpush.msk.msra.mxu1 %vm95_vm0, %v88_v7  ;;  %201 = vst [vmem:[#allocation1] ss:$2 sm:$0xff] %v197_v3  ;;  %v89_v8 = vld.sshfl [vmem:[#allocation1 + $0x10] sm:$0xff pattern:$0x75316420]  ;;  %v2724_v0 = vld [vmem:[#allocation4 + $0x1f0] sm:$0xff] }
  0x18   :  { %2191 = vmatmul.msk.f32.vlgmr.msra.gmra.mxu3 %vm91_vm1, %v79_v4  ;;  %2193 = vmatmul.msk.f32.vlgmr.msra.gmra.mxu1 %vm91_vm1, %v79_v4  ;;  %v90_v9 = vld.sshfl [vmem:[#allocation1 + $0x18] sm:$0xff pattern:$0x75316420]  ;;  %v2233_v38 = vld [vmem:[%s3642_s0 + $0x20] sm:$0x3f]  ;;  %v2717_v61 = vld [vmem:[#allocation4 + $0x1e0] sm:$0xff] }
  0x19   :  { %2194 = vmatpush.msk.msrb.mxu3 %vm95_vm0, %v89_v8  ;;  %203 = vst [vmem:[#allocation1 + $0x10] ss:$2 sm:$0xff] %v198_v5  ;;  %v739_v39 = vld [vmem:[%s3645_s3 + $0x8] sm:$0x77]  ;;  %v847_v44 = vld [vmem:[%s3645_s3] sm:$0x77] }
  0x1a   :  { %v848_v45 = vld [vmem:[%s3645_s3 + $0x8] sm:$0x77]  ;;  %v956_v51 = vld [vmem:[%s3645_s3] sm:$0x77]  ;;  %v2734_v3 = vld [vmem:[#allocation4 + $0x1c8] sm:$0xff]  ;;  %vm2063_vm5 = vcmask 48128  }
  0x1b   :  { %2196 = vmatpush.msk.msra.mxu3 %vm95_vm0, %v90_v9  ;;  %v2242_v46 = vld [vmem:[%s3642_s0 + $0x28] sm:$0x3f]  ;;  %v2743_v6 = vld [vmem:[#allocation4 + $0x1a8] sm:$0xff]  ;;  %v2745_v7 = vld [vmem:[#allocation4 + $0x1b0] sm:$0xff]  ;;  %vm2169_vm6 = vcmask 257024   ;;  %vm2182_vm7 = vcmask 3072  }
  0x1c   :  { %v957_v53 = vld [vmem:[%s3645_s3 + $0x8] sm:$0x77]  ;;  %3746 = vst [vmem:[#allocation10_spill] sm:$0xff] %v2743_v6  ;;  %v2753_v9 = vld [vmem:[#allocation4 + $0x188] sm:$0xff] }
  0x1d   :  { %v2729_v1 = vld [vmem:[#allocation4 + $0x1c0] sm:$0xff]  ;;  %3747 = vst [vmem:[#allocation11_spill] sm:$0xff] %v2745_v7 }
  0x1e   :  { %v204_v12 = vld.sshfl [vmem:[#allocation1] sm:$0xff pattern:$0x75316420]  ;;  %v205_v13 = vld.sshfl [vmem:[#allocation1 + $0x8] sm:$0xff pattern:$0x75316420] }
  0x1f   :  { %2198 = vmatpush.msk.msra.mxu0 %vm95_vm0, %v204_v12  ;;  %2200 = vmatpush.msk.msrb.mxu1 %vm95_vm0, %v205_v13  ;;  %306 = vst [vmem:[#allocation1] ss:$2 sm:$0xff] %v302_v10  ;;  %v2740_v5 = vld [vmem:[#allocation4 + $0x1a0] sm:$0xff]  ;;  %v2755_v10 = vld [vmem:[#allocation4 + $0x190] sm:$0xff]  ;;  %v2761_v12 = vld [vmem:[#allocation4 + $0x1f8] sm:$0xff] }
  0x20   :  { %v206_v14 = vld.sshfl [vmem:[#allocation1 + $0x10] sm:$0xff pattern:$0x75316420]  ;;  %v207_v15 = vld.sshfl [vmem:[#allocation1 + $0x18] sm:$0xff pattern:$0x75316420]  ;;  %2195 = vmatmul.msk.f32.vlgmr.msrb.gmra.mxu3 %vm91_vm1, %v79_v4  ;;  %2199 = vmatmul.msk.f32.vlgmr.msra.gmra.mxu0 %vm91_vm1, %v79_v4 }
  0x21   :  { %2202 = vmatpush.msk.msra.mxu2 %vm95_vm0, %v206_v14  ;;  %308 = vst [vmem:[#allocation1 + $0x10] ss:$2 sm:$0xff] %v303_v11  ;;  %2201 = vmatmul.msk.f32.vlgmr.msrb.gmra.mxu1 %vm91_vm1, %v79_v4  ;;  %v2750_v8 = vld [vmem:[#allocation4 + $0x180] sm:$0xff]  ;;  %v2765_v13 = vld [vmem:[#allocation4 + $0x168] sm:$0xff]  ;;  %v2767_v14 = vld [vmem:[#allocation4 + $0x170] sm:$0xff] }
  0x22   :  { %2203 = vmatmul.msk.f32.vlgmr.msra.gmra.mxu2 %vm91_vm1, %v79_v4  ;;  %2204 = vmatpush.msk.msrb.mxu3 %vm95_vm0, %v207_v15  ;;  %v2759_v11 = vld [vmem:[#allocation4 + $0x160] sm:$0xff] }
  0x23   :  { %v2771_v15 = vld [vmem:[#allocation4 + $0x140] sm:$0xff] }
  0x26   :  { %v309_v19 = vld.sshfl [vmem:[#allocation1] sm:$0xff pattern:$0x75316420]  ;;  %v310_v20 = vld.sshfl [vmem:[#allocation1 + $0x8] sm:$0xff pattern:$0x75316420] }
  0x27   :  { %2207 = vmatpush.msk.msrb.mxu0 %vm95_vm0, %v309_v19  ;;  %2209 = vmatpush.msk.msra.mxu1 %vm95_vm0, %v310_v20  ;;  %415 = vst [vmem:[#allocation1] ss:$2 sm:$0xff] %v411_v16  ;;  %v2773_v16 = vld [vmem:[#allocation4 + $0x1d8] sm:$0xff]  ;;  %v2783_v19 = vld [vmem:[#allocation4 + $0x120] sm:$0xff] }
  0x28   :  { %v311_v21 = vld.sshfl [vmem:[#allocation1 + $0x10] sm:$0xff pattern:$0x75316420]  ;;  %v312_v22 = vld.sshfl [vmem:[#allocation1 + $0x18] sm:$0xff pattern:$0x75316420]  ;;  %2197 = vmatmul.msk.f32.vlgmr.msra.gmra.mxu3 %vm91_vm1, %v79_v4  ;;  %2208 = vmatmul.msk.f32.vlgmr.msrb.gmra.mxu0 %vm91_vm1, %v2206_v18 }
  0x29   :  { %2211 = vmatpush.msk.msrb.mxu2 %vm95_vm0, %v311_v21  ;;  %417 = vst [vmem:[#allocation1 + $0x10] ss:$2 sm:$0xff] %v412_v17  ;;  %2210 = vmatmul.msk.f32.vlgmr.msra.gmra.mxu1 %vm91_vm1, %v2206_v18  ;;  %v2777_v17 = vld [vmem:[#allocation4 + $0x148] sm:$0xff]  ;;  %v2785_v20 = vld [vmem:[#allocation4 + $0x1b8] sm:$0xff] }
  0x2a   :  { %2212 = vmatmul.msk.f32.vlgmr.msrb.gmra.mxu2 %vm91_vm1, %v2206_v18  ;;  %2213 = vmatpush.msk.msra.mxu3 %vm95_vm0, %v312_v22  ;;  %v2789_v21 = vld [vmem:[#allocation4 + $0x128] sm:$0xff]  ;;  %v2791_v22 = vld [vmem:[#allocation4 + $0x130] sm:$0xff] }
  0x2e   :  { %v418_v26 = vld.sshfl [vmem:[#allocation1] sm:$0xff pattern:$0x75316420]  ;;  %v419_v27 = vld.sshfl [vmem:[#allocation1 + $0x8] sm:$0xff pattern:$0x75316420] }
  0x2f   :  { %2216 = vmatpush.msk.msra.mxu0 %vm95_vm0, %v418_v26  ;;  %2218 = vmatpush.msk.msrb.mxu1 %vm95_vm0, %v419_v27  ;;  %524 = vst [vmem:[#allocation1] ss:$2 sm:$0xff] %v520_v23  ;;  %v2795_v23 = vld [vmem:[#allocation4 + $0x100] sm:$0xff]  ;;  %v2803_v26 = vld [vmem:[#allocation4 + $0x110] sm:$0xff] }
  0x30   :  { %v421_v28 = vld.sshfl [vmem:[#allocation1 + $0x18] sm:$0xff pattern:$0x75316420]  ;;  %v420_v29 = vld.sshfl [vmem:[#allocation1 + $0x10] sm:$0xff pattern:$0x75316420]  ;;  %2205 = vmatmul.msk.f32.vlgmr.msrb.gmra.mxu3 %vm91_vm1, %v79_v4  ;;  %2217 = vmatmul.msk.f32.vlgmr.msra.gmra.mxu0 %vm91_vm1, %v2215_v24 }
  0x31   :  { %2220 = vmatpush.msk.msra.mxu2 %vm95_vm0, %v420_v29  ;;  %2219 = vmatmul.msk.f32.vlgmr.msrb.gmra.mxu1 %vm91_vm1, %v2215_v24  ;;  %526 = vst [vmem:[#allocation1 + $0x10] ss:$2 sm:$0xff] %v521_v25  ;;  %v2736_v4 = vld [vmem:[#allocation4 + $0x1d0] sm:$0xff]  ;;  %v2801_v25 = vld [vmem:[#allocation4 + $0x108] sm:$0xff]  ;;  %v2807_v27 = vld [vmem:[#allocation4 + $0xe0] sm:$0xff] }
  0x32   :  { %2221 = vmatmul.msk.f32.vlgmr.msra.gmra.mxu2 %vm91_vm1, %v2215_v24  ;;  %2222 = vmatpush.msk.msrb.mxu3 %vm95_vm0, %v421_v28  ;;  %3748 = vst [vmem:[#allocation12_spill] sm:$0xff] %v2801_v25  ;;  %v2811_v28 = vld [vmem:[#allocation4 + $0xe8] sm:$0xff]  ;;  %v2813_v29 = vld [vmem:[#allocation4 + $0xf0] sm:$0xff] }
  0x36   :  { %v527_v33 = vld.sshfl [vmem:[#allocation1] sm:$0xff pattern:$0x75316420]  ;;  %v528_v34 = vld.sshfl [vmem:[#allocation1 + $0x8] sm:$0xff pattern:$0x75316420] }
  0x37   :  { %2225 = vmatpush.msk.msrb.mxu0 %vm95_vm0, %v527_v33  ;;  %2227 = vmatpush.msk.msra.mxu1 %vm95_vm0, %v528_v34  ;;  %633 = vst [vmem:[#allocation1] ss:$2 sm:$0xff] %v629_v30  ;;  %v2817_v30 = vld [vmem:[#allocation4 + $0x178] sm:$0xff]  ;;  %v2826_v33 = vld [vmem:[#allocation4 + $0xd0] sm:$0xff] }
  0x38   :  { %v529_v35 = vld.sshfl [vmem:[#allocation1 + $0x10] sm:$0xff pattern:$0x75316420]  ;;  %v530_v36 = vld.sshfl [vmem:[#allocation1 + $0x18] sm:$0xff pattern:$0x75316420]  ;;  %2214 = vmatmul.msk.f32.vlgmr.msra.gmra.mxu3 %vm91_vm1, %v2206_v18  ;;  %2226 = vmatmul.msk.f32.vlgmr.msrb.gmra.mxu0 %vm91_vm1, %v2224_v31 }
  0x39   :  { %2229 = vmatpush.msk.msrb.mxu2 %vm95_vm0, %v529_v35  ;;  %2228 = vmatmul.msk.f32.vlgmr.msra.gmra.mxu1 %vm91_vm1, %v2224_v31  ;;  %635 = vst [vmem:[#allocation1 + $0x10] ss:$2 sm:$0xff] %v630_v32  ;;  %v2779_v18 = vld [vmem:[#allocation4 + $0x150] sm:$0xff]  ;;  %v2824_v32 = vld [vmem:[#allocation4 + $0xc8] sm:$0xff]  ;;  %v2830_v34 = vld [vmem:[#allocation4 + $0x158] sm:$0xff] }
  0x3a   :  { %2230 = vmatmul.msk.f32.vlgmr.msrb.gmra.mxu2 %vm91_vm1, %v2224_v31  ;;  %2231 = vmatpush.msk.msra.mxu3 %vm95_vm0, %v530_v36  ;;  %3749 = vst [vmem:[#allocation13_spill] sm:$0xff] %v2826_v33  ;;  %v2832_v35 = vld [vmem:[#allocation4 + $0xa0] sm:$0xff]  ;;  %v2836_v36 = vld [vmem:[#allocation4 + $0xa8] sm:$0xff] }
  0x3b   :  { %3750 = vst [vmem:[#allocation14_spill] sm:$0xff] %v2832_v35 }
  0x3e   :  { %v636_v40 = vld.sshfl [vmem:[#allocation1] sm:$0xff pattern:$0x75316420]  ;;  %v637_v41 = vld.sshfl [vmem:[#allocation1 + $0x8] sm:$0xff pattern:$0x75316420] }
  0x3f   :  { %2234 = vmatpush.msk.msra.mxu0 %vm95_vm0, %v636_v40  ;;  %2236 = vmatpush.msk.msrb.mxu1 %vm95_vm0, %v637_v41  ;;  %742 = vst [vmem:[#allocation1] ss:$2 sm:$0xff] %v738_v37  ;;  %v2838_v37 = vld [vmem:[#allocation4 + $0xb0] sm:$0xff]  ;;  %v2848_v40 = vld [vmem:[#allocation4 + $0x88] sm:$0xff] }
  0x40   :  { %v638_v42 = vld.sshfl [vmem:[#allocation1 + $0x10] sm:$0xff pattern:$0x75316420]  ;;  %v639_v43 = vld.sshfl [vmem:[#allocation1 + $0x18] sm:$0xff pattern:$0x75316420]  ;;  %2223 = vmatmul.msk.f32.vlgmr.msrb.gmra.mxu3 %vm91_vm1, %v2215_v24  ;;  %2235 = vmatmul.msk.f32.vlgmr.msra.gmra.mxu0 %vm91_vm1, %v2233_v38 }
  0x41   :  { %2238 = vmatpush.msk.msra.mxu2 %vm95_vm0, %v638_v42  ;;  %2237 = vmatmul.msk.f32.vlgmr.msrb.gmra.mxu1 %vm91_vm1, %v2233_v38  ;;  %744 = vst [vmem:[#allocation1 + $0x10] ss:$2 sm:$0xff] %v739_v39  ;;  %v2797_v24 = vld [vmem:[#allocation4 + $0x198] sm:$0xff]  ;;  %v2844_v39 = vld [vmem:[#allocation4 + $0x80] sm:$0xff]  ;;  %v2850_v41 = vld [vmem:[#allocation4 + $0x90] sm:$0xff] }
  0x42   :  { %2239 = vmatmul.msk.f32.vlgmr.msra.gmra.mxu2 %vm91_vm1, %v2233_v38  ;;  %2240 = vmatpush.msk.msrb.mxu3 %vm95_vm0, %v639_v43  ;;  %3751 = vst [vmem:[#allocation15_spill] sm:$0xff] %v2838_v37  ;;  %v2854_v42 = vld [vmem:[#allocation4 + $0x118] sm:$0xff]  ;;  %v2856_v43 = vld [vmem:[#allocation4 + $0x60] sm:$0xff] }
  0x43   :  { %3752 = vst [vmem:[#allocation16_spill] sm:$0xff] %v2844_v39 }
  0x44   :  { %3753 = vst [vmem:[#allocation17_spill] sm:$0xff] %v2848_v40 }
  0x45   :  { %3754 = vst [vmem:[#allocation18_spill] sm:$0xff] %v2850_v41 }
  0x46   :  { %v745_v47 = vld.sshfl [vmem:[#allocation1] sm:$0xff pattern:$0x75316420]  ;;  %v746_v48 = vld.sshfl [vmem:[#allocation1 + $0x8] sm:$0xff pattern:$0x75316420] }
  0x47   :  { %2243 = vmatpush.msk.msrb.mxu0 %vm95_vm0, %v745_v47  ;;  %2245 = vmatpush.msk.msra.mxu1 %vm95_vm0, %v746_v48  ;;  %851 = vst [vmem:[#allocation1] ss:$2 sm:$0xff] %v847_v44  ;;  %v2860_v44 = vld [vmem:[#allocation4 + $0x68] sm:$0xff]  ;;  %v2868_v47 = vld [vmem:[#allocation4 + $0x40] sm:$0xff] }
  0x48   :  { %v747_v49 = vld.sshfl [vmem:[#allocation1 + $0x10] sm:$0xff pattern:$0x75316420]  ;;  %v748_v50 = vld.sshfl [vmem:[#allocation1 + $0x18] sm:$0xff pattern:$0x75316420]  ;;  %2232 = vmatmul.msk.f32.vlgmr.msra.gmra.mxu3 %vm91_vm1, %v2224_v31  ;;  %2244 = vmatmul.msk.f32.vlgmr.msrb.gmra.mxu0 %vm91_vm1, %v2242_v46 }
  0x49   :  { %2247 = vmatpush.msk.msrb.mxu2 %vm95_vm0, %v747_v49  ;;  %853 = vst [vmem:[#allocation1 + $0x10] ss:$2 sm:$0xff] %v848_v45  ;;  %2246 = vmatmul.msk.f32.vlgmr.msra.gmra.mxu1 %vm91_vm1, %v2242_v46  ;;  %v2819_v31 = vld [vmem:[#allocation4 + $0xc0] sm:$0xff]  ;;  %v2862_v45 = vld [vmem:[#allocation4 + $0x70] sm:$0xff]  ;;  %v2872_v48 = vld [vmem:[#allocation4 + $0x48] sm:$0xff] }
  0x4a   :  { %2248 = vmatmul.msk.f32.vlgmr.msrb.gmra.mxu2 %vm91_vm1, %v2242_v46  ;;  %2249 = vmatpush.msk.msra.mxu3 %vm95_vm0, %v748_v50  ;;  %3755 = vst [vmem:[#allocation19_spill] sm:$0xff] %v2856_v43  ;;  %v2874_v49 = vld [vmem:[#allocation4 + $0x50] sm:$0xff]  ;;  %v2878_v50 = vld [vmem:[#allocation4 + $0xd8] sm:$0xff] }
  0x4b   :  { %3756 = vst [vmem:[#allocation20_spill] sm:$0xff] %v2860_v44 }
  0x4c   :  { %3757 = vst [vmem:[#allocation21_spill] sm:$0xff] %v2862_v45 }
  0x4d   :  { %3758 = vst [vmem:[#allocation22_spill] sm:$0xff] %v2868_v47 }
  0x4e   :  { %v854_v54 = vld.sshfl [vmem:[#allocation1] sm:$0xff pattern:$0x75316420]  ;;  %v855_v55 = vld.sshfl [vmem:[#allocation1 + $0x8] sm:$0xff pattern:$0x75316420] }
  0x4f   :  { %2252 = vmatpush.msk.msra.mxu0 %vm95_vm0, %v854_v54  ;;  %2254 = vmatpush.msk.msrb.mxu1 %vm95_vm0, %v855_v55  ;;  %960 = vst [vmem:[#allocation1] ss:$2 sm:$0xff] %v956_v51  ;;  %v2880_v51 = vld [vmem:[#allocation4 + $0x20] sm:$0xff]  ;;  %v2890_v54 = vld [vmem:[#allocation4 + $0xb8] sm:$0xff] }
  0x50   :  { %v857_v56 = vld.sshfl [vmem:[#allocation1 + $0x18] sm:$0xff pattern:$0x75316420]  ;;  %v856_v57 = vld.sshfl [vmem:[#allocation1 + $0x10] sm:$0xff pattern:$0x75316420]  ;;  %2241 = vmatmul.msk.f32.vlgmr.msrb.gmra.mxu3 %vm91_vm1, %v2233_v38  ;;  %2253 = vmatmul.msk.f32.vlgmr.msra.gmra.mxu0 %vm91_vm1, %v2251_v52 }
  0x51   :  { %2256 = vmatpush.msk.msra.mxu2 %vm95_vm0, %v856_v57  ;;  %2255 = vmatmul.msk.f32.vlgmr.msrb.gmra.mxu1 %vm91_vm1, %v2251_v52  ;;  %962 = vst [vmem:[#allocation1 + $0x10] ss:$2 sm:$0xff] %v957_v53  ;;  %v2842_v38 = vld [vmem:[#allocation4 + $0x138] sm:$0xff]  ;;  %v2886_v53 = vld [vmem:[#allocation4 + $0x30] sm:$0xff]  ;;  %v2892_v55 = vld [vmem:[#allocation4] sm:$0xff] }
  0x52   :  { %2257 = vmatmul.msk.f32.vlgmr.msra.gmra.mxu2 %vm91_vm1, %v2251_v52  ;;  %2258 = vmatpush.msk.msrb.mxu3 %vm95_vm0, %v857_v56  ;;  %3759 = vst [vmem:[#allocation23_spill] sm:$0xff] %v2872_v48  ;;  %v2896_v56 = vld [vmem:[#allocation4 + $0x8] sm:$0xff]  ;;  %v2898_v57 = vld [vmem:[#allocation4 + $0x10] sm:$0xff] }
  0x53   :  { %3760 = vst [vmem:[#allocation24_spill] sm:$0xff] %v2874_v49 }
  0x54   :  { %3761 = vst [vmem:[#allocation25_spill] sm:$0xff] %v2880_v51 }
  0x55   :  { %3763 = vst [vmem:[#allocation27_spill] sm:$0xff] %v2886_v53 }
  0x56   :  { %v963_v59 = vld.sshfl [vmem:[#allocation1] sm:$0xff pattern:$0x75316420]  ;;  %v964_v60 = vld.sshfl [vmem:[#allocation1 + $0x8] sm:$0xff pattern:$0x75316420] }
  0x57   :  { %2261 = vmatpush.msk.msrb.mxu0 %vm95_vm0, %v963_v59  ;;  %2263 = vmatpush.msk.msra.mxu1 %vm95_vm0, %v964_v60  ;;  %3764 = vst [vmem:[#allocation28_spill] sm:$0xff] %v2892_v55  ;;  %v2908_v59 = vld [vmem:[#allocation4 + $0x78] sm:$0xff]  ;;  %v3658_v60 = vmov 0.0  }
  0x58   :  { %v965_v62 = vld.sshfl [vmem:[#allocation1 + $0x10] sm:$0xff pattern:$0x75316420]  ;;  %2250 = vmatmul.msk.f32.vlgmr.msra.gmra.mxu3 %vm91_vm1, %v2242_v46  ;;  %2262 = vmatmul.msk.f32.vlgmr.msrb.gmra.mxu0 %vm91_vm1, %v2713_v58  ;;  %v966_v2 = vld.sshfl [vmem:[#allocation1 + $0x18] sm:$0xff pattern:$0x75316420] }
  0x59   :  { %2265 = vmatpush.msk.msrb.mxu2 %vm95_vm0, %v965_v62  ;;  %2264 = vmatmul.msk.f32.vlgmr.msra.gmra.mxu1 %vm91_vm1, %v2713_v58  ;;  %v2866_v46 = vld [vmem:[#allocation4 + $0xf8] sm:$0xff]  ;;  %3765 = vst [vmem:[#allocation29_spill] sm:$0xff] %v2896_v56 }
  0x5a   :  { %2266 = vmatmul.msk.f32.vlgmr.msrb.gmra.mxu2 %vm91_vm1, %v2713_v58  ;;  %1131 = vmatpush.msra.mxu0 %v2717_v61  ;;  %3766 = vst [vmem:[#allocation30_spill] sm:$0xff] %v2898_v57  ;;  %v2914_v62 = vld [vmem:[#allocation4 + $0x58] sm:$0xff] }
  0x5b   :  { %1151 = vmatpush.msrb.mxu1 %v2722_v63  ;;  %1171 = vmatpush.msra.mxu2 %v2724_v0  ;;  %3767 = vst [vmem:[#allocation31_spill] sm:$0xff] %v2914_v62 }
  0x5c   :  { %1132 = vmatpush.msra.mxu0 %v2729_v1  ;;  %2267 = vmatpush.msk.msra.mxu3 %vm95_vm0, %v966_v2  ;;  %v2918_v2 = vld [vmem:[#allocation4 + $0x38] sm:$0xff] }
  0x5d   :  { %1152 = vmatpush.msrb.mxu1 %v2734_v3  ;;  %1172 = vmatpush.msra.mxu2 %v2736_v4  ;;  %3768 = vst [vmem:[#allocation32_spill] sm:$0xff] %v2918_v2 }
  0x5e   :  { %1133 = vmatpush.msra.mxu0 %v2740_v5 }
  0x5f   :  { %1153 = vmatpush.msrb.mxu1 %v2743_v6  ;;  %1173 = vmatpush.msra.mxu2 %v2745_v7 }
  0x60   :  { %1134 = vmatpush.msra.mxu0 %v2750_v8  ;;  %2259 = vmatmul.msk.f32.vlgmr.msrb.gmra.mxu3 %vm91_vm1, %v2251_v52  ;;  %v2884_v52 = vld [vmem:[#allocation4 + $0x28] sm:$0xff] }
  0x61   :  { %1154 = vmatpush.msrb.mxu1 %v2753_v9  ;;  %1174 = vmatpush.msra.mxu2 %v2755_v10  ;;  %3762 = vst [vmem:[#allocation26_spill] sm:$0xff] %v2884_v52 }
  0x62   :  { %1135 = vmatpush.msra.mxu0 %v2759_v11  ;;  %1191 = vmatpush.msrb.mxu3 %v2761_v12 }
  0x63   :  { %1155 = vmatpush.msrb.mxu1 %v2765_v13  ;;  %1175 = vmatpush.msra.mxu2 %v2767_v14 }
  0x64   :  { %1136 = vmatpush.msra.mxu0 %v2771_v15  ;;  %1192 = vmatpush.msrb.mxu3 %v2773_v16 }
  0x65   :  { %1156 = vmatpush.msrb.mxu1 %v2777_v17  ;;  %1176 = vmatpush.msra.mxu2 %v2779_v18 }
  0x66   :  { %1137 = vmatpush.msra.mxu0 %v2783_v19  ;;  %1193 = vmatpush.msrb.mxu3 %v2785_v20 }
  0x67   :  { %1157 = vmatpush.msrb.mxu1 %v2789_v21  ;;  %1177 = vmatpush.msra.mxu2 %v2791_v22 }
  0x68   :  { %1138 = vmatpush.msra.mxu0 %v2795_v23  ;;  %1194 = vmatpush.msrb.mxu3 %v2797_v24 }
  0x69   :  { %1158 = vmatpush.msrb.mxu1 %v2801_v25  ;;  %1178 = vmatpush.msra.mxu2 %v2803_v26 }
  0x6a   :  { %2268 = vmatmul.msk.f32.vlgmr.msra.gmra.mxu3 %vm91_vm1, %v2713_v58  ;;  %1139 = vmatpush.msra.mxu0 %v2807_v27  ;;  %v2902_v58 = vld [vmem:[#allocation4 + $0x98] sm:$0xff] }
  0x6b   :  { %1159 = vmatpush.msrb.mxu1 %v2811_v28  ;;  %1179 = vmatpush.msra.mxu2 %v2813_v29 }
  0x6c   :  { %1195 = vmatpush.msrb.mxu3 %v2817_v30  ;;  %1140 = vmatpush.msra.mxu0 %v2819_v31 }
  0x6d   :  { %1160 = vmatpush.msrb.mxu1 %v2824_v32  ;;  %1180 = vmatpush.msra.mxu2 %v2826_v33 }
  0x6e   :  { %1196 = vmatpush.msrb.mxu3 %v2830_v34  ;;  %1141 = vmatpush.msra.mxu0 %v2832_v35 }
  0x6f   :  { %1161 = vmatpush.msrb.mxu1 %v2836_v36  ;;  %1181 = vmatpush.msra.mxu2 %v2838_v37 }
  0x70   :  { %1197 = vmatpush.msrb.mxu3 %v2842_v38  ;;  %1142 = vmatpush.msra.mxu0 %v2844_v39 }
  0x71   :  { %1162 = vmatpush.msrb.mxu1 %v2848_v40  ;;  %1182 = vmatpush.msra.mxu2 %v2850_v41 }
  0x72   :  { %1198 = vmatpush.msrb.mxu3 %v2854_v42  ;;  %1143 = vmatpush.msra.mxu0 %v2856_v43 }
  0x73   :  { %1163 = vmatpush.msrb.mxu1 %v2860_v44  ;;  %1183 = vmatpush.msra.mxu2 %v2862_v45 }
  0x74   :  { %1199 = vmatpush.msrb.mxu3 %v2866_v46  ;;  %1144 = vmatpush.msra.mxu0 %v2868_v47 }
  0x75   :  { %1164 = vmatpush.msrb.mxu1 %v2872_v48  ;;  %1184 = vmatpush.msra.mxu2 %v2874_v49 }
  0x76   :  { %1200 = vmatpush.msrb.mxu3 %v2878_v50  ;;  %1145 = vmatpush.msra.mxu0 %v2880_v51 }
  0x77   :  { %1165 = vmatpush.msrb.mxu1 %v2884_v52  ;;  %1185 = vmatpush.msra.mxu2 %v2886_v53 }
  0x78   :  { %1201 = vmatpush.msrb.mxu3 %v2890_v54  ;;  %1146 = vmatpush.msra.mxu0 %v2892_v55 }
  0x79   :  { %1166 = vmatpush.msrb.mxu1 %v2896_v56  ;;  %1186 = vmatpush.msra.mxu2 %v2898_v57  ;;  %v2924_v57 = vld [vmem:[#allocation4 + $0x18] sm:$0xff] }
  0x7a   :  { %1202 = vmatpush.msrb.mxu3 %v2902_v58  ;;  %1147 = vmatmul.f32.vlgmr.msra.gmra.mxu0 %v3658_v60  ;;  %3769 = vst [vmem:[#allocation33_spill] sm:$0xff] %v2924_v57 }
  0x7b   :  { %1167 = vmatmul.f32.vlgmr.msrb.gmra.mxu1 %v3658_v60  ;;  %1187 = vmatmul.f32.vlgmr.msra.gmra.mxu2 %v3658_v60 }
  0x7c   :  { %1203 = vmatpush.msrb.mxu3 %v2908_v59  ;;  %1237 = vmatpush.msrb.mxu0 %v2717_v61 }
  0x7d   :  { %1257 = vmatpush.msra.mxu1 %v2722_v63  ;;  %1277 = vmatpush.msrb.mxu2 %v2724_v0 }
  0x7e   :  { %1204 = vmatpush.msrb.mxu3 %v2914_v62  ;;  %1238 = vmatpush.msrb.mxu0 %v2729_v1 }
  0x7f   :  { %1258 = vmatpush.msra.mxu1 %v2734_v3  ;;  %1278 = vmatpush.msrb.mxu2 %v2736_v4 }
  0x80   :  { %1205 = vmatpush.msrb.mxu3 %v2918_v2  ;;  %1239 = vmatpush.msrb.mxu0 %v2740_v5 }
  0x81   :  { %1259 = vmatpush.msra.mxu1 %v2743_v6  ;;  %1279 = vmatpush.msrb.mxu2 %v2745_v7 }
  0x82   :  { %1206 = vmatpush.msrb.mxu3 %v2924_v57  ;;  %1240 = vmatpush.msrb.mxu0 %v2750_v8 }
  0x83   :  { %1207 = vmatmul.f32.vlgmr.msrb.gmra.mxu3 %v3658_v60  ;;  %1260 = vmatpush.msra.mxu1 %v2753_v9  ;;  %v2973_v60 = vld [vmem:[%s3648_s6] sm:$0xf] }
  0x84   :  { %1297 = vmatpush.msra.mxu3 %v2761_v12  ;;  %1280 = vmatpush.msrb.mxu2 %v2755_v10 }
  0x85   :  { %1241 = vmatpush.msrb.mxu0 %v2759_v11  ;;  %1261 = vmatpush.msra.mxu1 %v2765_v13 }
  0x86   :  { %1298 = vmatpush.msra.mxu3 %v2773_v16  ;;  %1281 = vmatpush.msrb.mxu2 %v2767_v14 }
  0x87   :  { %1242 = vmatpush.msrb.mxu0 %v2771_v15  ;;  %1262 = vmatpush.msra.mxu1 %v2777_v17 }
  0x88   :  { %1299 = vmatpush.msra.mxu3 %v2785_v20  ;;  %1282 = vmatpush.msrb.mxu2 %v2779_v18 }
  0x89   :  { %1243 = vmatpush.msrb.mxu0 %v2783_v19  ;;  %1263 = vmatpush.msra.mxu1 %v2789_v21 }
  0x8a   :  { %1300 = vmatpush.msra.mxu3 %v2797_v24  ;;  %1283 = vmatpush.msrb.mxu2 %v2791_v22 }
  0x8b   :  { %1244 = vmatpush.msrb.mxu0 %v2795_v23  ;;  %1264 = vmatpush.msra.mxu1 %v2801_v25 }
  0x8c   :  { %1301 = vmatpush.msra.mxu3 %v2817_v30  ;;  %1284 = vmatpush.msrb.mxu2 %v2803_v26 }
  0x8d   :  { %1245 = vmatpush.msrb.mxu0 %v2807_v27  ;;  %1265 = vmatpush.msra.mxu1 %v2811_v28 }
  0x8e   :  { %1302 = vmatpush.msra.mxu3 %v2830_v34  ;;  %1285 = vmatpush.msrb.mxu2 %v2813_v29 }
  0x8f   :  { %1246 = vmatpush.msrb.mxu0 %v2819_v31  ;;  %1266 = vmatpush.msra.mxu1 %v2824_v32 }
  0x90   :  { %1303 = vmatpush.msra.mxu3 %v2842_v38  ;;  %1286 = vmatpush.msrb.mxu2 %v2826_v33 }
  0x91   :  { %1247 = vmatpush.msrb.mxu0 %v2832_v35  ;;  %1267 = vmatpush.msra.mxu1 %v2836_v36 }
  0x92   :  { %1304 = vmatpush.msra.mxu3 %v2854_v42  ;;  %1287 = vmatpush.msrb.mxu2 %v2838_v37 }
  0x93   :  { %1248 = vmatpush.msrb.mxu0 %v2844_v39  ;;  %1268 = vmatpush.msra.mxu1 %v2848_v40  ;;  %v186_v40 = vperm.slane %v2973_v60, 1 }
  0x94   :  { %1305 = vmatpush.msra.mxu3 %v2866_v46  ;;  %1288 = vmatpush.msrb.mxu2 %v2850_v41  ;;  %v185_v41 = vperm.slane %v2973_v60, 0 }
  0x95   :  { %v141_v35 = vpop.f32.mrf.mxu1  ;;  %1249 = vmatpush.msrb.mxu0 %v2856_v43  ;;  %1269 = vmatpush.msra.mxu1 %v2860_v44 }
  0x96   :  { %1306 = vmatpush.msra.mxu3 %v2878_v50  ;;  %1289 = vmatpush.msrb.mxu2 %v2862_v45  ;;  %v2989_v45 = vsub.f32 %v186_v40, %v141_v35 }
  0x97   :  { %1250 = vmatpush.msrb.mxu0 %v2868_v47  ;;  %1270 = vmatpush.msra.mxu1 %v2872_v48 }
  0x98   :  { %1307 = vmatpush.msra.mxu3 %v2890_v54  ;;  %1290 = vmatpush.msrb.mxu2 %v2874_v49  ;;  %v3770_v49 = vld [vmem:[#allocation30_spill] sm:$0xff] }
  0x99   :  { %1251 = vmatpush.msrb.mxu0 %v2880_v51  ;;  %1271 = vmatpush.msra.mxu1 %v2884_v52 }
  0x9a   :  { %1308 = vmatpush.msra.mxu3 %v2902_v58  ;;  %1291 = vmatpush.msrb.mxu2 %v2886_v53 }
  0x9b   :  { %v121_v44 = vpop.f32.mrf.mxu3  ;;  %1252 = vmatpush.msrb.mxu0 %v2892_v55  ;;  %1272 = vmatpush.msra.mxu1 %v2896_v56 }
  0x9c   :  { %v2993_v48 = vsub.f32 %v185_v41, %v121_v44  ;;  %1309 = vmatpush.msra.mxu3 %v2908_v59  ;;  %1292 = vmatpush.msrb.mxu2 %v3770_v49  ;;  %v187_v41 = vperm.slane %v2973_v60, 2 }
  0x9d   :  { %v233_v51 = vpop.f32.mrf.mxu0  ;;  %1343 = vmatpush.msra.mxu0 %v2717_v61  ;;  %1363 = vmatpush.msrb.mxu1 %v2722_v63 }
  0x9e   :  { %v234_v53 = vadd.f32 %v233_v51, %v2993_v48  ;;  %v253_v35 = vpop.f32.mrf.mxu1  ;;  %1310 = vmatpush.msra.mxu3 %v2914_v62  ;;  %1383 = vmatpush.msra.mxu2 %v2724_v0 }
  0x9f   :  { %v254_v40 = vadd.f32 %v253_v35, %v2989_v45  ;;  %1344 = vmatpush.msra.mxu0 %v2729_v1  ;;  %1364 = vmatpush.msrb.mxu1 %v2734_v3 }
  0xa0   :  { %296 = vst [vmem:[#allocation2 + $0xb0] sm:$0x3f] %v234_v53  ;;  %1311 = vmatpush.msra.mxu3 %v2918_v2  ;;  %1384 = vmatpush.msra.mxu2 %v2736_v4 }
  0xa1   :  { %297 = vst [vmem:[#allocation2] sm:$0x3f] %v254_v40  ;;  %1345 = vmatpush.msra.mxu0 %v2740_v5  ;;  %1365 = vmatpush.msrb.mxu1 %v2743_v6 }
  0xa2   :  { %1312 = vmatpush.msra.mxu3 %v2924_v57  ;;  %1385 = vmatpush.msra.mxu2 %v2745_v7 }
  0xa3   :  { %v161_v44 = vpop.f32.mrf.mxu3  ;;  %1346 = vmatpush.msra.mxu0 %v2750_v8  ;;  %1366 = vmatpush.msrb.mxu1 %v2753_v9 }
  0xa4   :  { %1403 = vmatpush.msrb.mxu3 %v2761_v12  ;;  %v3014_v51 = vsub.f32 %v187_v41, %v161_v44  ;;  %1386 = vmatpush.msra.mxu2 %v2755_v10 }
  0xa5   :  { %v273_v53 = vpop.f32.mrf.mxu2  ;;  %v341_v35 = vpop.f32.mrf.mxu0  ;;  %1347 = vmatpush.msra.mxu0 %v2759_v11  ;;  %1367 = vmatpush.msrb.mxu1 %v2765_v13 }
  0xa6   :  { %1404 = vmatpush.msrb.mxu3 %v2773_v16  ;;  %v274_v40 = vadd.f32 %v273_v53, %v3014_v51  ;;  %v342_v7 = vadd.f32 %v341_v35, %v2993_v48  ;;  %v361_v6 = vpop.f32.mrf.mxu1  ;;  %1387 = vmatpush.msra.mxu2 %v2767_v14  ;;  %v188_v53 = vperm.slane %v2973_v60, 3  ;;  %v3771_v60 = vld [vmem:[#allocation14_spill] sm:$0xff] }
  0xa7   :  { %v362_v41 = vadd.f32 %v361_v6, %v2989_v45  ;;  %1348 = vmatpush.msra.mxu0 %v2771_v15  ;;  %1368 = vmatpush.msrb.mxu1 %v2777_v17 }
  0xa8   :  { %1405 = vmatpush.msrb.mxu3 %v2785_v20  ;;  %298 = vst [vmem:[#allocation2 + $0xd8] sm:$0x3f] %v274_v40  ;;  %1388 = vmatpush.msra.mxu2 %v2779_v18 }
  0xa9   :  { %405 = vst [vmem:[#allocation2 + $0x50] sm:$0x3f] %v342_v7  ;;  %1349 = vmatpush.msra.mxu0 %v2783_v19  ;;  %1369 = vmatpush.msrb.mxu1 %v2789_v21 }
  0xaa   :  { %1406 = vmatpush.msrb.mxu3 %v2797_v24  ;;  %406 = vst [vmem:[#allocation2 + $0x68] sm:$0x3f] %v362_v41  ;;  %1389 = vmatpush.msra.mxu2 %v2791_v22 }
  0xab   :  { %v181_v6 = vpop.f32.mrf.mxu3  ;;  %1350 = vmatpush.msra.mxu0 %v2795_v23  ;;  %1370 = vmatpush.msrb.mxu1 %v2801_v25 }
  0xac   :  { %1407 = vmatpush.msrb.mxu3 %v2817_v30  ;;  %1390 = vmatpush.msra.mxu2 %v2803_v26 }
  0xad   :  { %v381_v44 = vpop.f32.mrf.mxu2  ;;  %v450_v7 = vpop.f32.mrf.mxu0  ;;  %1351 = vmatpush.msra.mxu0 %v2807_v27  ;;  %1371 = vmatpush.msrb.mxu1 %v2811_v28 }
  0xae   :  { %1408 = vmatpush.msrb.mxu3 %v2830_v34  ;;  %v382_v35 = vadd.f32 %v381_v44, %v3014_v51  ;;  %v451_v40 = vadd.f32 %v450_v7, %v2993_v48  ;;  %v470_v41 = vpop.f32.mrf.mxu1  ;;  %1391 = vmatpush.msra.mxu2 %v2813_v29  ;;  %v3051_v44 = vsub.f32 %v188_v53, %v181_v6 }
  0xaf   :  { %v471_v25 = vadd.f32 %v470_v41, %v2989_v45  ;;  %1352 = vmatpush.msra.mxu0 %v2819_v31  ;;  %1372 = vmatpush.msrb.mxu1 %v2824_v32  ;;  %v3772_v41 = vld [vmem:[#allocation17_spill] sm:$0xff] }
  0xb0   :  { %1409 = vmatpush.msrb.mxu3 %v2842_v38  ;;  %407 = vst [vmem:[#allocation2 + $0x30] sm:$0x3f] %v382_v35  ;;  %1392 = vmatpush.msra.mxu2 %v2826_v33 }
  0xb1   :  { %514 = vst [vmem:[#allocation2 + $0x80] sm:$0x3f] %v451_v40  ;;  %1353 = vmatpush.msra.mxu0 %v3771_v60  ;;  %1373 = vmatpush.msrb.mxu1 %v2836_v36  ;;  %v3773_v40 = vld [vmem:[#allocation18_spill] sm:$0xff] }
  0xb2   :  { %1410 = vmatpush.msrb.mxu3 %v2854_v42  ;;  %515 = vst [vmem:[#allocation2 + $0x88] sm:$0x3f] %v471_v25  ;;  %1393 = vmatpush.msra.mxu2 %v2838_v37  ;;  %v3774_v37 = vld [vmem:[#allocation20_spill] sm:$0xff] }
  0xb3   :  { %v293_v7 = vpop.f32.mrf.mxu3  ;;  %1354 = vmatpush.msra.mxu0 %v2844_v39  ;;  %1374 = vmatpush.msrb.mxu1 %v3772_v41  ;;  %v3775_v39 = vld [vmem:[#allocation21_spill] sm:$0xff] }
  0xb4   :  { %1411 = vmatpush.msrb.mxu3 %v2866_v46  ;;  %v294_v35 = vadd.f32 %v293_v7, %v3051_v44  ;;  %1394 = vmatpush.msra.mxu2 %v3773_v40  ;;  %v3776_v40 = vld [vmem:[#allocation23_spill] sm:$0xff] }
  0xb5   :  { %v490_v33 = vpop.f32.mrf.mxu2  ;;  %v559_v60 = vpop.f32.mrf.mxu0  ;;  %1355 = vmatpush.msra.mxu0 %v2856_v43  ;;  %1375 = vmatpush.msrb.mxu1 %v3774_v37  ;;  %v3777_v43 = vld [vmem:[#allocation24_spill] sm:$0xff] }
  0xb6   :  { %1412 = vmatpush.msrb.mxu3 %v2878_v50  ;;  %299 = vst [vmem:[#allocation2 + $0x18] sm:$0x3f] %v294_v35  ;;  %v491_v25 = vadd.f32 %v490_v33, %v3014_v51  ;;  %v560_v6 = vadd.f32 %v559_v60, %v2993_v48  ;;  %v579_v53 = vpop.f32.mrf.mxu1  ;;  %1395 = vmatpush.msra.mxu2 %v3775_v39  ;;  %v3778_v33 = vld [vmem:[#allocation25_spill] sm:$0xff]  ;;  %v3779_v60 = vld [vmem:[#allocation27_spill] sm:$0xff] }
  0xb7   :  { %v580_v7 = vadd.f32 %v579_v53, %v2989_v45  ;;  %1356 = vmatpush.msra.mxu0 %v2868_v47  ;;  %1376 = vmatpush.msrb.mxu1 %v3776_v40 }
  0xb8   :  { %1413 = vmatpush.msrb.mxu3 %v2890_v54  ;;  %516 = vst [vmem:[#allocation2 + $0xe8] sm:$0x3f] %v491_v25  ;;  %1396 = vmatpush.msra.mxu2 %v3777_v43 }
  0xb9   :  { %623 = vst [vmem:[#allocation2 + $0x60] sm:$0x3f] %v560_v6  ;;  %1357 = vmatpush.msra.mxu0 %v3778_v33  ;;  %1377 = vmatpush.msrb.mxu1 %v2884_v52 }
  0xba   :  { %1414 = vmatpush.msrb.mxu3 %v2902_v58  ;;  %624 = vst [vmem:[#allocation2 + $0xf0] sm:$0x3f] %v580_v7  ;;  %1397 = vmatpush.msra.mxu2 %v3779_v60 }
  0xbb   :  { %v401_v35 = vpop.f32.mrf.mxu3  ;;  %1358 = vmatpush.msra.mxu0 %v2892_v55  ;;  %1378 = vmatpush.msrb.mxu1 %v2896_v56 }
  0xbc   :  { %1415 = vmatpush.msrb.mxu3 %v2908_v59  ;;  %v402_v25 = vadd.f32 %v401_v35, %v3051_v44  ;;  %1398 = vmatpush.msra.mxu2 %v3770_v49 }
  0xbd   :  { %v599_v6 = vpop.f32.mrf.mxu2  ;;  %v668_v53 = vpop.f32.mrf.mxu0 }
  0xbe   :  { %1416 = vmatpush.msrb.mxu3 %v2914_v62  ;;  %408 = vst [vmem:[#allocation2 + $0x48] sm:$0x3f] %v402_v25  ;;  %v600_v7 = vadd.f32 %v599_v6, %v3014_v51  ;;  %v669_v60 = vadd.f32 %v668_v53, %v2993_v48  ;;  %v688_v52 = vpop.f32.mrf.mxu1 }
  0xbf   :  { %v689_v33 = vadd.f32 %v688_v52, %v2989_v45 }
  0xc0   :  { %1417 = vmatpush.msrb.mxu3 %v2918_v2  ;;  %625 = vst [vmem:[#allocation2 + $0x8] sm:$0x3f] %v600_v7 }
  0xc1   :  { %732 = vst [vmem:[#allocation2 + $0x38] sm:$0x3f] %v669_v60 }
  0xc2   :  { %1418 = vmatpush.msrb.mxu3 %v2924_v57  ;;  %733 = vst [vmem:[#allocation2 + $0x58] sm:$0x3f] %v689_v33 }
  0xc3   :  { %v510_v35 = vpop.f32.mrf.mxu3 }
  0xc4   :  { %v511_v49 = vadd.f32 %v510_v35, %v3051_v44 }
  0xc5   :  { %v708_v56 = vpop.f32.mrf.mxu2  ;;  %v777_v55 = vpop.f32.mrf.mxu0 }
  0xc6   :  { %517 = vst [vmem:[#allocation2 + $0xb8] sm:$0x3f] %v511_v49  ;;  %v709_v25 = vadd.f32 %v708_v56, %v3014_v51  ;;  %v778_v6 = vadd.f32 %v777_v55, %v2993_v48  ;;  %v797_v53 = vpop.f32.mrf.mxu1 }
  0xc7   :  { %v798_v52 = vadd.f32 %v797_v53, %v2989_v45 }
  0xc8   :  { %734 = vst [vmem:[#allocation2 + $0x40] sm:$0x3f] %v709_v25 }
  0xc9   :  { %841 = vst [vmem:[#allocation2 + $0xe0] sm:$0x3f] %v778_v6 }
  0xca   :  { %842 = vst [vmem:[#allocation2 + $0x90] sm:$0x3f] %v798_v52 }
  0xcb   :  { %v619_v60 = vpop.f32.mrf.mxu3 }
  0xcc   :  { %v620_v7 = vadd.f32 %v619_v60, %v3051_v44 }
  0xcd   :  { %v817_v33 = vpop.f32.mrf.mxu2  ;;  %v886_v57 = vpop.f32.mrf.mxu0 }
  0xce   :  { %626 = vst [vmem:[#allocation2 + $0x78] sm:$0x3f] %v620_v7  ;;  %v818_v35 = vadd.f32 %v817_v33, %v3014_v51  ;;  %v887_v49 = vadd.f32 %v886_v57, %v2993_v48  ;;  %v906_v2 = vpop.f32.mrf.mxu1 }
  0xcf   :  { %v907_v56 = vadd.f32 %v906_v2, %v2989_v45 }
  0xd0   :  { %843 = vst [vmem:[#allocation2 + $0x70] sm:$0x3f] %v818_v35 }
  0xd1   :  { %950 = vst [vmem:[#allocation2 + $0xa8] sm:$0x3f] %v887_v49 }
  0xd2   :  { %951 = vst [vmem:[#allocation2 + $0xd0] sm:$0x3f] %v907_v56 }
  0xd3   :  { %v728_v55 = vpop.f32.mrf.mxu3 }
  0xd4   :  { %v729_v25 = vadd.f32 %v728_v55, %v3051_v44 }
  0xd5   :  { %v926_v6 = vpop.f32.mrf.mxu2  ;;  %v995_v53 = vpop.f32.mrf.mxu0 }
  0xd6   :  { %735 = vst [vmem:[#allocation2 + $0xc8] sm:$0x3f] %v729_v25  ;;  %v927_v52 = vadd.f32 %v926_v6, %v3014_v51  ;;  %v996_v60 = vadd.f32 %v995_v53, %v2993_v48  ;;  %v1015_v7 = vpop.f32.mrf.mxu1 }
  0xd7   :  { %v1016_v33 = vadd.f32 %v1015_v7, %v2989_v45  ;;  %v1063_v45 = vld [vmem:[#allocation2 + $0xb0] sm:$0x3f] }
  0xd8   :  { %952 = vst [vmem:[#allocation2 + $0x10] sm:$0x3f] %v927_v52  ;;  %v1064_v52 = vld [vmem:[#allocation2] sm:$0x3f] }
  0xd9   :  { %1059 = vst [vmem:[#allocation2 + $0xa0] sm:$0x3f] %v996_v60 }
  0xda   :  { %1060 = vst [vmem:[#allocation2 + $0xf8] sm:$0x3f] %v1016_v33 }
  0xdb   :  { %v837_v57 = vpop.f32.mrf.mxu3 }
  0xdc   :  { %v838_v2 = vadd.f32 %v837_v57, %v3051_v44 }
  0xdd   :  { %v1035_v35 = vpop.f32.mrf.mxu2 }
  0xde   :  { %844 = vst [vmem:[#allocation2 + $0xc0] sm:$0x3f] %v838_v2  ;;  %v1036_v49 = vadd.f32 %v1035_v35, %v3014_v51  ;;  %v1065_v51 = vld [vmem:[#allocation2 + $0xd8] sm:$0x3f] }
  0xe0   :  { %1061 = vst [vmem:[#allocation2 + $0x20] sm:$0x3f] %v1036_v49 }
  0xe3   :  { %v946_v56 = vpop.f32.mrf.mxu3 }
  0xe4   :  { %v947_v55 = vadd.f32 %v946_v56, %v3051_v44 }
  0xe6   :  { %953 = vst [vmem:[#allocation2 + $0x28] sm:$0x3f] %v947_v55 }
  0xed   :  { %v1055_v25 = vpop.f32.mrf.mxu3 }
  0xee   :  { %v1056_v48 = vadd.f32 %v1055_v25, %v3051_v44 }
  0xf0   :  { %1062 = vst [vmem:[#allocation2 + $0x98] sm:$0x3f] %v1056_v48  ;;  %v1066_v48 = vld [vmem:[#allocation2 + $0x18] sm:$0x3f] }
  0xf7   :  { %v1148_v6 = vpop.f32.mrf.mxu0 }
  0xf8   :  { %v1211_v53 = vadd.f32 %v1148_v6, %v1063_v45  ;;  %v1168_v60 = vpop.f32.mrf.mxu1 }
  0xf9   :  { %v1212_v7 = vadd.f32 %v1168_v60, %v1064_v52 }
  0xfa   :  { %v1215_v33 = vmul.f32 0.5, %v1211_v53 }
  0xfb   :  { %v1219_v57 = vmul.f32 0.5, %v1212_v7 }
  0xfc   :  { %2288 = vtanh.f32 %v1215_v33 }
  0xfd   :  { %2290 = vtanh.f32 %v1219_v57 }
  0xfe   :  { %v1188_v2 = vpop.f32.mrf.mxu2 }
  0xff   :  { %v1213_v35 = vadd.f32 %v1188_v2, %v1065_v51 }
 0x101   :  { %2292 = vtanh.f32 %v1213_v35  ;;  %v3790_v35 = vld [vmem:[#allocation24_spill] sm:$0xff] }
 0x102   :  { %v2289_v49 = vpop.eup %2288 }
 0x103   :  { %v2291_v56 = vpop.eup %2290  ;;  %v1217_v55 = vmul.f32 0.5, %v2289_v49  ;;  %v3791_v49 = vld [vmem:[#allocation31_spill] sm:$0xff] }
 0x104   :  { %v1221_v62 = vmul.f32 0.5, %v2291_v56  ;;  %v3792_v56 = vld [vmem:[#allocation25_spill] sm:$0xff] }
 0x105   :  { %v1218_v44 = vadd.f32 0.5, %v1217_v55  ;;  %v3793_v55 = vld [vmem:[#allocation26_spill] sm:$0xff] }
 0x106   :  { %v1222_v25 = vadd.f32 0.5, %v1221_v62  ;;  %v1208_v43 = vpop.f32.mrf.mxu3  ;;  %v3781_v62 = vld [vmem:[#allocation11_spill] sm:$0xff] }
 0x107   :  { %v2293_v45 = vpop.eup %2292  ;;  %v1214_v6 = vadd.f32 %v1208_v43, %v1066_v48  ;;  %v3780_v43 = vld [vmem:[#allocation10_spill] sm:$0xff]  ;;  %v3796_v48 = vld [vmem:[#allocation28_spill] sm:$0xff] }
 0x108   :  { %v1228_v40 = vmul.f32 0.0, %v1222_v25  ;;  %v1229_v52 = vmul.f32 %v2293_v45, %v1218_v44  ;;  %v3794_v44 = vld [vmem:[#allocation27_spill] sm:$0xff]  ;;  %v3795_v25 = vld [vmem:[#allocation32_spill] sm:$0xff]  ;;  %v3797_v45 = vld [vmem:[#allocation29_spill] sm:$0xff] }
 0x109   :  { %v1224_v53 = vmul.f32 0.5, %v1214_v6  ;;  %v3798_v6 = vld [vmem:[#allocation30_spill] sm:$0xff] }
 0x10a   :  { %v3102_v60 = vadd.f32 %v1229_v52, %v1228_v40  ;;  %v3789_v40 = vld [vmem:[#allocation23_spill] sm:$0xff]  ;;  %v3799_v52 = vld [vmem:[#allocation33_spill] sm:$0xff] }
 0x10b   :  { %2294 = vtanh.f32 %v1224_v53  ;;  %v1233_v53 = vld [vmem:[#allocation2 + $0x50] sm:$0x3f] }
 0x10c   :  { %2296 = vtanh.f32 %v3102_v60 }
 0x111   :  { %v2295_v7 = vpop.eup %2294 }
 0x112   :  { %v1226_v33 = vmul.f32 0.5, %v2295_v7  ;;  %v2297_v51 = vpop.eup %2296 }
 0x114   :  { %v1227_v57 = vadd.f32 0.5, %v1226_v33  ;;  %v1234_v33 = vld [vmem:[#allocation2 + $0x68] sm:$0x3f] }
 0x116   :  { %v1232_v2 = vmul.f32 %v2297_v51, %v1227_v57 }
 0x118   :  { %1253 = vmatmul.f32.vlgmr.msrb.gmra.mxu0 %v1232_v2  ;;  %1273 = vmatmul.f32.vlgmr.msra.gmra.mxu1 %v1232_v2 }
 0x119   :  { %1293 = vmatmul.f32.vlgmr.msrb.gmra.mxu2 %v1232_v2  ;;  %1313 = vmatmul.f32.vlgmr.msra.gmra.mxu3 %v1232_v2 }
 0x11a   :  { %1449 = vmatpush.msrb.mxu0 %v2717_v61  ;;  %1469 = vmatpush.msra.mxu1 %v2722_v63  ;;  %v3782_v61 = vld [vmem:[#allocation12_spill] sm:$0xff]  ;;  %v3783_v63 = vld [vmem:[#allocation13_spill] sm:$0xff] }
 0x11b   :  { %1489 = vmatpush.msrb.mxu2 %v2724_v0  ;;  %1509 = vmatpush.msra.mxu3 %v2761_v12  ;;  %v3784_v0 = vld [vmem:[#allocation14_spill] sm:$0xff] }
 0x11c   :  { %1450 = vmatpush.msrb.mxu0 %v2729_v1  ;;  %1470 = vmatpush.msra.mxu1 %v2734_v3  ;;  %v3785_v1 = vld [vmem:[#allocation15_spill] sm:$0xff]  ;;  %v3786_v3 = vld [vmem:[#allocation16_spill] sm:$0xff] }
 0x11d   :  { %1490 = vmatpush.msrb.mxu2 %v2736_v4  ;;  %1510 = vmatpush.msra.mxu3 %v2773_v16  ;;  %v3787_v4 = vld [vmem:[#allocation18_spill] sm:$0xff] }
 0x11e   :  { %1451 = vmatpush.msrb.mxu0 %v2740_v5  ;;  %1471 = vmatpush.msra.mxu1 %v3780_v43  ;;  %v3788_v5 = vld [vmem:[#allocation19_spill] sm:$0xff] }
 0x11f   :  { %1491 = vmatpush.msrb.mxu2 %v3781_v62  ;;  %1511 = vmatpush.msra.mxu3 %v2785_v20 }
 0x120   :  { %1452 = vmatpush.msrb.mxu0 %v2750_v8  ;;  %1472 = vmatpush.msra.mxu1 %v2753_v9 }
 0x121   :  { %1492 = vmatpush.msrb.mxu2 %v2755_v10  ;;  %1512 = vmatpush.msra.mxu3 %v2797_v24 }
 0x122   :  { %1453 = vmatpush.msrb.mxu0 %v2759_v11  ;;  %1473 = vmatpush.msra.mxu1 %v2765_v13 }
 0x123   :  { %1493 = vmatpush.msrb.mxu2 %v2767_v14  ;;  %1513 = vmatpush.msra.mxu3 %v2817_v30 }
 0x124   :  { %1454 = vmatpush.msrb.mxu0 %v2771_v15  ;;  %1474 = vmatpush.msra.mxu1 %v2777_v17 }
 0x125   :  { %1494 = vmatpush.msrb.mxu2 %v2779_v18  ;;  %1514 = vmatpush.msra.mxu3 %v2830_v34 }
 0x126   :  { %1455 = vmatpush.msrb.mxu0 %v2783_v19  ;;  %1475 = vmatpush.msra.mxu1 %v2789_v21 }
 0x127   :  { %1495 = vmatpush.msrb.mxu2 %v2791_v22  ;;  %1515 = vmatpush.msra.mxu3 %v2842_v38 }
 0x128   :  { %1456 = vmatpush.msrb.mxu0 %v2795_v23  ;;  %1476 = vmatpush.msra.mxu1 %v3782_v61 }
 0x129   :  { %1496 = vmatpush.msrb.mxu2 %v2803_v26  ;;  %1516 = vmatpush.msra.mxu3 %v2854_v42 }
 0x12a   :  { %1457 = vmatpush.msrb.mxu0 %v2807_v27  ;;  %1477 = vmatpush.msra.mxu1 %v2811_v28 }
 0x12b   :  { %1497 = vmatpush.msrb.mxu2 %v2813_v29  ;;  %1517 = vmatpush.msra.mxu3 %v2866_v46 }
 0x12c   :  { %1458 = vmatpush.msrb.mxu0 %v2819_v31  ;;  %1478 = vmatpush.msra.mxu1 %v2824_v32 }
 0x12d   :  { %1498 = vmatpush.msrb.mxu2 %v3783_v63  ;;  %1518 = vmatpush.msra.mxu3 %v2878_v50 }
 0x12e   :  { %1459 = vmatpush.msrb.mxu0 %v3784_v0  ;;  %1479 = vmatpush.msra.mxu1 %v2836_v36 }
 0x12f   :  { %1499 = vmatpush.msrb.mxu2 %v3785_v1  ;;  %1519 = vmatpush.msra.mxu3 %v2890_v54 }
 0x130   :  { %1460 = vmatpush.msrb.mxu0 %v3786_v3  ;;  %1480 = vmatpush.msra.mxu1 %v3772_v41 }
 0x131   :  { %1500 = vmatpush.msrb.mxu2 %v3787_v4  ;;  %1520 = vmatpush.msra.mxu3 %v2902_v58 }
 0x132   :  { %1461 = vmatpush.msrb.mxu0 %v3788_v5  ;;  %1481 = vmatpush.msra.mxu1 %v3774_v37 }
 0x133   :  { %1501 = vmatpush.msrb.mxu2 %v3775_v39  ;;  %1521 = vmatpush.msra.mxu3 %v2908_v59 }
 0x134   :  { %1462 = vmatpush.msrb.mxu0 %v2868_v47  ;;  %1482 = vmatpush.msra.mxu1 %v3789_v40 }
 0x135   :  { %1502 = vmatpush.msrb.mxu2 %v3790_v35  ;;  %1522 = vmatpush.msra.mxu3 %v3791_v49 }
 0x136   :  { %1463 = vmatpush.msrb.mxu0 %v3792_v56  ;;  %1483 = vmatpush.msra.mxu1 %v3793_v55  ;;  %v1236_v55 = vld [vmem:[#allocation2 + $0x48] sm:$0x3f] }
 0x137   :  { %1503 = vmatpush.msrb.mxu2 %v3794_v44  ;;  %1523 = vmatpush.msra.mxu3 %v3795_v25  ;;  %v1235_v44 = vld [vmem:[#allocation2 + $0x30] sm:$0x3f] }
 0x138   :  { %1464 = vmatpush.msrb.mxu0 %v3796_v48  ;;  %1484 = vmatpush.msra.mxu1 %v3797_v45 }
 0x139   :  { %1504 = vmatpush.msrb.mxu2 %v3798_v6  ;;  %1524 = vmatpush.msra.mxu3 %v3799_v52 }
 0x195   :  { %v1254_v7 = vpop.f32.mrf.mxu0  ;;  %v1274_v57 = vpop.f32.mrf.mxu1 }
 0x196   :  { %v1317_v51 = vadd.f32 %v1254_v7, %v1233_v53  ;;  %v1318_v2 = vadd.f32 %v1274_v57, %v1234_v33 }
 0x198   :  { %v1321_v43 = vmul.f32 0.5, %v1317_v51  ;;  %v1325_v62 = vmul.f32 0.5, %v1318_v2 }
 0x19a   :  { %2298 = vtanh.f32 %v1321_v43  ;;  %v3268_v43 = vld [vmem:[#allocation4 + $0x1d8] sm:$0xff] }
 0x19b   :  { %2300 = vtanh.f32 %v1325_v62  ;;  %v3274_v62 = vld [vmem:[#allocation4 + $0x1b8] sm:$0xff] }
 0x19c   :  { %v1294_v25 = vpop.f32.mrf.mxu2  ;;  %v1314_v48 = vpop.f32.mrf.mxu3 }
 0x19d   :  { %v1319_v56 = vadd.f32 %v1294_v25, %v1235_v44  ;;  %v1320_v45 = vadd.f32 %v1314_v48, %v1236_v55  ;;  %v3189_v48 = vld [vmem:[#allocation4 + $0x1d0] sm:$0xff] }
 0x19f   :  { %2302 = vtanh.f32 %v1319_v56  ;;  %v1330_v6 = vmul.f32 0.5, %v1320_v45  ;;  %v3193_v45 = vld [vmem:[#allocation4 + $0x1a0] sm:$0xff] }
 0x1a0   :  { %v2299_v49 = vpop.eup %2298 }
 0x1a1   :  { %v2301_v52 = vpop.eup %2300  ;;  %v1323_v35 = vmul.f32 0.5, %v2299_v49  ;;  %2304 = vtanh.f32 %v1330_v6  ;;  %v3173_v49 = vld [vmem:[#allocation4 + $0x1e0] sm:$0xff]  ;;  %v3196_v6 = vld [vmem:[#allocation4 + $0x1a8] sm:$0xff] }
 0x1a2   :  { %v1327_v40 = vmul.f32 0.5, %v2301_v52  ;;  %v3262_v52 = vld [vmem:[#allocation4 + $0x1f8] sm:$0xff] }
 0x1a3   :  { %v1324_v47 = vadd.f32 0.5, %v1323_v35  ;;  %v3186_v35 = vld [vmem:[#allocation4 + $0x1c8] sm:$0xff] }
 0x1a4   :  { %v1328_v53 = vadd.f32 0.5, %v1327_v40  ;;  %v3176_v40 = vld [vmem:[#allocation4 + $0x1e8] sm:$0xff] }
 0x1a5   :  { %v2303_v7 = vpop.eup %2302 }
 0x1a6   :  { %v1334_v33 = vmul.f32 %v1328_v53, %v3102_v60  ;;  %v1335_v57 = vmul.f32 %v2303_v7, %v1324_v47  ;;  %v3179_v47 = vld [vmem:[#allocation4 + $0x1f0] sm:$0xff]  ;;  %v3183_v60 = vld [vmem:[#allocation4 + $0x1c0] sm:$0xff]  ;;  %v3280_v7 = vld [vmem:[#allocation4 + $0x188] sm:$0xff] }
 0x1a7   :  { %v2305_v51 = vpop.eup %2304  ;;  %v3277_v53 = vld [vmem:[#allocation4 + $0x180] sm:$0xff] }
 0x1a8   :  { %v3170_v2 = vadd.f32 %v1335_v57, %v1334_v33  ;;  %v1332_v44 = vmul.f32 0.5, %v2305_v51  ;;  %v3283_v33 = vld [vmem:[#allocation4 + $0x190] sm:$0xff]  ;;  %v3286_v57 = vld [vmem:[#allocation4 + $0x198] sm:$0xff]  ;;  %v3289_v51 = vld [vmem:[#allocation4 + $0x160] sm:$0xff] }
 0x1aa   :  { %2306 = vtanh.f32 %v3170_v2  ;;  %v1333_v55 = vadd.f32 0.5, %v1332_v44  ;;  %v3295_v44 = vld [vmem:[#allocation4 + $0x170] sm:$0xff] }
 0x1b0   :  { %v2307_v56 = vpop.eup %2306 }
 0x1b1   :  { %v1338_v25 = vmul.f32 %v2307_v56, %v1333_v55  ;;  %v3298_v55 = vld [vmem:[#allocation4 + $0x178] sm:$0xff]  ;;  %v3301_v56 = vld [vmem:[#allocation4 + $0x140] sm:$0xff] }
 0x1b3   :  { %1359 = vmatmul.f32.vlgmr.msra.gmra.mxu0 %v1338_v25  ;;  %1379 = vmatmul.f32.vlgmr.msrb.gmra.mxu1 %v1338_v25 }
 0x1b4   :  { %1399 = vmatmul.f32.vlgmr.msra.gmra.mxu2 %v1338_v25  ;;  %1419 = vmatmul.f32.vlgmr.msrb.gmra.mxu3 %v1338_v25  ;;  %v3304_v25 = vld [vmem:[#allocation4 + $0x148] sm:$0xff] }
 0x1b5   :  { %1555 = vmatpush.msra.mxu0 %v3173_v49  ;;  %1575 = vmatpush.msrb.mxu1 %v3176_v40 }
 0x1b6   :  { %1595 = vmatpush.msra.mxu2 %v3179_v47  ;;  %1615 = vmatpush.msrb.mxu3 %v2761_v12  ;;  %v3199_v12 = vld [vmem:[#allocation4 + $0x1b0] sm:$0xff] }
 0x1b7   :  { %1556 = vmatpush.msra.mxu0 %v3183_v60  ;;  %1576 = vmatpush.msrb.mxu1 %v3186_v35 }
 0x1b8   :  { %1596 = vmatpush.msra.mxu2 %v3189_v48  ;;  %1616 = vmatpush.msrb.mxu3 %v2773_v16  ;;  %v3807_v16 = vld [vmem:[#allocation32_spill] sm:$0xff] }
 0x1b9   :  { %1557 = vmatpush.msra.mxu0 %v3193_v45  ;;  %1577 = vmatpush.msrb.mxu1 %v3196_v6 }
 0x1ba   :  { %1597 = vmatpush.msra.mxu2 %v3199_v12  ;;  %1617 = vmatpush.msrb.mxu3 %v2785_v20  ;;  %v3811_v20 = vld [vmem:[#allocation33_spill] sm:$0xff] }
 0x1bb   :  { %1558 = vmatpush.msra.mxu0 %v2750_v8  ;;  %1578 = vmatpush.msrb.mxu1 %v2753_v9  ;;  %v3800_v8 = vld [vmem:[#allocation22_spill] sm:$0xff]  ;;  %v3801_v9 = vld [vmem:[#allocation23_spill] sm:$0xff] }
 0x1bc   :  { %1598 = vmatpush.msra.mxu2 %v2755_v10  ;;  %1618 = vmatpush.msrb.mxu3 %v2797_v24  ;;  %v3802_v10 = vld [vmem:[#allocation24_spill] sm:$0xff] }
 0x1bd   :  { %1559 = vmatpush.msra.mxu0 %v2759_v11  ;;  %1579 = vmatpush.msrb.mxu1 %v2765_v13  ;;  %v3803_v11 = vld [vmem:[#allocation31_spill] sm:$0xff]  ;;  %v3804_v13 = vld [vmem:[#allocation25_spill] sm:$0xff] }
 0x1be   :  { %1599 = vmatpush.msra.mxu2 %v2767_v14  ;;  %1619 = vmatpush.msrb.mxu3 %v2817_v30  ;;  %v3805_v14 = vld [vmem:[#allocation26_spill] sm:$0xff] }
 0x1bf   :  { %1560 = vmatpush.msra.mxu0 %v2771_v15  ;;  %1580 = vmatpush.msrb.mxu1 %v2777_v17  ;;  %v3806_v15 = vld [vmem:[#allocation27_spill] sm:$0xff]  ;;  %v3808_v17 = vld [vmem:[#allocation28_spill] sm:$0xff] }
 0x1c0   :  { %1600 = vmatpush.msra.mxu2 %v2779_v18  ;;  %1620 = vmatpush.msrb.mxu3 %v2830_v34  ;;  %v3809_v18 = vld [vmem:[#allocation29_spill] sm:$0xff]  ;;  %v1341_v30 = vld [vmem:[#allocation2 + $0xe8] sm:$0x3f] }
 0x1c1   :  { %1561 = vmatpush.msra.mxu0 %v2783_v19  ;;  %1581 = vmatpush.msrb.mxu1 %v2789_v21  ;;  %v3810_v19 = vld [vmem:[#allocation30_spill] sm:$0xff] }
 0x1c2   :  { %1601 = vmatpush.msra.mxu2 %v2791_v22  ;;  %1621 = vmatpush.msrb.mxu3 %v2842_v38  ;;  %v1339_v21 = vld [vmem:[#allocation2 + $0x80] sm:$0x3f] }
 0x1c3   :  { %1562 = vmatpush.msra.mxu0 %v2795_v23  ;;  %1582 = vmatpush.msrb.mxu1 %v3782_v61  ;;  %v1340_v23 = vld [vmem:[#allocation2 + $0x88] sm:$0x3f] }
 0x1c4   :  { %1602 = vmatpush.msra.mxu2 %v2803_v26  ;;  %1622 = vmatpush.msrb.mxu3 %v2854_v42 }
 0x1c5   :  { %1563 = vmatpush.msra.mxu0 %v2807_v27  ;;  %1583 = vmatpush.msrb.mxu1 %v2811_v28 }
 0x1c6   :  { %1603 = vmatpush.msra.mxu2 %v2813_v29  ;;  %1623 = vmatpush.msrb.mxu3 %v2866_v46 }
 0x1c7   :  { %1564 = vmatpush.msra.mxu0 %v2819_v31  ;;  %1584 = vmatpush.msrb.mxu1 %v2824_v32  ;;  %v1342_v32 = vld [vmem:[#allocation2 + $0xb8] sm:$0x3f] }
 0x1c8   :  { %1604 = vmatpush.msra.mxu2 %v3783_v63  ;;  %1624 = vmatpush.msrb.mxu3 %v2878_v50 }
 0x1c9   :  { %1565 = vmatpush.msra.mxu0 %v3784_v0  ;;  %1585 = vmatpush.msrb.mxu1 %v2836_v36 }
 0x1ca   :  { %1605 = vmatpush.msra.mxu2 %v3785_v1  ;;  %1625 = vmatpush.msrb.mxu3 %v2890_v54 }
 0x1cb   :  { %1566 = vmatpush.msra.mxu0 %v3786_v3  ;;  %1586 = vmatpush.msrb.mxu1 %v3772_v41 }
 0x1cc   :  { %1606 = vmatpush.msra.mxu2 %v3787_v4  ;;  %1626 = vmatpush.msrb.mxu3 %v2902_v58 }
 0x1cd   :  { %1567 = vmatpush.msra.mxu0 %v3788_v5  ;;  %1587 = vmatpush.msrb.mxu1 %v3774_v37 }
 0x1ce   :  { %1607 = vmatpush.msra.mxu2 %v3775_v39  ;;  %1627 = vmatpush.msrb.mxu3 %v2908_v59 }
 0x1cf   :  { %1568 = vmatpush.msra.mxu0 %v3800_v8  ;;  %1588 = vmatpush.msrb.mxu1 %v3801_v9  ;;  %v3307_v8 = vld [vmem:[#allocation4 + $0x150] sm:$0xff]  ;;  %v3310_v9 = vld [vmem:[#allocation4 + $0x158] sm:$0xff] }
 0x1d0   :  { %1608 = vmatpush.msra.mxu2 %v3802_v10  ;;  %1628 = vmatpush.msrb.mxu3 %v3803_v11  ;;  %v3313_v10 = vld [vmem:[#allocation4 + $0x120] sm:$0xff]  ;;  %v3316_v11 = vld [vmem:[#allocation4 + $0x128] sm:$0xff] }
 0x1d1   :  { %1569 = vmatpush.msra.mxu0 %v3804_v13  ;;  %1589 = vmatpush.msrb.mxu1 %v3805_v14  ;;  %v3319_v13 = vld [vmem:[#allocation4 + $0x130] sm:$0xff]  ;;  %v3322_v14 = vld [vmem:[#allocation4 + $0x138] sm:$0xff] }
 0x1d2   :  { %1609 = vmatpush.msra.mxu2 %v3806_v15  ;;  %1629 = vmatpush.msrb.mxu3 %v3807_v16  ;;  %v3325_v15 = vld [vmem:[#allocation4 + $0x100] sm:$0xff]  ;;  %v3328_v16 = vld [vmem:[#allocation4 + $0x108] sm:$0xff] }
 0x1d3   :  { %1570 = vmatpush.msra.mxu0 %v3808_v17  ;;  %1590 = vmatpush.msrb.mxu1 %v3809_v18  ;;  %v3331_v17 = vld [vmem:[#allocation4 + $0x110] sm:$0xff]  ;;  %v3334_v18 = vld [vmem:[#allocation4 + $0x118] sm:$0xff] }
 0x1d4   :  { %1610 = vmatpush.msra.mxu2 %v3810_v19  ;;  %1630 = vmatpush.msrb.mxu3 %v3811_v20  ;;  %v3337_v19 = vld [vmem:[#allocation4 + $0xe0] sm:$0xff]  ;;  %v3340_v20 = vld [vmem:[#allocation4 + $0xe8] sm:$0xff] }
 0x230   :  { %v1360_v22 = vpop.f32.mrf.mxu0  ;;  %v1380_v24 = vpop.f32.mrf.mxu1 }
 0x231   :  { %v1423_v26 = vadd.f32 %v1360_v22, %v1339_v21  ;;  %v1424_v27 = vadd.f32 %v1380_v24, %v1340_v23  ;;  %v3343_v21 = vld [vmem:[#allocation4 + $0xf0] sm:$0xff]  ;;  %v3346_v22 = vld [vmem:[#allocation4 + $0xf8] sm:$0xff]  ;;  %v3349_v23 = vld [vmem:[#allocation4 + $0xc0] sm:$0xff] }
 0x232   :  { %v3352_v24 = vld [vmem:[#allocation4 + $0xc8] sm:$0xff] }
 0x233   :  { %v1427_v28 = vmul.f32 0.5, %v1423_v26  ;;  %v1431_v29 = vmul.f32 0.5, %v1424_v27  ;;  %v3355_v26 = vld [vmem:[#allocation4 + $0xd0] sm:$0xff]  ;;  %v3358_v27 = vld [vmem:[#allocation4 + $0xd8] sm:$0xff] }
 0x235   :  { %2308 = vtanh.f32 %v1427_v28  ;;  %v3361_v28 = vld [vmem:[#allocation4 + $0xa0] sm:$0xff] }
 0x236   :  { %2310 = vtanh.f32 %v1431_v29  ;;  %v3364_v29 = vld [vmem:[#allocation4 + $0xa8] sm:$0xff] }
 0x237   :  { %v1400_v31 = vpop.f32.mrf.mxu2  ;;  %v1420_v34 = vpop.f32.mrf.mxu3 }
 0x238   :  { %v1425_v36 = vadd.f32 %v1400_v31, %v1341_v30  ;;  %v1426_v37 = vadd.f32 %v1420_v34, %v1342_v32  ;;  %v3367_v30 = vld [vmem:[#allocation4 + $0xb0] sm:$0xff]  ;;  %v3370_v31 = vld [vmem:[#allocation4 + $0xb8] sm:$0xff]  ;;  %v3373_v32 = vld [vmem:[#allocation4 + $0x80] sm:$0xff] }
 0x239   :  { %3812 = vst [vmem:[#allocation17_spill] sm:$0xff] %v3370_v31  ;;  %v3376_v34 = vld [vmem:[#allocation4 + $0x88] sm:$0xff] }
 0x23a   :  { %2312 = vtanh.f32 %v1425_v36  ;;  %v1436_v38 = vmul.f32 0.5, %v1426_v37  ;;  %3813 = vst [vmem:[#allocation20_spill] sm:$0xff] %v3373_v32  ;;  %v3379_v36 = vld [vmem:[#allocation4 + $0x90] sm:$0xff]  ;;  %v3382_v37 = vld [vmem:[#allocation4 + $0x98] sm:$0xff] }
 0x23b   :  { %v2309_v39 = vpop.eup %2308  ;;  %3814 = vst [vmem:[#allocation21_spill] sm:$0xff] %v3376_v34 }
 0x23c   :  { %v2311_v42 = vpop.eup %2310  ;;  %v1429_v46 = vmul.f32 0.5, %v2309_v39  ;;  %2314 = vtanh.f32 %v1436_v38  ;;  %3815 = vst [vmem:[#allocation10_spill] sm:$0xff] %v3379_v36  ;;  %v3385_v38 = vld [vmem:[#allocation4 + $0x60] sm:$0xff]  ;;  %v3388_v39 = vld [vmem:[#allocation4 + $0x68] sm:$0xff] }
 0x23d   :  { %v1433_v50 = vmul.f32 0.5, %v2311_v42  ;;  %3816 = vst [vmem:[#allocation11_spill] sm:$0xff] %v3382_v37  ;;  %v3391_v42 = vld [vmem:[#allocation4 + $0x70] sm:$0xff] }
 0x23e   :  { %v1430_v54 = vadd.f32 0.5, %v1429_v46  ;;  %3817 = vst [vmem:[#allocation12_spill] sm:$0xff] %v3385_v38  ;;  %v3394_v46 = vld [vmem:[#allocation4 + $0x78] sm:$0xff] }
 0x23f   :  { %v1434_v58 = vadd.f32 0.5, %v1433_v50  ;;  %3818 = vst [vmem:[#allocation13_spill] sm:$0xff] %v3388_v39  ;;  %v3397_v50 = vld [vmem:[#allocation4 + $0x40] sm:$0xff] }
 0x240   :  { %v2313_v59 = vpop.eup %2312  ;;  %3819 = vst [vmem:[#allocation14_spill] sm:$0xff] %v3391_v42 }
 0x241   :  { %v1440_v41 = vmul.f32 %v1434_v58, %v3170_v2  ;;  %v1441_v61 = vmul.f32 %v2313_v59, %v1430_v54  ;;  %v3292_v2 = vld [vmem:[#allocation4 + $0x168] sm:$0xff]  ;;  %3820 = vst [vmem:[#allocation15_spill] sm:$0xff] %v3394_v46  ;;  %v3403_v58 = vld [vmem:[#allocation4 + $0x50] sm:$0xff]  ;;  %v3406_v59 = vld [vmem:[#allocation4 + $0x58] sm:$0xff] }
 0x242   :  { %v2315_v63 = vpop.eup %2314  ;;  %3821 = vst [vmem:[#allocation16_spill] sm:$0xff] %v3397_v50  ;;  %v3400_v54 = vld [vmem:[#allocation4 + $0x48] sm:$0xff] }
 0x243   :  { %v3256_v0 = vadd.f32 %v1441_v61, %v1440_v41  ;;  %v1438_v1 = vmul.f32 0.5, %v2315_v63  ;;  %3822 = vst [vmem:[#allocation18_spill] sm:$0xff] %v3400_v54  ;;  %v3409_v41 = vld [vmem:[#allocation4 + $0x20] sm:$0xff]  ;;  %v3412_v61 = vld [vmem:[#allocation4 + $0x28] sm:$0xff]  ;;  %v3415_v63 = vld [vmem:[#allocation4 + $0x30] sm:$0xff] }
 0x244   :  { %3823 = vst [vmem:[#allocation19_spill] sm:$0xff] %v3403_v58 }
 0x245   :  { %2316 = vtanh.f32 %v3256_v0  ;;  %v1439_v3 = vadd.f32 0.5, %v1438_v1  ;;  %3824 = vst [vmem:[#allocation22_spill] sm:$0xff] %v3406_v59  ;;  %v3418_v1 = vld [vmem:[#allocation4 + $0x38] sm:$0xff] }
 0x246   :  { %3825 = vst [vmem:[#allocation23_spill] sm:$0xff] %v3409_v41 }
 0x247   :  { %3826 = vst [vmem:[#allocation24_spill] sm:$0xff] %v3412_v61 }
 0x248   :  { %3827 = vst [vmem:[#allocation31_spill] sm:$0xff] %v3415_v63 }
 0x249   :  { %3828 = vst [vmem:[#allocation25_spill] sm:$0xff] %v3418_v1 }
 0x24b   :  { %v2317_v4 = vpop.eup %2316 }
 0x24c   :  { %v1444_v5 = vmul.f32 %v2317_v4, %v1439_v3  ;;  %v3421_v3 = vld [vmem:[#allocation4] sm:$0xff]  ;;  %v3424_v4 = vld [vmem:[#allocation4 + $0x8] sm:$0xff] }
 0x24d   :  { %3829 = vst [vmem:[#allocation26_spill] sm:$0xff] %v3421_v3 }
 0x24e   :  { %1465 = vmatmul.f32.vlgmr.msrb.gmra.mxu0 %v1444_v5  ;;  %1485 = vmatmul.f32.vlgmr.msra.gmra.mxu1 %v1444_v5  ;;  %3830 = vst [vmem:[#allocation27_spill] sm:$0xff] %v3424_v4 }
 0x24f   :  { %1505 = vmatmul.f32.vlgmr.msrb.gmra.mxu2 %v1444_v5  ;;  %1525 = vmatmul.f32.vlgmr.msra.gmra.mxu3 %v1444_v5  ;;  %v3427_v5 = vld [vmem:[#allocation4 + $0x10] sm:$0xff] }
 0x250   :  { %1661 = vmatpush.msrb.mxu0 %v3173_v49  ;;  %1681 = vmatpush.msra.mxu1 %v3176_v40  ;;  %3831 = vst [vmem:[#allocation32_spill] sm:$0xff] %v3427_v5 }
 0x251   :  { %1701 = vmatpush.msrb.mxu2 %v3179_v47  ;;  %1721 = vmatpush.msra.mxu3 %v3262_v52 }
 0x252   :  { %1662 = vmatpush.msrb.mxu0 %v3183_v60  ;;  %1682 = vmatpush.msra.mxu1 %v3186_v35 }
 0x253   :  { %1702 = vmatpush.msrb.mxu2 %v3189_v48  ;;  %1722 = vmatpush.msra.mxu3 %v3268_v43 }
 0x254   :  { %1663 = vmatpush.msrb.mxu0 %v3193_v45  ;;  %1683 = vmatpush.msra.mxu1 %v3196_v6 }
 0x255   :  { %1703 = vmatpush.msrb.mxu2 %v3199_v12  ;;  %1723 = vmatpush.msra.mxu3 %v3274_v62 }
 0x256   :  { %1664 = vmatpush.msrb.mxu0 %v3277_v53  ;;  %1684 = vmatpush.msra.mxu1 %v3280_v7 }
 0x257   :  { %1704 = vmatpush.msrb.mxu2 %v3283_v33  ;;  %1724 = vmatpush.msra.mxu3 %v3286_v57 }
 0x258   :  { %1665 = vmatpush.msrb.mxu0 %v3289_v51  ;;  %1685 = vmatpush.msra.mxu1 %v3292_v2 }
 0x259   :  { %1705 = vmatpush.msrb.mxu2 %v3295_v44  ;;  %1725 = vmatpush.msra.mxu3 %v3298_v55 }
 0x25a   :  { %1666 = vmatpush.msrb.mxu0 %v3301_v56  ;;  %1686 = vmatpush.msra.mxu1 %v3304_v25 }
 0x25b   :  { %1706 = vmatpush.msrb.mxu2 %v3307_v8  ;;  %1726 = vmatpush.msra.mxu3 %v3310_v9 }
 0x25c   :  { %1667 = vmatpush.msrb.mxu0 %v3313_v10  ;;  %1687 = vmatpush.msra.mxu1 %v3316_v11 }
 0x25d   :  { %1707 = vmatpush.msrb.mxu2 %v3319_v13  ;;  %1727 = vmatpush.msra.mxu3 %v3322_v14 }
 0x25e   :  { %1668 = vmatpush.msrb.mxu0 %v3325_v15  ;;  %1688 = vmatpush.msra.mxu1 %v3328_v16 }
 0x25f   :  { %1708 = vmatpush.msrb.mxu2 %v3331_v17  ;;  %1728 = vmatpush.msra.mxu3 %v3334_v18 }
 0x260   :  { %1669 = vmatpush.msrb.mxu0 %v3337_v19  ;;  %1689 = vmatpush.msra.mxu1 %v3340_v20 }
 0x261   :  { %1709 = vmatpush.msrb.mxu2 %v3343_v21  ;;  %1729 = vmatpush.msra.mxu3 %v3346_v22 }
 0x262   :  { %1670 = vmatpush.msrb.mxu0 %v3349_v23  ;;  %1690 = vmatpush.msra.mxu1 %v3352_v24 }
 0x263   :  { %1710 = vmatpush.msrb.mxu2 %v3355_v26  ;;  %1730 = vmatpush.msra.mxu3 %v3358_v27 }
 0x264   :  { %1671 = vmatpush.msrb.mxu0 %v3361_v28  ;;  %1691 = vmatpush.msra.mxu1 %v3364_v29 }
 0x265   :  { %1711 = vmatpush.msrb.mxu2 %v3367_v30  ;;  %1731 = vmatpush.msra.mxu3 %v3370_v31 }
 0x266   :  { %1672 = vmatpush.msrb.mxu0 %v3373_v32  ;;  %1692 = vmatpush.msra.mxu1 %v3376_v34 }
 0x267   :  { %1712 = vmatpush.msrb.mxu2 %v3379_v36  ;;  %1732 = vmatpush.msra.mxu3 %v3382_v37 }
 0x268   :  { %1673 = vmatpush.msrb.mxu0 %v3385_v38  ;;  %1693 = vmatpush.msra.mxu1 %v3388_v39 }
 0x269   :  { %1713 = vmatpush.msrb.mxu2 %v3391_v42  ;;  %1733 = vmatpush.msra.mxu3 %v3394_v46  ;;  %v1447_v46 = vld [vmem:[#allocation2 + $0x8] sm:$0x3f]  ;;  %v1448_v42 = vld [vmem:[#allocation2 + $0x78] sm:$0x3f] }
 0x26a   :  { %1674 = vmatpush.msrb.mxu0 %v3397_v50  ;;  %1694 = vmatpush.msra.mxu1 %v3400_v54 }
 0x26b   :  { %1714 = vmatpush.msrb.mxu2 %v3403_v58  ;;  %1734 = vmatpush.msra.mxu3 %v3406_v59  ;;  %v1446_v59 = vld [vmem:[#allocation2 + $0xf0] sm:$0x3f] }
 0x26c   :  { %1675 = vmatpush.msrb.mxu0 %v3409_v41  ;;  %1695 = vmatpush.msra.mxu1 %v3412_v61  ;;  %v3430_v61 = vld [vmem:[#allocation4 + $0x18] sm:$0xff] }
 0x26d   :  { %1715 = vmatpush.msrb.mxu2 %v3415_v63  ;;  %1735 = vmatpush.msra.mxu3 %v3418_v1  ;;  %3832 = vst [vmem:[#allocation28_spill] sm:$0xff] %v3430_v61  ;;  %v1445_v63 = vld [vmem:[#allocation2 + $0x60] sm:$0x3f] }
 0x26e   :  { %1676 = vmatpush.msrb.mxu0 %v3421_v3  ;;  %1696 = vmatpush.msra.mxu1 %v3424_v4 }
 0x26f   :  { %1716 = vmatpush.msrb.mxu2 %v3427_v5  ;;  %1736 = vmatpush.msra.mxu3 %v3430_v61 }
 0x2cb   :  { %v1466_v41 = vpop.f32.mrf.mxu0  ;;  %v1486_v1 = vpop.f32.mrf.mxu1 }
 0x2cc   :  { %v1529_v58 = vadd.f32 %v1466_v41, %v1445_v63  ;;  %v1530_v54 = vadd.f32 %v1486_v1, %v1446_v59  ;;  %v3840_v1 = vld [vmem:[#allocation14_spill] sm:$0xff] }
 0x2ce   :  { %v1533_v50 = vmul.f32 0.5, %v1529_v58  ;;  %v1537_v3 = vmul.f32 0.5, %v1530_v54 }
 0x2d0   :  { %2318 = vtanh.f32 %v1533_v50 }
 0x2d1   :  { %2320 = vtanh.f32 %v1537_v3  ;;  %v3841_v3 = vld [vmem:[#allocation15_spill] sm:$0xff] }
 0x2d2   :  { %v1506_v4 = vpop.f32.mrf.mxu2  ;;  %v1526_v39 = vpop.f32.mrf.mxu3 }
 0x2d3   :  { %v1531_v38 = vadd.f32 %v1506_v4, %v1447_v46  ;;  %v1532_v5 = vadd.f32 %v1526_v39, %v1448_v42  ;;  %v3842_v4 = vld [vmem:[#allocation16_spill] sm:$0xff] }
 0x2d5   :  { %2322 = vtanh.f32 %v1531_v38  ;;  %v1542_v37 = vmul.f32 0.5, %v1532_v5  ;;  %v3843_v5 = vld [vmem:[#allocation18_spill] sm:$0xff] }
 0x2d6   :  { %v2319_v36 = vpop.eup %2318 }
 0x2d7   :  { %v2321_v61 = vpop.eup %2320  ;;  %v1535_v34 = vmul.f32 0.5, %v2319_v36  ;;  %2324 = vtanh.f32 %v1542_v37  ;;  %v3837_v36 = vld [vmem:[#allocation11_spill] sm:$0xff]  ;;  %v3838_v37 = vld [vmem:[#allocation12_spill] sm:$0xff] }
 0x2d8   :  { %v1539_v32 = vmul.f32 0.5, %v2321_v61  ;;  %v3839_v61 = vld [vmem:[#allocation13_spill] sm:$0xff] }
 0x2d9   :  { %v1536_v31 = vadd.f32 0.5, %v1535_v34  ;;  %v3836_v34 = vld [vmem:[#allocation10_spill] sm:$0xff] }
 0x2da   :  { %v1540_v41 = vadd.f32 0.5, %v1539_v32  ;;  %v3835_v32 = vld [vmem:[#allocation21_spill] sm:$0xff] }
 0x2db   :  { %v2323_v59 = vpop.eup %2322 }
 0x2dc   :  { %v1546_v54 = vmul.f32 %v1540_v41, %v3256_v0  ;;  %v1547_v50 = vmul.f32 %v2323_v59, %v1536_v31  ;;  %v3833_v0 = vld [vmem:[#allocation17_spill] sm:$0xff]  ;;  %v3834_v31 = vld [vmem:[#allocation20_spill] sm:$0xff]  ;;  %v3844_v41 = vld [vmem:[#allocation19_spill] sm:$0xff] }
 0x2dd   :  { %v2325_v58 = vpop.eup %2324  ;;  %v3845_v59 = vld [vmem:[#allocation22_spill] sm:$0xff] }
 0x2de   :  { %v3434_v63 = vadd.f32 %v1547_v50, %v1546_v54  ;;  %v1544_v46 = vmul.f32 0.5, %v2325_v58  ;;  %v3846_v54 = vld [vmem:[#allocation23_spill] sm:$0xff]  ;;  %v3847_v50 = vld [vmem:[#allocation24_spill] sm:$0xff] }
 0x2df   :  { %v3848_v58 = vld [vmem:[#allocation31_spill] sm:$0xff] }
 0x2e0   :  { %2326 = vtanh.f32 %v3434_v63  ;;  %v1545_v39 = vadd.f32 0.5, %v1544_v46  ;;  %v3849_v46 = vld [vmem:[#allocation25_spill] sm:$0xff] }
 0x2e6   :  { %v2327_v38 = vpop.eup %2326 }
 0x2e7   :  { %v1550_v42 = vmul.f32 %v2327_v38, %v1545_v39  ;;  %v3850_v39 = vld [vmem:[#allocation26_spill] sm:$0xff]  ;;  %v3851_v38 = vld [vmem:[#allocation27_spill] sm:$0xff] }
 0x2e9   :  { %1571 = vmatmul.f32.vlgmr.msra.gmra.mxu0 %v1550_v42  ;;  %1591 = vmatmul.f32.vlgmr.msrb.gmra.mxu1 %v1550_v42 }
 0x2ea   :  { %1611 = vmatmul.f32.vlgmr.msra.gmra.mxu2 %v1550_v42  ;;  %1631 = vmatmul.f32.vlgmr.msrb.gmra.mxu3 %v1550_v42  ;;  %v3852_v42 = vld [vmem:[#allocation32_spill] sm:$0xff] }
 0x2eb   :  { %1767 = vmatpush.msra.mxu0 %v3173_v49  ;;  %1787 = vmatpush.msrb.mxu1 %v3176_v40 }
 0x2ec   :  { %1807 = vmatpush.msra.mxu2 %v3179_v47  ;;  %1827 = vmatpush.msrb.mxu3 %v3262_v52 }
 0x2ed   :  { %1768 = vmatpush.msra.mxu0 %v3183_v60  ;;  %1788 = vmatpush.msrb.mxu1 %v3186_v35 }
 0x2ee   :  { %1808 = vmatpush.msra.mxu2 %v3189_v48  ;;  %1828 = vmatpush.msrb.mxu3 %v3268_v43 }
 0x2ef   :  { %1769 = vmatpush.msra.mxu0 %v3193_v45  ;;  %1789 = vmatpush.msrb.mxu1 %v3196_v6 }
 0x2f0   :  { %1809 = vmatpush.msra.mxu2 %v3199_v12  ;;  %1829 = vmatpush.msrb.mxu3 %v3274_v62 }
 0x2f1   :  { %1770 = vmatpush.msra.mxu0 %v3277_v53  ;;  %1790 = vmatpush.msrb.mxu1 %v3280_v7 }
 0x2f2   :  { %1810 = vmatpush.msra.mxu2 %v3283_v33  ;;  %1830 = vmatpush.msrb.mxu3 %v3286_v57 }
 0x2f3   :  { %1771 = vmatpush.msra.mxu0 %v3289_v51  ;;  %1791 = vmatpush.msrb.mxu1 %v3292_v2 }
 0x2f4   :  { %1811 = vmatpush.msra.mxu2 %v3295_v44  ;;  %1831 = vmatpush.msrb.mxu3 %v3298_v55 }
 0x2f5   :  { %1772 = vmatpush.msra.mxu0 %v3301_v56  ;;  %1792 = vmatpush.msrb.mxu1 %v3304_v25 }
 0x2f6   :  { %1812 = vmatpush.msra.mxu2 %v3307_v8  ;;  %1832 = vmatpush.msrb.mxu3 %v3310_v9 }
 0x2f7   :  { %1773 = vmatpush.msra.mxu0 %v3313_v10  ;;  %1793 = vmatpush.msrb.mxu1 %v3316_v11 }
 0x2f8   :  { %1813 = vmatpush.msra.mxu2 %v3319_v13  ;;  %1833 = vmatpush.msrb.mxu3 %v3322_v14 }
 0x2f9   :  { %1774 = vmatpush.msra.mxu0 %v3325_v15  ;;  %1794 = vmatpush.msrb.mxu1 %v3328_v16 }
 0x2fa   :  { %1814 = vmatpush.msra.mxu2 %v3331_v17  ;;  %1834 = vmatpush.msrb.mxu3 %v3334_v18 }
 0x2fb   :  { %1775 = vmatpush.msra.mxu0 %v3337_v19  ;;  %1795 = vmatpush.msrb.mxu1 %v3340_v20 }
 0x2fc   :  { %1815 = vmatpush.msra.mxu2 %v3343_v21  ;;  %1835 = vmatpush.msrb.mxu3 %v3346_v22 }
 0x2fd   :  { %1776 = vmatpush.msra.mxu0 %v3349_v23  ;;  %1796 = vmatpush.msrb.mxu1 %v3352_v24 }
 0x2fe   :  { %1816 = vmatpush.msra.mxu2 %v3355_v26  ;;  %1836 = vmatpush.msrb.mxu3 %v3358_v27 }
 0x2ff   :  { %1777 = vmatpush.msra.mxu0 %v3361_v28  ;;  %1797 = vmatpush.msrb.mxu1 %v3364_v29 }
 0x300   :  { %1817 = vmatpush.msra.mxu2 %v3367_v30  ;;  %1837 = vmatpush.msrb.mxu3 %v3833_v0 }
 0x301   :  { %1778 = vmatpush.msra.mxu0 %v3834_v31  ;;  %1798 = vmatpush.msrb.mxu1 %v3835_v32 }
 0x302   :  { %1818 = vmatpush.msra.mxu2 %v3836_v34  ;;  %1838 = vmatpush.msrb.mxu3 %v3837_v36 }
 0x303   :  { %1779 = vmatpush.msra.mxu0 %v3838_v37  ;;  %1799 = vmatpush.msrb.mxu1 %v3839_v61  ;;  %v1554_v37 = vld [vmem:[#allocation2 + $0xc8] sm:$0x3f] }
 0x304   :  { %1819 = vmatpush.msra.mxu2 %v3840_v1  ;;  %1839 = vmatpush.msrb.mxu3 %v3841_v3  ;;  %v1552_v3 = vld [vmem:[#allocation2 + $0x58] sm:$0x3f] }
 0x305   :  { %1780 = vmatpush.msra.mxu0 %v3842_v4  ;;  %1800 = vmatpush.msrb.mxu1 %v3843_v5  ;;  %v3853_v4 = vld [vmem:[#allocation28_spill] sm:$0xff] }
 0x306   :  { %1820 = vmatpush.msra.mxu2 %v3844_v41  ;;  %1840 = vmatpush.msrb.mxu3 %v3845_v59  ;;  %v1551_v5 = vld [vmem:[#allocation2 + $0x38] sm:$0x3f] }
 0x307   :  { %1781 = vmatpush.msra.mxu0 %v3846_v54  ;;  %1801 = vmatpush.msrb.mxu1 %v3847_v50 }
 0x308   :  { %1821 = vmatpush.msra.mxu2 %v3848_v58  ;;  %1841 = vmatpush.msrb.mxu3 %v3849_v46  ;;  %v1553_v58 = vld [vmem:[#allocation2 + $0x40] sm:$0x3f] }
 0x309   :  { %1782 = vmatpush.msra.mxu0 %v3850_v39  ;;  %1802 = vmatpush.msrb.mxu1 %v3851_v38 }
 0x30a   :  { %1822 = vmatpush.msra.mxu2 %v3852_v42  ;;  %1842 = vmatpush.msrb.mxu3 %v3853_v4 }
 0x366   :  { %v1572_v41 = vpop.f32.mrf.mxu0  ;;  %v1592_v59 = vpop.f32.mrf.mxu1 }
 0x367   :  { %v1635_v1 = vadd.f32 %v1572_v41, %v1551_v5  ;;  %v1636_v54 = vadd.f32 %v1592_v59, %v1552_v3 }
 0x369   :  { %v1639_v61 = vmul.f32 0.5, %v1635_v1  ;;  %v1643_v50 = vmul.f32 0.5, %v1636_v54 }
 0x36b   :  { %2328 = vtanh.f32 %v1639_v61 }
 0x36c   :  { %2330 = vtanh.f32 %v1643_v50 }
 0x36d   :  { %v1612_v46 = vpop.f32.mrf.mxu2  ;;  %v1632_v39 = vpop.f32.mrf.mxu3 }
 0x36e   :  { %v1637_v36 = vadd.f32 %v1612_v46, %v1553_v58  ;;  %v1638_v38 = vadd.f32 %v1632_v39, %v1554_v37  ;;  %v2005_v39 = vld [vmem:[#allocation6 + $0xf0] sm:$0xff] }
 0x370   :  { %2332 = vtanh.f32 %v1637_v36  ;;  %v1648_v42 = vmul.f32 0.5, %v1638_v38  ;;  %v2006_v38 = vld [vmem:[#allocation6 + $0xf8] sm:$0xff] }
 0x371   :  { %v2329_v34 = vpop.eup %2328 }
 0x372   :  { %v2331_v4 = vpop.eup %2330  ;;  %v1641_v32 = vmul.f32 0.5, %v2329_v34  ;;  %2334 = vtanh.f32 %v1648_v42  ;;  %v1763_v42 = vld [vmem:[#allocation2 + $0xa8] sm:$0x3f] }
 0x373   :  { %v1645_v31 = vmul.f32 0.5, %v2331_v4 }
 0x374   :  { %v1642_v0 = vadd.f32 0.5, %v1641_v32 }
 0x375   :  { %v1646_v5 = vadd.f32 0.5, %v1645_v31 }
 0x376   :  { %v2333_v3 = vpop.eup %2332 }
 0x377   :  { %v1652_v1 = vmul.f32 %v1646_v5, %v3434_v63  ;;  %v1653_v61 = vmul.f32 %v2333_v3, %v1642_v0  ;;  %v1764_v3 = vld [vmem:[#allocation2 + $0xd0] sm:$0x3f] }
 0x378   :  { %v2335_v41 = vpop.eup %2334 }
 0x379   :  { %v3502_v59 = vadd.f32 %v1653_v61, %v1652_v1  ;;  %v1650_v54 = vmul.f32 0.5, %v2335_v41 }
 0x37b   :  { %2336 = vtanh.f32 %v3502_v59  ;;  %v1651_v37 = vadd.f32 0.5, %v1650_v54 }
 0x381   :  { %v2337_v36 = vpop.eup %2336 }
 0x382   :  { %v1656_v50 = vmul.f32 %v2337_v36, %v1651_v37  ;;  %v1765_v37 = vld [vmem:[#allocation2 + $0x10] sm:$0x3f] }
 0x384   :  { %1677 = vmatmul.f32.vlgmr.msrb.gmra.mxu0 %v1656_v50  ;;  %1697 = vmatmul.f32.vlgmr.msra.gmra.mxu1 %v1656_v50 }
 0x385   :  { %1717 = vmatmul.f32.vlgmr.msrb.gmra.mxu2 %v1656_v50  ;;  %1737 = vmatmul.f32.vlgmr.msra.gmra.mxu3 %v1656_v50  ;;  %v1766_v50 = vld [vmem:[#allocation2 + $0x28] sm:$0x3f] }
 0x386   :  { %1873 = vmatpush.msrb.mxu0 %v3173_v49  ;;  %1893 = vmatpush.msra.mxu1 %v3176_v40  ;;  %v3854_v49 = vld [vmem:[#allocation17_spill] sm:$0xff]  ;;  %v3855_v40 = vld [vmem:[#allocation20_spill] sm:$0xff] }
 0x387   :  { %1913 = vmatpush.msrb.mxu2 %v3179_v47  ;;  %1933 = vmatpush.msra.mxu3 %v3262_v52  ;;  %v3856_v47 = vld [vmem:[#allocation21_spill] sm:$0xff]  ;;  %v3863_v52 = vld [vmem:[#allocation16_spill] sm:$0xff] }
 0x388   :  { %1874 = vmatpush.msrb.mxu0 %v3183_v60  ;;  %1894 = vmatpush.msra.mxu1 %v3186_v35  ;;  %v3857_v60 = vld [vmem:[#allocation10_spill] sm:$0xff]  ;;  %v3858_v35 = vld [vmem:[#allocation11_spill] sm:$0xff] }
 0x389   :  { %1914 = vmatpush.msrb.mxu2 %v3189_v48  ;;  %1934 = vmatpush.msra.mxu3 %v3268_v43  ;;  %v3859_v48 = vld [vmem:[#allocation12_spill] sm:$0xff]  ;;  %v3864_v43 = vld [vmem:[#allocation18_spill] sm:$0xff] }
 0x38a   :  { %1875 = vmatpush.msrb.mxu0 %v3193_v45  ;;  %1895 = vmatpush.msra.mxu1 %v3196_v6  ;;  %v3860_v45 = vld [vmem:[#allocation13_spill] sm:$0xff]  ;;  %v3861_v6 = vld [vmem:[#allocation14_spill] sm:$0xff] }
 0x38b   :  { %1915 = vmatpush.msrb.mxu2 %v3199_v12  ;;  %1935 = vmatpush.msra.mxu3 %v3274_v62  ;;  %v3862_v12 = vld [vmem:[#allocation15_spill] sm:$0xff] }
 0x38c   :  { %1876 = vmatpush.msrb.mxu0 %v3277_v53  ;;  %1896 = vmatpush.msra.mxu1 %v3280_v7  ;;  %v3865_v62 = vld [vmem:[#allocation19_spill] sm:$0xff]  ;;  %v3866_v53 = vld [vmem:[#allocation22_spill] sm:$0xff] }
 0x38d   :  { %1916 = vmatpush.msrb.mxu2 %v3283_v33  ;;  %1936 = vmatpush.msra.mxu3 %v3286_v57  ;;  %v3867_v7 = vld [vmem:[#allocation23_spill] sm:$0xff]  ;;  %v3868_v33 = vld [vmem:[#allocation24_spill] sm:$0xff] }
 0x38e   :  { %1877 = vmatpush.msrb.mxu0 %v3289_v51  ;;  %1897 = vmatpush.msra.mxu1 %v3292_v2  ;;  %v3869_v57 = vld [vmem:[#allocation31_spill] sm:$0xff]  ;;  %v3870_v51 = vld [vmem:[#allocation25_spill] sm:$0xff]  ;;  %v3871_v2 = vld [vmem:[#allocation26_spill] sm:$0xff] }
 0x38f   :  { %1917 = vmatpush.msrb.mxu2 %v3295_v44  ;;  %1937 = vmatpush.msra.mxu3 %v3298_v55  ;;  %v3872_v44 = vld [vmem:[#allocation27_spill] sm:$0xff]  ;;  %v3873_v55 = vld [vmem:[#allocation32_spill] sm:$0xff] }
 0x390   :  { %1878 = vmatpush.msrb.mxu0 %v3301_v56  ;;  %1898 = vmatpush.msra.mxu1 %v3304_v25  ;;  %v3874_v56 = vld [vmem:[#allocation28_spill] sm:$0xff]  ;;  %v1657_v25 = vld [vmem:[#allocation2 + $0xe0] sm:$0x3f] }
 0x391   :  { %1918 = vmatpush.msrb.mxu2 %v3307_v8  ;;  %1938 = vmatpush.msra.mxu3 %v3310_v9  ;;  %v1658_v9 = vld [vmem:[#allocation2 + $0x90] sm:$0x3f] }
 0x392   :  { %1879 = vmatpush.msrb.mxu0 %v3313_v10  ;;  %1899 = vmatpush.msra.mxu1 %v3316_v11 }
 0x393   :  { %1919 = vmatpush.msrb.mxu2 %v3319_v13  ;;  %1939 = vmatpush.msra.mxu3 %v3322_v14 }
 0x394   :  { %1880 = vmatpush.msrb.mxu0 %v3325_v15  ;;  %1900 = vmatpush.msra.mxu1 %v3328_v16  ;;  %v1659_v16 = vld [vmem:[#allocation2 + $0x70] sm:$0x3f] }
 0x395   :  { %1920 = vmatpush.msrb.mxu2 %v3331_v17  ;;  %1940 = vmatpush.msra.mxu3 %v3334_v18  ;;  %v1660_v18 = vld [vmem:[#allocation2 + $0xc0] sm:$0x3f] }
 0x396   :  { %1881 = vmatpush.msrb.mxu0 %v3337_v19  ;;  %1901 = vmatpush.msra.mxu1 %v3340_v20 }
 0x397   :  { %1921 = vmatpush.msrb.mxu2 %v3343_v21  ;;  %1941 = vmatpush.msra.mxu3 %v3346_v22 }
 0x398   :  { %1882 = vmatpush.msrb.mxu0 %v3349_v23  ;;  %1902 = vmatpush.msra.mxu1 %v3352_v24 }
 0x399   :  { %1922 = vmatpush.msrb.mxu2 %v3355_v26  ;;  %1942 = vmatpush.msra.mxu3 %v3358_v27 }
 0x39a   :  { %1883 = vmatpush.msrb.mxu0 %v3361_v28  ;;  %1903 = vmatpush.msra.mxu1 %v3364_v29 }
 0x39b   :  { %1923 = vmatpush.msrb.mxu2 %v3367_v30  ;;  %1943 = vmatpush.msra.mxu3 %v3854_v49 }
 0x39c   :  { %1884 = vmatpush.msrb.mxu0 %v3855_v40  ;;  %1904 = vmatpush.msra.mxu1 %v3856_v47 }
 0x39d   :  { %1924 = vmatpush.msrb.mxu2 %v3857_v60  ;;  %1944 = vmatpush.msra.mxu3 %v3858_v35 }
 0x39e   :  { %1885 = vmatpush.msrb.mxu0 %v3859_v48  ;;  %1905 = vmatpush.msra.mxu1 %v3860_v45 }
 0x39f   :  { %1925 = vmatpush.msrb.mxu2 %v3861_v6  ;;  %1945 = vmatpush.msra.mxu3 %v3862_v12 }
 0x3a0   :  { %1886 = vmatpush.msrb.mxu0 %v3863_v52  ;;  %1906 = vmatpush.msra.mxu1 %v3864_v43 }
 0x3a1   :  { %1926 = vmatpush.msrb.mxu2 %v3865_v62  ;;  %1946 = vmatpush.msra.mxu3 %v3866_v53 }
 0x3a2   :  { %1887 = vmatpush.msrb.mxu0 %v3867_v7  ;;  %1907 = vmatpush.msra.mxu1 %v3868_v33 }
 0x3a3   :  { %1927 = vmatpush.msrb.mxu2 %v3869_v57  ;;  %1947 = vmatpush.msra.mxu3 %v3870_v51 }
 0x3a4   :  { %1888 = vmatpush.msrb.mxu0 %v3871_v2  ;;  %1908 = vmatpush.msra.mxu1 %v3872_v44 }
 0x3a5   :  { %1928 = vmatpush.msrb.mxu2 %v3873_v55  ;;  %1948 = vmatpush.msra.mxu3 %v3874_v56  ;;  %v2003_v55 = vld [vmem:[#allocation6 + $0xe0] sm:$0xff]  ;;  %v2004_v56 = vld [vmem:[#allocation6 + $0xe8] sm:$0xff] }
 0x401   :  { %v1678_v8 = vpop.f32.mrf.mxu0  ;;  %v1698_v10 = vpop.f32.mrf.mxu1 }
 0x402   :  { %v1741_v11 = vadd.f32 %v1678_v8, %v1657_v25  ;;  %v1742_v13 = vadd.f32 %v1698_v10, %v1658_v9  ;;  %v2001_v25 = vld [vmem:[#allocation6 + $0xd0] sm:$0xff]  ;;  %v2002_v8 = vld [vmem:[#allocation6 + $0xd8] sm:$0xff]  ;;  %v1999_v9 = vld [vmem:[#allocation6 + $0xc0] sm:$0xff] }
 0x403   :  { %v2000_v10 = vld [vmem:[#allocation6 + $0xc8] sm:$0xff] }
 0x404   :  { %v1745_v14 = vmul.f32 0.5, %v1741_v11  ;;  %v1749_v15 = vmul.f32 0.5, %v1742_v13  ;;  %v1997_v11 = vld [vmem:[#allocation6 + $0xb0] sm:$0xff]  ;;  %v1998_v13 = vld [vmem:[#allocation6 + $0xb8] sm:$0xff] }
 0x406   :  { %2338 = vtanh.f32 %v1745_v14  ;;  %v1995_v14 = vld [vmem:[#allocation6 + $0xa0] sm:$0xff] }
 0x407   :  { %2340 = vtanh.f32 %v1749_v15  ;;  %v1996_v15 = vld [vmem:[#allocation6 + $0xa8] sm:$0xff] }
 0x408   :  { %v1718_v17 = vpop.f32.mrf.mxu2  ;;  %v1738_v19 = vpop.f32.mrf.mxu3 }
 0x409   :  { %v1743_v20 = vadd.f32 %v1718_v17, %v1659_v16  ;;  %v1744_v21 = vadd.f32 %v1738_v19, %v1660_v18  ;;  %v1993_v16 = vld [vmem:[#allocation6 + $0x90] sm:$0xff]  ;;  %v1994_v17 = vld [vmem:[#allocation6 + $0x98] sm:$0xff]  ;;  %v1991_v18 = vld [vmem:[#allocation6 + $0x80] sm:$0xff] }
 0x40a   :  { %v1992_v19 = vld [vmem:[#allocation6 + $0x88] sm:$0xff] }
 0x40b   :  { %2342 = vtanh.f32 %v1743_v20  ;;  %v1754_v22 = vmul.f32 0.5, %v1744_v21  ;;  %v1989_v20 = vld [vmem:[#allocation6 + $0x70] sm:$0xff]  ;;  %v1990_v21 = vld [vmem:[#allocation6 + $0x78] sm:$0xff] }
 0x40c   :  { %v2339_v23 = vpop.eup %2338 }
 0x40d   :  { %v2341_v24 = vpop.eup %2340  ;;  %v1747_v26 = vmul.f32 0.5, %v2339_v23  ;;  %2344 = vtanh.f32 %v1754_v22  ;;  %v1987_v22 = vld [vmem:[#allocation6 + $0x60] sm:$0xff]  ;;  %v1988_v23 = vld [vmem:[#allocation6 + $0x68] sm:$0xff] }
 0x40e   :  { %v1751_v27 = vmul.f32 0.5, %v2341_v24  ;;  %v1985_v24 = vld [vmem:[#allocation6 + $0x50] sm:$0xff] }
 0x40f   :  { %v1748_v28 = vadd.f32 0.5, %v1747_v26  ;;  %v1986_v26 = vld [vmem:[#allocation6 + $0x58] sm:$0xff] }
 0x410   :  { %v1752_v29 = vadd.f32 0.5, %v1751_v27  ;;  %v1983_v27 = vld [vmem:[#allocation6 + $0x40] sm:$0xff] }
 0x411   :  { %v2343_v30 = vpop.eup %2342 }
 0x412   :  { %v1758_v63 = vmul.f32 %v1752_v29, %v3502_v59  ;;  %v1759_v0 = vmul.f32 %v2343_v30, %v1748_v28  ;;  %v1984_v28 = vld [vmem:[#allocation6 + $0x48] sm:$0xff]  ;;  %v1981_v29 = vld [vmem:[#allocation6 + $0x30] sm:$0xff]  ;;  %v1982_v30 = vld [vmem:[#allocation6 + $0x38] sm:$0xff] }
 0x413   :  { %v2345_v31 = vpop.eup %2344 }
 0x414   :  { %v1760_v32 = vadd.f32 %v1759_v0, %v1758_v63  ;;  %v1756_v34 = vmul.f32 0.5, %v2345_v31  ;;  %v2049_v63 = vld [vmem:[%s3643_s1] sm:$0xf]  ;;  %v1979_v0 = vld [vmem:[#allocation6 + $0x20] sm:$0xff]  ;;  %v1980_v31 = vld [vmem:[#allocation6 + $0x28] sm:$0xff] }
 0x416   :  { %2346 = vtanh.f32 %v1760_v32  ;;  %v1757_v4 = vadd.f32 0.5, %v1756_v34  ;;  %v1977_v34 = vld [vmem:[#allocation6 + $0x10] sm:$0xff] }
 0x41c   :  { %v2347_v58 = vpop.eup %2346 }
 0x41d   :  { %v1762_v46 = vmul.f32 %v2347_v58, %v1757_v4  ;;  %v1978_v4 = vld [vmem:[#allocation6 + $0x18] sm:$0xff]  ;;  %v1975_v58 = vld [vmem:[#allocation6] sm:$0xff] }
 0x41f   :  { %1783 = vmatmul.f32.vlgmr.msra.gmra.mxu0 %v1762_v46  ;;  %1803 = vmatmul.f32.vlgmr.msrb.gmra.mxu1 %v1762_v46 }
 0x420   :  { %1823 = vmatmul.f32.vlgmr.msra.gmra.mxu2 %v1762_v46  ;;  %1843 = vmatmul.f32.vlgmr.msrb.gmra.mxu3 %v1762_v46  ;;  %v1976_v46 = vld [vmem:[#allocation6 + $0x8] sm:$0xff] }
 0x421   :  { %2007 = vmatpush.msra.mxu0 %v2005_v39  ;;  %2027 = vmatpush.msrb.mxu1 %v2006_v38  ;;  %v2056_v39 = vld [vmem:[%s3644_s2] sm:$0xf]  ;;  %v1869_v38 = vld [vmem:[#allocation2 + $0xa0] sm:$0x3f] }
 0x423   :  { %2008 = vmatpush.msra.mxu0 %v2003_v55  ;;  %2028 = vmatpush.msrb.mxu1 %v2004_v56  ;;  %v2047_v56 = vlaneseq }
 0x425   :  { %2009 = vmatpush.msra.mxu0 %v2001_v25  ;;  %2029 = vmatpush.msrb.mxu1 %v2002_v8  ;;  %v2048_v25 = vand.u32 127, %v2047_v56 }
 0x427   :  { %2010 = vmatpush.msra.mxu0 %v1999_v9  ;;  %2030 = vmatpush.msrb.mxu1 %v2000_v10  ;;  %v2138_v10 = vld [vmem:[%s3651_s9 + $0x78] sm:$0xff] }
 0x429   :  { %2011 = vmatpush.msra.mxu0 %v1997_v11  ;;  %2031 = vmatpush.msrb.mxu1 %v1998_v13  ;;  %v3875_v11 = vmov 0.0  }
 0x42b   :  { %2012 = vmatpush.msra.mxu0 %v1995_v14  ;;  %2032 = vmatpush.msrb.mxu1 %v1996_v15  ;;  %v2137_v15 = vld [vmem:[%s3651_s9 + $0x70] sm:$0xff] }
 0x42d   :  { %2013 = vmatpush.msra.mxu0 %v1993_v16  ;;  %2033 = vmatpush.msrb.mxu1 %v1994_v17  ;;  %v2136_v16 = vld [vmem:[%s3651_s9 + $0x68] sm:$0xff]  ;;  %v2135_v17 = vld [vmem:[%s3651_s9 + $0x60] sm:$0xff] }
 0x42f   :  { %2014 = vmatpush.msra.mxu0 %v1991_v18  ;;  %2034 = vmatpush.msrb.mxu1 %v1992_v19  ;;  %v2134_v18 = vld [vmem:[%s3651_s9 + $0x58] sm:$0xff]  ;;  %v2133_v19 = vld [vmem:[%s3651_s9 + $0x50] sm:$0xff] }
 0x431   :  { %2015 = vmatpush.msra.mxu0 %v1989_v20  ;;  %2035 = vmatpush.msrb.mxu1 %v1990_v21  ;;  %v2132_v20 = vld [vmem:[%s3651_s9 + $0x48] sm:$0xff]  ;;  %v2131_v21 = vld [vmem:[%s3651_s9 + $0x40] sm:$0xff] }
 0x433   :  { %2016 = vmatpush.msra.mxu0 %v1987_v22  ;;  %2036 = vmatpush.msrb.mxu1 %v1988_v23  ;;  %v2130_v22 = vld [vmem:[%s3651_s9 + $0x38] sm:$0xff]  ;;  %v2129_v23 = vld [vmem:[%s3651_s9 + $0x30] sm:$0xff] }
 0x435   :  { %2017 = vmatpush.msra.mxu0 %v1985_v24  ;;  %2037 = vmatpush.msrb.mxu1 %v1986_v26  ;;  %v2128_v24 = vld [vmem:[%s3651_s9 + $0x28] sm:$0xff]  ;;  %v2127_v26 = vld [vmem:[%s3651_s9 + $0x20] sm:$0xff] }
 0x437   :  { %2018 = vmatpush.msra.mxu0 %v1983_v27  ;;  %2038 = vmatpush.msrb.mxu1 %v1984_v28  ;;  %v2126_v27 = vld [vmem:[%s3651_s9 + $0x18] sm:$0xff]  ;;  %v2125_v28 = vld [vmem:[%s3651_s9 + $0x10] sm:$0xff] }
 0x439   :  { %2019 = vmatpush.msra.mxu0 %v1981_v29  ;;  %2039 = vmatpush.msrb.mxu1 %v1982_v30  ;;  %v2124_v29 = vld [vmem:[%s3651_s9 + $0x8] sm:$0xff]  ;;  %v2123_v30 = vld [vmem:[%s3651_s9] sm:$0xff] }
 0x43b   :  { %2020 = vmatpush.msra.mxu0 %v1979_v0  ;;  %2040 = vmatpush.msrb.mxu1 %v1980_v31 }
 0x43d   :  { %2021 = vmatpush.msra.mxu0 %v1977_v34  ;;  %2041 = vmatpush.msrb.mxu1 %v1978_v4 }
 0x43f   :  { %2022 = vmatpush.msra.mxu0 %v1975_v58  ;;  %2042 = vmatpush.msrb.mxu1 %v1976_v46  ;;  %v2285_v58 = vld [vmem:[%s3652_s10] ss:$0 sm:$0xff] }
 0x49c   :  { %v1784_v5 = vpop.f32.mrf.mxu0  ;;  %v1804_v1 = vpop.f32.mrf.mxu1 }
 0x49d   :  { %v1847_v61 = vadd.f32 %v1784_v5, %v1763_v42  ;;  %v1848_v41 = vadd.f32 %v1804_v1, %v1764_v3  ;;  %v1870_v5 = vld [vmem:[#allocation2 + $0xf8] sm:$0x3f] }
 0x49f   :  { %v1851_v59 = vmul.f32 0.5, %v1847_v61  ;;  %v1855_v54 = vmul.f32 0.5, %v1848_v41 }
 0x4a1   :  { %2348 = vtanh.f32 %v1851_v59 }
 0x4a2   :  { %2350 = vtanh.f32 %v1855_v54  ;;  %v1871_v54 = vld [vmem:[#allocation2 + $0x20] sm:$0x3f] }
 0x4a3   :  { %v1824_v36 = vpop.f32.mrf.mxu2  ;;  %v1844_v49 = vpop.f32.mrf.mxu3 }
 0x4a4   :  { %v1849_v40 = vadd.f32 %v1824_v36, %v1765_v37  ;;  %v1850_v47 = vadd.f32 %v1844_v49, %v1766_v50  ;;  %v1872_v36 = vld [vmem:[#allocation2 + $0x98] sm:$0x3f] }
 0x4a6   :  { %2352 = vtanh.f32 %v1849_v40  ;;  %v1860_v60 = vmul.f32 0.5, %v1850_v47 }
 0x4a7   :  { %v2349_v35 = vpop.eup %2348 }
 0x4a8   :  { %v2351_v48 = vpop.eup %2350  ;;  %v1853_v45 = vmul.f32 0.5, %v2349_v35  ;;  %2354 = vtanh.f32 %v1860_v60 }
 0x4a9   :  { %v1857_v6 = vmul.f32 0.5, %v2351_v48 }
 0x4aa   :  { %v1854_v12 = vadd.f32 0.5, %v1853_v45 }
 0x4ab   :  { %v1858_v52 = vadd.f32 0.5, %v1857_v6 }
 0x4ac   :  { %v2353_v43 = vpop.eup %2352 }
 0x4ad   :  { %v1864_v62 = vmul.f32 %v1858_v52, %v1760_v32  ;;  %v1865_v53 = vmul.f32 %v2353_v43, %v1854_v12  ;;  %v2493_v32 = vmov 0  }
 0x4ae   :  { %v2355_v7 = vpop.eup %2354  ;;  %2283 = vset.pattern.permute.xlu0 %v2493_v32 }
 0x4af   :  { %v3570_v33 = vadd.f32 %v1865_v53, %v1864_v62  ;;  %v1862_v57 = vmul.f32 0.5, %v2355_v7  ;;  %2051 = vperm.xlu0 %2283, %v2049_v63   ;;  %v2284_v63 = vld [vmem:[%s3650_s8] ss:$0 sm:$0xff] }
 0x4b1   :  { %2356 = vtanh.f32 %v3570_v33  ;;  %v1863_v51 = vadd.f32 0.5, %v1862_v57 }
 0x4b7   :  { %v2357_v2 = vpop.eup %2356  ;;  %2058 = vperm.xlu0 %2283, %v2056_v39  }
 0x4b8   :  { %v1868_v44 = vmul.f32 %v2357_v2, %v1863_v51 }
 0x4ba   :  { %1889 = vmatmul.f32.vlgmr.msrb.gmra.mxu0 %v1868_v44  ;;  %1909 = vmatmul.f32.vlgmr.msra.gmra.mxu1 %v1868_v44 }
 0x4bb   :  { %1929 = vmatmul.f32.vlgmr.msrb.gmra.mxu2 %v1868_v44  ;;  %1949 = vmatmul.f32.vlgmr.msra.gmra.mxu3 %v1868_v44 }
 0x521   :  { %v2052_v55 = vpop.permute.xlu0 %2051 }
 0x522   :  { %vm2053_vm2 = vcmp.eq.s32.totalorder %v2048_v25, %v2052_v55 }
 0x523   :  { %v2269_v13 = vsel %vm2053_vm2, 1.0, %v3875_v11 }
 0x529   :  { %v2059_v8 = vpop.permute.xlu0 %2058 }
 0x52a   :  { %vm2060_vm3 = vcmp.eq.s32.totalorder %v2048_v25, %v2059_v8 }
 0x52b   :  { %v2270_v14 = vsel %vm2060_vm3, 1.0, %v3875_v11 }
 0x537   :  { %v1890_v42 = vpop.f32.mrf.mxu0  ;;  %v1910_v3 = vpop.f32.mrf.mxu1 }
 0x538   :  { %v1953_v1 = vadd.f32 %v1890_v42, %v1869_v38  ;;  %v1954_v61 = vadd.f32 %v1910_v3, %v1870_v5  ;;  %v2286_v38 = vld [vmem:[%s3653_s11] ss:$0 sm:$0xff] }
 0x53a   :  { %v1957_v41 = vmul.f32 0.5, %v1953_v1  ;;  %v1961_v59 = vmul.f32 0.5, %v1954_v61  ;;  %v2287_v1 = vld [vmem:[#allocation3] ss:$0 sm:$0xff] }
 0x53c   :  { %2358 = vtanh.f32 %v1957_v41 }
 0x53d   :  { %2360 = vtanh.f32 %v1961_v59 }
 0x53e   :  { %v1930_v37 = vpop.f32.mrf.mxu2  ;;  %v1950_v50 = vpop.f32.mrf.mxu3 }
 0x53f   :  { %v1955_v49 = vadd.f32 %v1930_v37, %v1871_v54  ;;  %v1956_v40 = vadd.f32 %v1950_v50, %v1872_v36 }
 0x541   :  { %2362 = vtanh.f32 %v1955_v49  ;;  %v1966_v47 = vmul.f32 0.5, %v1956_v40 }
 0x542   :  { %v2359_v60 = vpop.eup %2358 }
 0x543   :  { %v2361_v35 = vpop.eup %2360  ;;  %v1959_v48 = vmul.f32 0.5, %v2359_v60  ;;  %2364 = vtanh.f32 %v1966_v47 }
 0x544   :  { %v1963_v45 = vmul.f32 0.5, %v2361_v35 }
 0x545   :  { %v1960_v6 = vadd.f32 0.5, %v1959_v48 }
 0x546   :  { %v1964_v12 = vadd.f32 0.5, %v1963_v45 }
 0x547   :  { %v2363_v52 = vpop.eup %2362 }
 0x548   :  { %v1970_v43 = vmul.f32 %v1964_v12, %v3570_v33  ;;  %v1971_v62 = vmul.f32 %v2363_v52, %v1960_v6 }
 0x549   :  { %v2365_v53 = vpop.eup %2364 }
 0x54a   :  { %v1972_v7 = vadd.f32 %v1971_v62, %v1970_v43  ;;  %v1968_v57 = vmul.f32 0.5, %v2365_v53 }
 0x54c   :  { %2366 = vtanh.f32 %v1972_v7  ;;  %v1969_v51 = vadd.f32 0.5, %v1968_v57 }
 0x552   :  { %v2367_v2 = vpop.eup %2366 }
 0x553   :  { %v1974_v44 = vmul.f32 %v2367_v2, %v1969_v51 }
 0x555   :  { %2023 = vmatmul.f32.vlgmr.msra.gmra.mxu0 %v1974_v44  ;;  %2043 = vmatmul.f32.vlgmr.msrb.gmra.mxu1 %v1974_v44 }
 0x5d2   :  { %v2024_v9 = vpop.f32.mrf.mxu0  ;;  %v2044_v33 = vpop.f32.mrf.mxu1 }
 0x5d3   :  { %2271 = vmatpush.msk.msra.mxu2 %vm2067_vm4, %v2044_v33  ;;  %2273 = vmatpush.msk.msrb.mxu3 %vm2067_vm4, %v2024_v9 }
 0x5d4   :  { %2272 = vmatmul.msk.f32.vlgmr.msra.gmra.mxu2 %vm2063_vm5, %v2270_v14  ;;  %2274 = vmatmul.msk.f32.vlgmr.msrb.gmra.mxu3 %vm2063_vm5, %v2269_v13 }
 0x5d5   :  { %2143 = vmatpush.msrb.mxu2 %v2138_v10 }
 0x5d7   :  { %2144 = vmatpush.msrb.mxu2 %v2137_v15 }
 0x5d9   :  { %2145 = vmatpush.msrb.mxu2 %v2136_v16 }
 0x5db   :  { %2146 = vmatpush.msrb.mxu2 %v2135_v17 }
 0x5dd   :  { %2147 = vmatpush.msrb.mxu2 %v2134_v18 }
 0x5df   :  { %2148 = vmatpush.msrb.mxu2 %v2133_v19 }
 0x5e1   :  { %2149 = vmatpush.msrb.mxu2 %v2132_v20 }
 0x5e3   :  { %2150 = vmatpush.msrb.mxu2 %v2131_v21 }
 0x5e5   :  { %2151 = vmatpush.msrb.mxu2 %v2130_v22 }
 0x5e7   :  { %2152 = vmatpush.msrb.mxu2 %v2129_v23 }
 0x5e9   :  { %2153 = vmatpush.msrb.mxu2 %v2128_v24 }
 0x5eb   :  { %2154 = vmatpush.msrb.mxu2 %v2127_v26 }
 0x5ed   :  { %2155 = vmatpush.msrb.mxu2 %v2126_v27 }
 0x5ef   :  { %2156 = vmatpush.msrb.mxu2 %v2125_v28 }
 0x5f1   :  { %2157 = vmatpush.msrb.mxu2 %v2124_v29 }
 0x5f3   :  { %2158 = vmatpush.msrb.mxu2 %v2123_v30 }
 0x657   :  { %v2088_v0 = vpop.f32.mrf.mxu2  ;;  %v2114_v31 = vpop.f32.mrf.mxu3 }
 0x658   :  { %v2115_v32 = vadd.f32 %v2114_v31, %v2088_v0 }
 0x65a   :  { %v2121_v34 = vadd.f32 %v2284_v63, %v2115_v32 }
 0x65c   :  { %v2122_v4 = vmax.f32 %v2121_v34, 0.0 }
 0x65e   :  { %2159 = vmatmul.f32.vlgmr.msrb.gmra.mxu2 %v2122_v4 }
 0x6e1   :  { %v2160_v46 = vpop.f32.mrf.mxu2 }
 0x6e2   :  { %v2161_v39 = vadd.f32 %v2285_v58, %v2160_v46 }
 0x6e4   :  { %v2163_v42 = vmax.f32 %v2161_v39, 0.0 }
 0x6e6   :  { %v2168_v5 = vmul.f32 %v2286_v38, %v2163_v42 }
 0x6e8   :  { %v2170_v3 = vsel %vm2169_vm6, %v2168_v5, 0.0 }
 0x6e9   :  { %2171 = vadd.xlane.f32.xlu1 %v2170_v3 }
 0x75c   :  { %v2172_v61 = vpop.xlane.xlu1 %2171 }
 0x75d   :  { %v2177_v41 = vadd.f32 %v2287_v1, %v2172_v61 }
 0x75f   :  { %v2178_v59 = vmul.f32 0.5, %v2177_v41 }
 0x761   :  { %2368 = vtanh.f32 %v2178_v59 }
 0x767   :  { %v2369_v54 = vpop.eup %2368 }
 0x768   :  { %v2180_v37 = vmul.f32 0.5, %v2369_v54 }
 0x76a   :  { %v2181_v36 = vadd.f32 0.5, %v2180_v37 }
 0x76c   :  { %2183 = vst.msk [vmem:[%s3655_s13] sm:$0xf] %vm2182_vm7, %v2181_v36 }
 0x76d   :  { %2188 = vsyncpa [#allocation5], 1 }
 0x76e   :  { %2189 = vsyncpa [#allocation7], 1 }

</bundles_post_ra>
